<compile_context>
chip_gen: v6e
topology: v6e:2x2x1
jax: 0.10.0
libtpu: 0.0.40
codegen_flags: <defaults>
</compile_context>

<pallas_src>
import functools
import math

import jax
import jax.numpy as jnp
import numpy as np
from jax.experimental import pallas as pl
from jax.experimental.pallas import tpu as pltpu

D_MODEL = 64
NHEAD = 8
HEAD_DIM = D_MODEL // NHEAD
DIM_FF = 2048          # nn.TransformerEncoderLayer default dim_feedforward
NUM_LAYERS = 2
LN_EPS = 1e-5
HEAD_HIDDEN = 32
HEAD_OUT_PAD = 8       # 2 + 2 + 1 head outputs padded to 8 lanes
FF_CHUNK = 512         # feed-forward streamed/computed in 512-lane chunks
FF_WEIGHTS_DTYPE = jnp.float32   # jnp.bfloat16 on v5e/v6e halves HBM bytes (rtol ~1e-2)


def _layernorm(x, w, b):
    mu = jnp.mean(x, axis=-1, keepdims=True)
    var = jnp.mean((x - mu) ** 2, axis=-1, keepdims=True)
    return (x - mu) * jax.lax.rsqrt(var + LN_EPS) * w + b


# ---------------- the single fused, pipelined kernel ----------------
def fused_kernel(seq_ref, static_ref,
                 wproj_ref, bproj_ref,
                 wqh_ref, bqh_ref, wkh_ref, bkh_ref, wvo_ref, bo_ref,
                 ln1w_ref, ln1b_ref, ln2w_ref, ln2b_ref,
                 w1_ref, b1_ref, w2_ref, b2_ref,
                 wh1s_ref, wh1t_ref, bh1_ref, wh2_ref, bh2_ref,
                 out_ref,
                 x_scr, ff_scr,
                 *, batch, seq_len):
    B, S = batch, seq_len
    N = B * S
    scale = 1.0 / math.sqrt(HEAD_DIM)
    l = pl.program_id(0)
    c = pl.program_id(1)
    last_l = pl.num_programs(0) - 1
    last_c = pl.num_programs(1) - 1

    # ---- grid step (0, 0): sequence projection into the resident x scratch ----
    @pl.when(jnp.logical_and(l == 0, c == 0))
    def _():
        x0 = seq_ref[...].reshape(N, seq_ref.shape[-1]).astype(jnp.float32)
        x_scr[...] = (jnp.dot(x0, wproj_ref[...],
                              preferred_element_type=jnp.float32) + bproj_ref[...])

    # ---- chunk 0 of every layer: self-attention + residual + LN1 ----
    @pl.when(c == 0)
    def _():
        x = x_scr[...]
        # bo already contains the folded V bias (bv @ wo): start accumulation there.
        attn = jnp.zeros((N, D_MODEL), jnp.float32) + bo_ref[...]
        for h in range(NHEAD):                              # statically unrolled
            qh = (jnp.dot(x, wqh_ref[h], preferred_element_type=jnp.float32)
                  + bqh_ref[h])                             # (N, HEAD_DIM)
            kh = (jnp.dot(x, wkh_ref[h], preferred_element_type=jnp.float32)
                  + bkh_ref[h])                             # (N, HEAD_DIM)
            vh = jnp.dot(x, wvo_ref[h],
                         preferred_element_type=jnp.float32)  # (N, D), out-proj folded
            q3 = qh.reshape(B, S, HEAD_DIM)
            k3 = kh.reshape(B, S, HEAD_DIM)
            v3 = vh.reshape(B, S, D_MODEL)
            s = jnp.einsum('bqd,bkd->bqk', q3, k3,
                           preferred_element_type=jnp.float32) * scale
            s = s - jnp.max(s, axis=-1, keepdims=True)
            p = jnp.exp(s)
            p = p * pl.reciprocal(jnp.sum(p, axis=-1, keepdims=True), approx=False)
            attn = attn + jnp.einsum('bqk,bkd->bqd', p, v3,
                                     preferred_element_type=jnp.float32
                                     ).reshape(N, D_MODEL)
        x1 = _layernorm(x + attn, ln1w_ref[...], ln1b_ref[...])
        x_scr[...] = x1                     # x no longer needed; keep x1 resident
        ff_scr[...] = jnp.zeros((N, D_MODEL), jnp.float32) + b2_ref[...]

    # ---- every grid step: one FF_CHUNK-wide slice of the feed-forward ----
    # Exact: ReLU is per-column and FF2 sums over columns, so chunks accumulate.
    x1 = x_scr[...]
    h1 = jnp.maximum(
        jnp.dot(x1.astype(w1_ref.dtype), w1_ref[...],
                preferred_element_type=jnp.float32) + b1_ref[...], 0.0)
    ff_scr[...] += jnp.dot(h1.astype(w2_ref.dtype), w2_ref[...],
                           preferred_element_type=jnp.float32)

    # ---- last chunk of every layer: FF residual + LN2 ----
    @pl.when(c == last_c)
    def _():
        x_scr[...] = _layernorm(x_scr[...] + ff_scr[...],
                                ln2w_ref[...], ln2b_ref[...])

    # ---- final grid step: mean-pool over seq + fused (stacked) heads ----
    @pl.when(jnp.logical_and(l == last_l, c == last_c))
    def _():
        pooled = jnp.mean(x_scr[...].reshape(B, S, D_MODEL), axis=1)   # (B, D)
        # fusion @ W1  ==  pooled @ W1_seq + static @ W1_static  (no lane concat)
        hh = (jnp.dot(pooled, wh1s_ref[...], preferred_element_type=jnp.float32)
              + jnp.dot(static_ref[...].astype(jnp.float32), wh1t_ref[...],
                        preferred_element_type=jnp.float32)
              + bh1_ref[...])
        hh = jnp.maximum(hh, 0.0)
        out_ref[...] = (jnp.dot(hh, wh2_ref[...], preferred_element_type=jnp.float32)
                        + bh2_ref[...]).astype(out_ref.dtype)


# ---------------- host-side parameter preparation (one time) ----------------
def prepare_kernel_params(p):
    """Pre-transpose to (in,out), split q/k per head, fold wo into V, stack layers."""
    L = p['layers']

    def stack(fn):
        return jnp.stack([fn(lp) for lp in L], axis=0)

    def per_head(w_t):                  # (D_in, D_out) -> (H, D_in, HEAD_DIM)
        return w_t.reshape(D_MODEL, NHEAD, HEAD_DIM).transpose(1, 0, 2)

    # q/k weights pre-split per head: (L, H, D, HEAD_DIM); biases (L, H, 1, HEAD_DIM)
    wqh = stack(lambda lp: per_head(lp['wqkv'][:D_MODEL, :].T))
    wkh = stack(lambda lp: per_head(lp['wqkv'][D_MODEL:2 * D_MODEL, :].T))
    bqh = stack(lambda lp: lp['bqkv'][:, :D_MODEL].reshape(NHEAD, 1, HEAD_DIM))
    bkh = stack(lambda lp: lp['bqkv'][:, D_MODEL:2 * D_MODEL].reshape(NHEAD, 1, HEAD_DIM))

    # fold out-projection into V:  wvo[l,h] = wv_h @ wo_h   (L, H, D, D)
    def fold_vo(lp):
        wv_t = lp['wqkv'][2 * D_MODEL:, :].T             # (D_in, D_out)
        wo_t = lp['wo'].T                                # (D_in, D_out)
        wv_h = per_head(wv_t)                            # (H, D, hd)
        wo_h = wo_t.reshape(NHEAD, HEAD_DIM, D_MODEL)    # (H, hd, D)
        return jnp.einsum('hik,hkj->hij', wv_h, wo_h)    # (H, D, D)
    wvo = stack(fold_vo)
    # fold V bias through wo (softmax rows sum to 1):  bo' = bo + bv @ wo^T
    bo = stack(lambda lp: lp['bo'] + lp['bqkv'][:, 2 * D_MODEL:] @ lp['wo'].T)

    ln1w = stack(lambda lp: lp['ln1w'])
    ln1b = stack(lambda lp: lp['ln1b'])
    ln2w = stack(lambda lp: lp['ln2w'])
    ln2b = stack(lambda lp: lp['ln2b'])
    w1 = stack(lambda lp: lp['w1'].T).astype(FF_WEIGHTS_DTYPE)       # (L, D, FF)
    b1 = stack(lambda lp: lp['b1'])                                  # (L, 1, FF)
    w2 = stack(lambda lp: lp['w2'].T).astype(FF_WEIGHTS_DTYPE)       # (L, FF, D)
    b2 = stack(lambda lp: lp['b2'])                                  # (L, 1, D)

    wproj = p['seq_proj_w'].T                                        # (F_seq, D)
    bproj = p['seq_proj_b']                                          # (1, D)

    # stacked first layer of the 3 heads: (fusion_dim, 96), split pooled/static rows
    wh1 = jnp.concatenate([p['bp24_w1'], p['bp3_w1'], p['risk_w1']], axis=0).T
    wh1_seq = wh1[:D_MODEL, :]                                       # (D, 96)
    wh1_static = wh1[D_MODEL:, :]                                    # (F_static, 96)
    bh1 = jnp.concatenate([p['bp24_b1'], p['bp3_b1'], p['risk_b1']], axis=1)  # (1, 96)

    # block-diagonal second layer, padded to 8 output lanes
    wh2 = jnp.zeros((3 * HEAD_HIDDEN, HEAD_OUT_PAD), jnp.float32)
    wh2 = wh2.at[0:32, 0:2].set(p['bp24_w2'].T)
    wh2 = wh2.at[32:64, 2:4].set(p['bp3_w2'].T)
    wh2 = wh2.at[64:96, 4:5].set(p['risk_w2'].T)
    bh2 = jnp.zeros((1, HEAD_OUT_PAD), jnp.float32)
    bh2 = bh2.at[:, 0:2].set(p['bp24_b2'])
    bh2 = bh2.at[:, 2:4].set(p['bp3_b2'])
    bh2 = bh2.at[:, 4:5].set(p['risk_b2'])

    return (wproj, bproj, wqh, bqh, wkh, bkh, wvo, bo,
            ln1w, ln1b, ln2w, ln2b, w1, b1, w2, b2,
            wh1_seq, wh1_static, bh1, wh2, bh2)


# ---------------- forward: one pallas_call, layer/FF-chunk grid -------------
def multitask_bp_forward(seq_input, static_input, kernel_params):
    B, S, F_seq = seq_input.shape
    F_static = static_input.shape[-1]
    N = B * S
    assert DIM_FF % FF_CHUNK == 0
    n_chunks = DIM_FF // FF_CHUNK
    kernel = functools.partial(fused_kernel, batch=B, seq_len=S)

    const2 = lambda l, c: (0, 0)
    layer3 = lambda l, c: (l, 0, 0)
    layer4 = lambda l, c: (l, 0, 0, 0)

    in_specs = [
        pl.BlockSpec((B, S, F_seq), lambda l, c: (0, 0, 0)),          # seq (fetched once)
        pl.BlockSpec((B, F_static), const2),                          # static
        pl.BlockSpec((F_seq, D_MODEL), const2),                       # wproj
        pl.BlockSpec((1, D_MODEL), const2),                           # bproj
        pl.BlockSpec((None, NHEAD, D_MODEL, HEAD_DIM), layer4),       # wqh  (per layer)
        pl.BlockSpec((None, NHEAD, 1, HEAD_DIM), layer4),             # bqh
        pl.BlockSpec((None, NHEAD, D_MODEL, HEAD_DIM), layer4),       # wkh
        pl.BlockSpec((None, NHEAD, 1, HEAD_DIM), layer4),             # bkh
        pl.BlockSpec((None, NHEAD, D_MODEL, D_MODEL), layer4),        # wvo
        pl.BlockSpec((None, 1, D_MODEL), layer3),                     # bo (folded)
        pl.BlockSpec((None, 1, D_MODEL), layer3),                     # ln1w
        pl.BlockSpec((None, 1, D_MODEL), layer3),                     # ln1b
        pl.BlockSpec((None, 1, D_MODEL), layer3),                     # ln2w
        pl.BlockSpec((None, 1, D_MODEL), layer3),                     # ln2b
        pl.BlockSpec((None, D_MODEL, FF_CHUNK), lambda l, c: (l, 0, c)),  # w1 chunk
        pl.BlockSpec((None, 1, FF_CHUNK), lambda l, c: (l, 0, c)),        # b1 chunk
        pl.BlockSpec((None, FF_CHUNK, D_MODEL), lambda l, c: (l, c, 0)),  # w2 chunk
        pl.BlockSpec((None, 1, D_MODEL), layer3),                     # b2
        pl.BlockSpec((D_MODEL, 3 * HEAD_HIDDEN), const2),             # wh1 (pooled rows)
        pl.BlockSpec((F_static, 3 * HEAD_HIDDEN), const2),            # wh1 (static rows)
        pl.BlockSpec((1, 3 * HEAD_HIDDEN), const2),                   # bh1
        pl.BlockSpec((3 * HEAD_HIDDEN, HEAD_OUT_PAD), const2),        # wh2 (block-diag)
        pl.BlockSpec((1, HEAD_OUT_PAD), const2),                      # bh2
    ]

    grid_spec = pltpu.PrefetchScalarGridSpec(
        num_scalar_prefetch=0,
        grid=(NUM_LAYERS, n_chunks),
        in_specs=in_specs,
        out_specs=pl.BlockSpec((B, HEAD_OUT_PAD), const2),
        scratch_shapes=[pltpu.VMEM((N, D_MODEL), jnp.float32),    # x / x1 carry
                        pltpu.VMEM((N, D_MODEL), jnp.float32)],   # FF accumulator
    )

    # advisory cost so XLA schedules neighbours around this tiny custom call
    params_bytes = sum(int(w.size) * w.dtype.itemsize for w in kernel_params)
    flops = (2 * N * F_seq * D_MODEL
             + NUM_LAYERS * (2 * N * D_MODEL * (2 * D_MODEL + NHEAD * D_MODEL)
                             + 2 * NHEAD * B * S * S * (HEAD_DIM + D_MODEL)
                             + 4 * N * D_MODEL * DIM_FF)
             + 2 * B * (D_MODEL + F_static) * 3 * HEAD_HIDDEN
             + 2 * B * 3 * HEAD_HIDDEN * HEAD_OUT_PAD)
    transcendentals = NUM_LAYERS * (NHEAD * B * S * S + 2 * N)
    bytes_accessed = (params_bytes
                      + seq_input.size * seq_input.dtype.itemsize
                      + static_input.size * static_input.dtype.itemsize
                      + B * HEAD_OUT_PAD * 4)

    out = pl.pallas_call(
        kernel,
        grid_spec=grid_spec,
        out_shape=jax.ShapeDtypeStruct((B, HEAD_OUT_PAD), jnp.float32),
        compiler_params=pltpu.CompilerParams(
            # Both axes carry the resident x/ff scratch -> "arbitrary".
            # On v7x a leading "parallel" batch-chunk axis can use the 2nd TensorCore
            # when serving batches large enough to split.
            dimension_semantics=("arbitrary", "arbitrary")),
        cost_estimate=pl.CostEstimate(flops=int(flops),
                                      transcendentals=int(transcendentals),
                                      bytes_accessed=int(bytes_accessed)),
    )(seq_input, static_input, *kernel_params)
    return out[:, 0:2], out[:, 2:4], out[:, 4:5]


# ---------------- parameters (deterministic, PyTorch-like uniform init) ---------
def init_params(key, seq_input_dim, static_input_dim):
    keys = iter(jax.random.split(key, 64))

    def dense(out_dim, in_dim):
        bound = 1.0 / math.sqrt(in_dim)
        w = jax.random.uniform(next(keys), (out_dim, in_dim), jnp.float32,
                               -bound, bound)
        b = jax.random.uniform(next(keys), (1, out_dim), jnp.float32,
                               -bound, bound)
        return w, b

    p = {}
    p['seq_proj_w'], p['seq_proj_b'] = dense(D_MODEL, seq_input_dim)

    layers = []
    for _ in range(NUM_LAYERS):
        wqkv, bqkv = dense(3 * D_MODEL, D_MODEL)
        wo, bo = dense(D_MODEL, D_MODEL)
        w1, b1 = dense(DIM_FF, D_MODEL)
        w2, b2 = dense(D_MODEL, DIM_FF)
        layers.append(dict(
            wqkv=wqkv, bqkv=bqkv, wo=wo, bo=bo,
            ln1w=jnp.ones((1, D_MODEL), jnp.float32),
            ln1b=jnp.zeros((1, D_MODEL), jnp.float32),
            ln2w=jnp.ones((1, D_MODEL), jnp.float32),
            ln2b=jnp.zeros((1, D_MODEL), jnp.float32),
            w1=w1, b1=b1, w2=w2, b2=b2))
    p['layers'] = layers

    fusion_dim = D_MODEL + static_input_dim
    for name, out_dim in (('bp24', 2), ('bp3', 2), ('risk', 1)):
        p[f'{name}_w1'], p[f'{name}_b1'] = dense(HEAD_HIDDEN, fusion_dim)
        p[f'{name}_w2'], p[f'{name}_b2'] = dense(out_dim, HEAD_HIDDEN)
    return p


# ---------------- pure-JAX reference for validation ----------------
def _ref_layer(x, lp):
    B, S, D = x.shape
    qkv = x @ lp['wqkv'].T + lp['bqkv']
    q, k, v = qkv[..., :D], qkv[..., D:2 * D], qkv[..., 2 * D:]
    q = q.reshape(B, S, NHEAD, HEAD_DIM)
    k = k.reshape(B, S, NHEAD, HEAD_DIM)
    v = v.reshape(B, S, NHEAD, HEAD_DIM)
    s = jnp.einsum('bqhd,bkhd->bhqk', q, k) / math.sqrt(HEAD_DIM)
    p = jax.nn.softmax(s, axis=-1)
    attn = jnp.einsum('bhqk,bkhd->bqhd', p, v).reshape(B, S, D)
    attn = attn @ lp['wo'].T + lp['bo']
    x1 = _layernorm(x + attn, lp['ln1w'], lp['ln1b'])
    h = jax.nn.relu(x1 @ lp['w1'].T + lp['b1'])
    return _layernorm(x1 + h @ lp['w2'].T + lp['b2'], lp['ln2w'], lp['ln2b'])


def reference_forward(seq_input, static_input, params):
    x = seq_input @ params['seq_proj_w'].T + params['seq_proj_b']
    for lp in params['layers']:
        x = _ref_layer(x, lp)
    pooled = x.mean(axis=1)
    fusion = jnp.concatenate([pooled, static_input], axis=1)

    def mlp(prefix):
        h = jax.nn.relu(fusion @ params[f'{prefix}_w1'].T + params[f'{prefix}_b1'])
        return h @ params[f'{prefix}_w2'].T + params[f'{prefix}_b2']

    return mlp('bp24'), mlp('bp3'), mlp('risk')


if __name__ == "__main__":
    B, S = 2, 8
    SEQ_INPUT_DIM = 16
    STATIC_INPUT_DIM = 16

    key = jax.random.PRNGKey(0)
    k_params, k_seq, k_static = jax.random.split(key, 3)
    params = init_params(k_params, SEQ_INPUT_DIM, STATIC_INPUT_DIM)
    kernel_params = prepare_kernel_params(params)   # one-time host-side prep

    seq_input = jax.random.normal(k_seq, (B, S, SEQ_INPUT_DIM), jnp.float32)
    static_input = jax.random.normal(k_static, (B, STATIC_INPUT_DIM), jnp.float32)

    bp24, bp3, risk = jax.block_until_ready(
        multitask_bp_forward(seq_input, static_input, kernel_params))

    bp24_r, bp3_r, risk_r = reference_forward(seq_input, static_input, params)
    np.testing.assert_allclose(np.asarray(bp24), np.asarray(bp24_r), rtol=2e-3, atol=2e-4)
    np.testing.assert_allclose(np.asarray(bp3), np.asarray(bp3_r), rtol=2e-3, atol=2e-4)
    np.testing.assert_allclose(np.asarray(risk), np.asarray(risk_r), rtol=2e-3, atol=2e-4)

    assert bp24.shape == (B, 2) and bp3.shape == (B, 2) and risk.shape == (B, 1)
    print("KERNEL_OK")
</pallas_src>

<mosaic_0001>
module attributes {stable_mosaic.version = 11 : i64} {
  func.func @fused_kernel(%arg0: i32, %arg1: i32, %arg2: memref<2x8x16xf32, #tpu.memory_space<vmem>>, %arg3: memref<2x16xf32, #tpu.memory_space<vmem>>, %arg4: memref<16x64xf32, #tpu.memory_space<vmem>>, %arg5: memref<1x64xf32, #tpu.memory_space<vmem>>, %arg6: memref<1x8x64x8xf32, #tpu.memory_space<vmem>>, %arg7: memref<1x8x1x8xf32, #tpu.memory_space<vmem>>, %arg8: memref<1x8x64x8xf32, #tpu.memory_space<vmem>>, %arg9: memref<1x8x1x8xf32, #tpu.memory_space<vmem>>, %arg10: memref<1x8x64x64xf32, #tpu.memory_space<vmem>>, %arg11: memref<1x1x64xf32, #tpu.memory_space<vmem>>, %arg12: memref<1x1x64xf32, #tpu.memory_space<vmem>>, %arg13: memref<1x1x64xf32, #tpu.memory_space<vmem>>, %arg14: memref<1x1x64xf32, #tpu.memory_space<vmem>>, %arg15: memref<1x1x64xf32, #tpu.memory_space<vmem>>, %arg16: memref<1x64x512xf32, #tpu.memory_space<vmem>>, %arg17: memref<1x1x512xf32, #tpu.memory_space<vmem>>, %arg18: memref<1x512x64xf32, #tpu.memory_space<vmem>>, %arg19: memref<1x1x64xf32, #tpu.memory_space<vmem>>, %arg20: memref<64x96xf32, #tpu.memory_space<vmem>>, %arg21: memref<16x96xf32, #tpu.memory_space<vmem>>, %arg22: memref<1x96xf32, #tpu.memory_space<vmem>>, %arg23: memref<96x8xf32, #tpu.memory_space<vmem>>, %arg24: memref<1x8xf32, #tpu.memory_space<vmem>>, %arg25: memref<2x8xf32, #tpu.memory_space<vmem>>, %arg26: memref<16x64xf32, #tpu.memory_space<vmem>>, %arg27: memref<16x64xf32, #tpu.memory_space<vmem>>) attributes {dimension_semantics = [#tpu.dimension_semantics<arbitrary>, #tpu.dimension_semantics<arbitrary>], iteration_bounds = array<i64: 2, 4>, scalar_prefetch = 0 : i64, scratch_operands = 2 : i64, tpu.core_type = #tpu.core_type<tc>, window_params = [{pipeline_mode = #tpu.pipeline_mode<synchronous>, transform_indices = @transform_0, window_bounds = array<i64: 2, 8, 16>}, {pipeline_mode = #tpu.pipeline_mode<synchronous>, transform_indices = @transform_1, window_bounds = array<i64: 2, 16>}, {pipeline_mode = #tpu.pipeline_mode<synchronous>, transform_indices = @transform_2, window_bounds = array<i64: 16, 64>}, {pipeline_mode = #tpu.pipeline_mode<synchronous>, transform_indices = @transform_3, window_bounds = array<i64: 1, 64>}, {transform_indices = @transform_4, window_bounds = array<i64: 1, 8, 64, 8>}, {transform_indices = @transform_5, window_bounds = array<i64: 1, 8, 1, 8>}, {transform_indices = @transform_6, window_bounds = array<i64: 1, 8, 64, 8>}, {transform_indices = @transform_7, window_bounds = array<i64: 1, 8, 1, 8>}, {transform_indices = @transform_8, window_bounds = array<i64: 1, 8, 64, 64>}, {transform_indices = @transform_9, window_bounds = array<i64: 1, 1, 64>}, {transform_indices = @transform_10, window_bounds = array<i64: 1, 1, 64>}, {transform_indices = @transform_11, window_bounds = array<i64: 1, 1, 64>}, {transform_indices = @transform_12, window_bounds = array<i64: 1, 1, 64>}, {transform_indices = @transform_13, window_bounds = array<i64: 1, 1, 64>}, {transform_indices = @transform_14, window_bounds = array<i64: 1, 64, 512>}, {transform_indices = @transform_15, window_bounds = array<i64: 1, 1, 512>}, {transform_indices = @transform_16, window_bounds = array<i64: 1, 512, 64>}, {transform_indices = @transform_17, window_bounds = array<i64: 1, 1, 64>}, {pipeline_mode = #tpu.pipeline_mode<synchronous>, transform_indices = @transform_18, window_bounds = array<i64: 64, 96>}, {pipeline_mode = #tpu.pipeline_mode<synchronous>, transform_indices = @transform_19, window_bounds = array<i64: 16, 96>}, {pipeline_mode = #tpu.pipeline_mode<synchronous>, transform_indices = @transform_20, window_bounds = array<i64: 1, 96>}, {pipeline_mode = #tpu.pipeline_mode<synchronous>, transform_indices = @transform_21, window_bounds = array<i64: 96, 8>}, {pipeline_mode = #tpu.pipeline_mode<synchronous>, transform_indices = @transform_22, window_bounds = array<i64: 1, 8>}, {pipeline_mode = #tpu.pipeline_mode<synchronous>, transform_indices = @transform_23, window_bounds = array<i64: 2, 8>}]} {
    %c0_i32 = arith.constant 0 : i32
    %0 = arith.cmpi eq, %arg0, %c0_i32 : i32
    %c0_i32_0 = arith.constant 0 : i32
    %1 = arith.cmpi eq, %arg1, %c0_i32_0 : i32
    %2 = arith.andi %0, %1 : i1
    %3 = arith.extui %2 : i1 to i32
    %c0_i32_1 = arith.constant 0 : i32
    %4 = arith.cmpi ne, %3, %c0_i32_1 : i32
    scf.if %4 {
      %c0_23 = arith.constant 0 : index
      %c0_24 = arith.constant 0 : index
      %c0_25 = arith.constant 0 : index
      %32 = vector.load %arg2[%c0_23, %c0_24, %c0_25] : memref<2x8x16xf32, #tpu.memory_space<vmem>>, vector<2x8x16xf32>
      %33 = vector.shape_cast %32 : vector<2x8x16xf32> to vector<16x16xf32>
      %c0_26 = arith.constant 0 : index
      %c0_27 = arith.constant 0 : index
      %34 = vector.load %arg4[%c0_26, %c0_27] : memref<16x64xf32, #tpu.memory_space<vmem>>, vector<16x64xf32>
      %cst_28 = arith.constant dense<0.000000e+00> : vector<16x64xf32>
      %35 = tpu.matmul %33, %34, %cst_28 {dimension_numbers = #tpu.dot_dimension_numbers<[1], [0], [0], [1], [0, 0, 1, 1], [], []>} : vector<16x16xf32>, vector<16x64xf32>, vector<16x64xf32> -> vector<16x64xf32>
      %c0_29 = arith.constant 0 : index
      %c0_30 = arith.constant 0 : index
      %36 = vector.load %arg5[%c0_29, %c0_30] : memref<1x64xf32, #tpu.memory_space<vmem>>, vector<1x64xf32>
      %37 = vector.broadcast %36 : vector<1x64xf32> to vector<16x64xf32>
      %38 = arith.addf %35, %37 : vector<16x64xf32>
      %c0_31 = arith.constant 0 : index
      %c0_32 = arith.constant 0 : index
      %39 = vector.load %arg26[%c0_31, %c0_32] : memref<16x64xf32, #tpu.memory_space<vmem>>, vector<16x64xf32>
      tpu.vector_store %arg26[%c0_31, %c0_32], %38 {strides = array<i32>} : memref<16x64xf32, #tpu.memory_space<vmem>>, vector<16x64xf32>,
    } else {
    }
    %c0_i32_2 = arith.constant 0 : i32
    %5 = arith.cmpi eq, %arg1, %c0_i32_2 : i32
    %6 = arith.extui %5 : i1 to i32
    %c0_i32_3 = arith.constant 0 : i32
    %7 = arith.cmpi ne, %6, %c0_i32_3 : i32
    scf.if %7 {
      %c0_23 = arith.constant 0 : index
      %c0_24 = arith.constant 0 : index
      %32 = vector.load %arg26[%c0_23, %c0_24] : memref<16x64xf32, #tpu.memory_space<vmem>>, vector<16x64xf32>
      %cst_25 = arith.constant 0.000000e+00 : f32
      %33 = vector.broadcast %cst_25 : f32 to vector<16x64xf32>
      %c0_26 = arith.constant 0 : index
      %c0_27 = arith.constant 0 : index
      %c0_28 = arith.constant 0 : index
      %34 = vector.load %arg11[%c0_26, %c0_27, %c0_28] : memref<1x1x64xf32, #tpu.memory_space<vmem>>, vector<1x1x64xf32>
      %35 = vector.shape_cast %34 : vector<1x1x64xf32> to vector<1x64xf32>
      %36 = vector.broadcast %35 : vector<1x64xf32> to vector<16x64xf32>
      %37 = arith.addf %33, %36 : vector<16x64xf32>
      %c0_29 = arith.constant 0 : index
      %c0_30 = arith.constant 0 : index
      %c0_31 = arith.constant 0 : index
      %c0_32 = arith.constant 0 : index
      %38 = vector.load %arg6[%c0_29, %c0_30, %c0_31, %c0_32] : memref<1x8x64x8xf32, #tpu.memory_space<vmem>>, vector<1x1x64x8xf32>
      %39 = vector.shape_cast %38 : vector<1x1x64x8xf32> to vector<64x8xf32>
      %cst_33 = arith.constant dense<0.000000e+00> : vector<16x8xf32>
      %40 = tpu.matmul %32, %39, %cst_33 {dimension_numbers = #tpu.dot_dimension_numbers<[1], [0], [0], [1], [0, 0, 1, 1], [], []>} : vector<16x64xf32>, vector<64x8xf32>, vector<16x8xf32> -> vector<16x8xf32>
      %c0_34 = arith.constant 0 : index
      %c0_35 = arith.constant 0 : index
      %c0_36 = arith.constant 0 : index
      %c0_37 = arith.constant 0 : index
      %41 = vector.load %arg7[%c0_34, %c0_35, %c0_36, %c0_37] : memref<1x8x1x8xf32, #tpu.memory_space<vmem>>, vector<1x1x1x8xf32>
      %42 = vector.shape_cast %41 : vector<1x1x1x8xf32> to vector<1x8xf32>
      %43 = vector.broadcast %42 : vector<1x8xf32> to vector<16x8xf32>
      %44 = arith.addf %40, %43 : vector<16x8xf32>
      %c0_38 = arith.constant 0 : index
      %c0_39 = arith.constant 0 : index
      %c0_40 = arith.constant 0 : index
      %c0_41 = arith.constant 0 : index
      %45 = vector.load %arg8[%c0_38, %c0_39, %c0_40, %c0_41] : memref<1x8x64x8xf32, #tpu.memory_space<vmem>>, vector<1x1x64x8xf32>
      %46 = vector.shape_cast %45 : vector<1x1x64x8xf32> to vector<64x8xf32>
      %cst_42 = arith.constant dense<0.000000e+00> : vector<16x8xf32>
      %47 = tpu.matmul %32, %46, %cst_42 {dimension_numbers = #tpu.dot_dimension_numbers<[1], [0], [0], [1], [0, 0, 1, 1], [], []>} : vector<16x64xf32>, vector<64x8xf32>, vector<16x8xf32> -> vector<16x8xf32>
      %c0_43 = arith.constant 0 : index
      %c0_44 = arith.constant 0 : index
      %c0_45 = arith.constant 0 : index
      %c0_46 = arith.constant 0 : index
      %48 = vector.load %arg9[%c0_43, %c0_44, %c0_45, %c0_46] : memref<1x8x1x8xf32, #tpu.memory_space<vmem>>, vector<1x1x1x8xf32>
      %49 = vector.shape_cast %48 : vector<1x1x1x8xf32> to vector<1x8xf32>
      %50 = vector.broadcast %49 : vector<1x8xf32> to vector<16x8xf32>
      %51 = arith.addf %47, %50 : vector<16x8xf32>
      %c0_47 = arith.constant 0 : index
      %c0_48 = arith.constant 0 : index
      %c0_49 = arith.constant 0 : index
      %c0_50 = arith.constant 0 : index
      %52 = vector.load %arg10[%c0_47, %c0_48, %c0_49, %c0_50] : memref<1x8x64x64xf32, #tpu.memory_space<vmem>>, vector<1x1x64x64xf32>
      %53 = vector.shape_cast %52 : vector<1x1x64x64xf32> to vector<64x64xf32>
      %cst_51 = arith.constant dense<0.000000e+00> : vector<16x64xf32>
      %54 = tpu.matmul %32, %53, %cst_51 {dimension_numbers = #tpu.dot_dimension_numbers<[1], [0], [0], [1], [0, 0, 1, 1], [], []>} : vector<16x64xf32>, vector<64x64xf32>, vector<16x64xf32> -> vector<16x64xf32>
      %55 = vector.shape_cast %44 : vector<16x8xf32> to vector<2x8x8xf32>
      %56 = vector.shape_cast %51 : vector<16x8xf32> to vector<2x8x8xf32>
      %57 = vector.shape_cast %54 : vector<16x64xf32> to vector<2x8x64xf32>
      "tpu.trace_start"() <{level = 10 : i32, message = "bqd,bkd->bqk"}> : () -> ()
      %cst_52 = arith.constant dense<0.000000e+00> : vector<2x8x8xf32>
      %58 = tpu.matmul %55, %56, %cst_52 {dimension_numbers = #tpu.dot_dimension_numbers<[2], [2], [1], [1], [0, 0, 0, 1, 1, 1], [0], [0]>} : vector<2x8x8xf32>, vector<2x8x8xf32>, vector<2x8x8xf32> -> vector<2x8x8xf32>
      "tpu.trace_stop"() : () -> ()
      %cst_53 = arith.constant 0.353553385 : f32
      %59 = vector.broadcast %cst_53 : f32 to vector<2x8x8xf32>
      %60 = arith.mulf %58, %59 : vector<2x8x8xf32>
      %cst_54 = arith.constant dense<0xFF800000> : vector<2x8xf32>
      %61 = vector.multi_reduction <maximumf>, %60, %cst_54 [2] : vector<2x8x8xf32> to vector<2x8xf32>
      %62 = vector.shape_cast %61 : vector<2x8xf32> to vector<2x8x1xf32>
      %63 = vector.broadcast %62 : vector<2x8x1xf32> to vector<2x8x8xf32>
      %64 = arith.subf %60, %63 : vector<2x8x8xf32>
      %65 = math.exp %64 : vector<2x8x8xf32>
      %cst_55 = arith.constant dense<0.000000e+00> : vector<2x8xf32>
      %66 = vector.multi_reduction <add>, %65, %cst_55 [2] : vector<2x8x8xf32> to vector<2x8xf32>
      %67 = vector.shape_cast %66 : vector<2x8xf32> to vector<2x8x1xf32>
      %68 = tpu.reciprocal %67 : vector<2x8x1xf32> -> vector<2x8x1xf32>
      %69 = vector.broadcast %68 : vector<2x8x1xf32> to vector<2x8x8xf32>
      %70 = arith.mulf %65, %69 : vector<2x8x8xf32>
      "tpu.trace_start"() <{level = 10 : i32, message = "bqk,bkd->bqd"}> : () -> ()
      %cst_56 = arith.constant dense<0.000000e+00> : vector<2x8x64xf32>
      %71 = tpu.matmul %70, %57, %cst_56 {dimension_numbers = #tpu.dot_dimension_numbers<[2], [1], [1], [2], [0, 0, 0, 1, 1, 2], [0], [0]>} : vector<2x8x8xf32>, vector<2x8x64xf32>, vector<2x8x64xf32> -> vector<2x8x64xf32>
      "tpu.trace_stop"() : () -> ()
      %72 = vector.shape_cast %71 : vector<2x8x64xf32> to vector<16x64xf32>
      %73 = arith.addf %37, %72 : vector<16x64xf32>
      %c0_57 = arith.constant 0 : index
      %c1 = arith.constant 1 : index
      %c0_58 = arith.constant 0 : index
      %c0_59 = arith.constant 0 : index
      %74 = vector.load %arg6[%c0_57, %c1, %c0_58, %c0_59] : memref<1x8x64x8xf32, #tpu.memory_space<vmem>>, vector<1x1x64x8xf32>
      %75 = vector.shape_cast %74 : vector<1x1x64x8xf32> to vector<64x8xf32>
      %cst_60 = arith.constant dense<0.000000e+00> : vector<16x8xf32>
      %76 = tpu.matmul %32, %75, %cst_60 {dimension_numbers = #tpu.dot_dimension_numbers<[1], [0], [0], [1], [0, 0, 1, 1], [], []>} : vector<16x64xf32>, vector<64x8xf32>, vector<16x8xf32> -> vector<16x8xf32>
      %c0_61 = arith.constant 0 : index
      %c1_62 = arith.constant 1 : index
      %c0_63 = arith.constant 0 : index
      %c0_64 = arith.constant 0 : index
      %77 = vector.load %arg7[%c0_61, %c1_62, %c0_63, %c0_64] : memref<1x8x1x8xf32, #tpu.memory_space<vmem>>, vector<1x1x1x8xf32>
      %78 = vector.shape_cast %77 : vector<1x1x1x8xf32> to vector<1x8xf32>
      %79 = vector.broadcast %78 : vector<1x8xf32> to vector<16x8xf32>
      %80 = arith.addf %76, %79 : vector<16x8xf32>
      %c0_65 = arith.constant 0 : index
      %c1_66 = arith.constant 1 : index
      %c0_67 = arith.constant 0 : index
      %c0_68 = arith.constant 0 : index
      %81 = vector.load %arg8[%c0_65, %c1_66, %c0_67, %c0_68] : memref<1x8x64x8xf32, #tpu.memory_space<vmem>>, vector<1x1x64x8xf32>
      %82 = vector.shape_cast %81 : vector<1x1x64x8xf32> to vector<64x8xf32>
      %cst_69 = arith.constant dense<0.000000e+00> : vector<16x8xf32>
      %83 = tpu.matmul %32, %82, %cst_69 {dimension_numbers = #tpu.dot_dimension_numbers<[1], [0], [0], [1], [0, 0, 1, 1], [], []>} : vector<16x64xf32>, vector<64x8xf32>, vector<16x8xf32> -> vector<16x8xf32>
      %c0_70 = arith.constant 0 : index
      %c1_71 = arith.constant 1 : index
      %c0_72 = arith.constant 0 : index
      %c0_73 = arith.constant 0 : index
      %84 = vector.load %arg9[%c0_70, %c1_71, %c0_72, %c0_73] : memref<1x8x1x8xf32, #tpu.memory_space<vmem>>, vector<1x1x1x8xf32>
      %85 = vector.shape_cast %84 : vector<1x1x1x8xf32> to vector<1x8xf32>
      %86 = vector.broadcast %85 : vector<1x8xf32> to vector<16x8xf32>
      %87 = arith.addf %83, %86 : vector<16x8xf32>
      %c0_74 = arith.constant 0 : index
      %c1_75 = arith.constant 1 : index
      %c0_76 = arith.constant 0 : index
      %c0_77 = arith.constant 0 : index
      %88 = vector.load %arg10[%c0_74, %c1_75, %c0_76, %c0_77] : memref<1x8x64x64xf32, #tpu.memory_space<vmem>>, vector<1x1x64x64xf32>
      %89 = vector.shape_cast %88 : vector<1x1x64x64xf32> to vector<64x64xf32>
      %cst_78 = arith.constant dense<0.000000e+00> : vector<16x64xf32>
      %90 = tpu.matmul %32, %89, %cst_78 {dimension_numbers = #tpu.dot_dimension_numbers<[1], [0], [0], [1], [0, 0, 1, 1], [], []>} : vector<16x64xf32>, vector<64x64xf32>, vector<16x64xf32> -> vector<16x64xf32>
      %91 = vector.shape_cast %80 : vector<16x8xf32> to vector<2x8x8xf32>
      %92 = vector.shape_cast %87 : vector<16x8xf32> to vector<2x8x8xf32>
      %93 = vector.shape_cast %90 : vector<16x64xf32> to vector<2x8x64xf32>
      "tpu.trace_start"() <{level = 10 : i32, message = "bqd,bkd->bqk"}> : () -> ()
      %cst_79 = arith.constant dense<0.000000e+00> : vector<2x8x8xf32>
      %94 = tpu.matmul %91, %92, %cst_79 {dimension_numbers = #tpu.dot_dimension_numbers<[2], [2], [1], [1], [0, 0, 0, 1, 1, 1], [0], [0]>} : vector<2x8x8xf32>, vector<2x8x8xf32>, vector<2x8x8xf32> -> vector<2x8x8xf32>
      "tpu.trace_stop"() : () -> ()
      %cst_80 = arith.constant 0.353553385 : f32
      %95 = vector.broadcast %cst_80 : f32 to vector<2x8x8xf32>
      %96 = arith.mulf %94, %95 : vector<2x8x8xf32>
      %cst_81 = arith.constant dense<0xFF800000> : vector<2x8xf32>
      %97 = vector.multi_reduction <maximumf>, %96, %cst_81 [2] : vector<2x8x8xf32> to vector<2x8xf32>
      %98 = vector.shape_cast %97 : vector<2x8xf32> to vector<2x8x1xf32>
      %99 = vector.broadcast %98 : vector<2x8x1xf32> to vector<2x8x8xf32>
      %100 = arith.subf %96, %99 : vector<2x8x8xf32>
      %101 = math.exp %100 : vector<2x8x8xf32>
      %cst_82 = arith.constant dense<0.000000e+00> : vector<2x8xf32>
      %102 = vector.multi_reduction <add>, %101, %cst_82 [2] : vector<2x8x8xf32> to vector<2x8xf32>
      %103 = vector.shape_cast %102 : vector<2x8xf32> to vector<2x8x1xf32>
      %104 = tpu.reciprocal %103 : vector<2x8x1xf32> -> vector<2x8x1xf32>
      %105 = vector.broadcast %104 : vector<2x8x1xf32> to vector<2x8x8xf32>
      %106 = arith.mulf %101, %105 : vector<2x8x8xf32>
      "tpu.trace_start"() <{level = 10 : i32, message = "bqk,bkd->bqd"}> : () -> ()
      %cst_83 = arith.constant dense<0.000000e+00> : vector<2x8x64xf32>
      %107 = tpu.matmul %106, %93, %cst_83 {dimension_numbers = #tpu.dot_dimension_numbers<[2], [1], [1], [2], [0, 0, 0, 1, 1, 2], [0], [0]>} : vector<2x8x8xf32>, vector<2x8x64xf32>, vector<2x8x64xf32> -> vector<2x8x64xf32>
      "tpu.trace_stop"() : () -> ()
      %108 = vector.shape_cast %107 : vector<2x8x64xf32> to vector<16x64xf32>
      %109 = arith.addf %73, %108 : vector<16x64xf32>
      %c0_84 = arith.constant 0 : index
      %c2 = arith.constant 2 : index
      %c0_85 = arith.constant 0 : index
      %c0_86 = arith.constant 0 : index
      %110 = vector.load %arg6[%c0_84, %c2, %c0_85, %c0_86] : memref<1x8x64x8xf32, #tpu.memory_space<vmem>>, vector<1x1x64x8xf32>
      %111 = vector.shape_cast %110 : vector<1x1x64x8xf32> to vector<64x8xf32>
      %cst_87 = arith.constant dense<0.000000e+00> : vector<16x8xf32>
      %112 = tpu.matmul %32, %111, %cst_87 {dimension_numbers = #tpu.dot_dimension_numbers<[1], [0], [0], [1], [0, 0, 1, 1], [], []>} : vector<16x64xf32>, vector<64x8xf32>, vector<16x8xf32> -> vector<16x8xf32>
      %c0_88 = arith.constant 0 : index
      %c2_89 = arith.constant 2 : index
      %c0_90 = arith.constant 0 : index
      %c0_91 = arith.constant 0 : index
      %113 = vector.load %arg7[%c0_88, %c2_89, %c0_90, %c0_91] : memref<1x8x1x8xf32, #tpu.memory_space<vmem>>, vector<1x1x1x8xf32>
      %114 = vector.shape_cast %113 : vector<1x1x1x8xf32> to vector<1x8xf32>
      %115 = vector.broadcast %114 : vector<1x8xf32> to vector<16x8xf32>
      %116 = arith.addf %112, %115 : vector<16x8xf32>
      %c0_92 = arith.constant 0 : index
      %c2_93 = arith.constant 2 : index
      %c0_94 = arith.constant 0 : index
      %c0_95 = arith.constant 0 : index
      %117 = vector.load %arg8[%c0_92, %c2_93, %c0_94, %c0_95] : memref<1x8x64x8xf32, #tpu.memory_space<vmem>>, vector<1x1x64x8xf32>
      %118 = vector.shape_cast %117 : vector<1x1x64x8xf32> to vector<64x8xf32>
      %cst_96 = arith.constant dense<0.000000e+00> : vector<16x8xf32>
      %119 = tpu.matmul %32, %118, %cst_96 {dimension_numbers = #tpu.dot_dimension_numbers<[1], [0], [0], [1], [0, 0, 1, 1], [], []>} : vector<16x64xf32>, vector<64x8xf32>, vector<16x8xf32> -> vector<16x8xf32>
      %c0_97 = arith.constant 0 : index
      %c2_98 = arith.constant 2 : index
      %c0_99 = arith.constant 0 : index
      %c0_100 = arith.constant 0 : index
      %120 = vector.load %arg9[%c0_97, %c2_98, %c0_99, %c0_100] : memref<1x8x1x8xf32, #tpu.memory_space<vmem>>, vector<1x1x1x8xf32>
      %121 = vector.shape_cast %120 : vector<1x1x1x8xf32> to vector<1x8xf32>
      %122 = vector.broadcast %121 : vector<1x8xf32> to vector<16x8xf32>
      %123 = arith.addf %119, %122 : vector<16x8xf32>
      %c0_101 = arith.constant 0 : index
      %c2_102 = arith.constant 2 : index
      %c0_103 = arith.constant 0 : index
      %c0_104 = arith.constant 0 : index
      %124 = vector.load %arg10[%c0_101, %c2_102, %c0_103, %c0_104] : memref<1x8x64x64xf32, #tpu.memory_space<vmem>>, vector<1x1x64x64xf32>
      %125 = vector.shape_cast %124 : vector<1x1x64x64xf32> to vector<64x64xf32>
      %cst_105 = arith.constant dense<0.000000e+00> : vector<16x64xf32>
      %126 = tpu.matmul %32, %125, %cst_105 {dimension_numbers = #tpu.dot_dimension_numbers<[1], [0], [0], [1], [0, 0, 1, 1], [], []>} : vector<16x64xf32>, vector<64x64xf32>, vector<16x64xf32> -> vector<16x64xf32>
      %127 = vector.shape_cast %116 : vector<16x8xf32> to vector<2x8x8xf32>
      %128 = vector.shape_cast %123 : vector<16x8xf32> to vector<2x8x8xf32>
      %129 = vector.shape_cast %126 : vector<16x64xf32> to vector<2x8x64xf32>
      "tpu.trace_start"() <{level = 10 : i32, message = "bqd,bkd->bqk"}> : () -> ()
      %cst_106 = arith.constant dense<0.000000e+00> : vector<2x8x8xf32>
      %130 = tpu.matmul %127, %128, %cst_106 {dimension_numbers = #tpu.dot_dimension_numbers<[2], [2], [1], [1], [0, 0, 0, 1, 1, 1], [0], [0]>} : vector<2x8x8xf32>, vector<2x8x8xf32>, vector<2x8x8xf32> -> vector<2x8x8xf32>
      "tpu.trace_stop"() : () -> ()
      %cst_107 = arith.constant 0.353553385 : f32
      %131 = vector.broadcast %cst_107 : f32 to vector<2x8x8xf32>
      %132 = arith.mulf %130, %131 : vector<2x8x8xf32>
      %cst_108 = arith.constant dense<0xFF800000> : vector<2x8xf32>
      %133 = vector.multi_reduction <maximumf>, %132, %cst_108 [2] : vector<2x8x8xf32> to vector<2x8xf32>
      %134 = vector.shape_cast %133 : vector<2x8xf32> to vector<2x8x1xf32>
      %135 = vector.broadcast %134 : vector<2x8x1xf32> to vector<2x8x8xf32>
      %136 = arith.subf %132, %135 : vector<2x8x8xf32>
      %137 = math.exp %136 : vector<2x8x8xf32>
      %cst_109 = arith.constant dense<0.000000e+00> : vector<2x8xf32>
      %138 = vector.multi_reduction <add>, %137, %cst_109 [2] : vector<2x8x8xf32> to vector<2x8xf32>
      %139 = vector.shape_cast %138 : vector<2x8xf32> to vector<2x8x1xf32>
      %140 = tpu.reciprocal %139 : vector<2x8x1xf32> -> vector<2x8x1xf32>
      %141 = vector.broadcast %140 : vector<2x8x1xf32> to vector<2x8x8xf32>
      %142 = arith.mulf %137, %141 : vector<2x8x8xf32>
      "tpu.trace_start"() <{level = 10 : i32, message = "bqk,bkd->bqd"}> : () -> ()
      %cst_110 = arith.constant dense<0.000000e+00> : vector<2x8x64xf32>
      %143 = tpu.matmul %142, %129, %cst_110 {dimension_numbers = #tpu.dot_dimension_numbers<[2], [1], [1], [2], [0, 0, 0, 1, 1, 2], [0], [0]>} : vector<2x8x8xf32>, vector<2x8x64xf32>, vector<2x8x64xf32> -> vector<2x8x64xf32>
      "tpu.trace_stop"() : () -> ()
      %144 = vector.shape_cast %143 : vector<2x8x64xf32> to vector<16x64xf32>
      %145 = arith.addf %109, %144 : vector<16x64xf32>
      %c0_111 = arith.constant 0 : index
      %c3 = arith.constant 3 : index
      %c0_112 = arith.constant 0 : index
      %c0_113 = arith.constant 0 : index
      %146 = vector.load %arg6[%c0_111, %c3, %c0_112, %c0_113] : memref<1x8x64x8xf32, #tpu.memory_space<vmem>>, vector<1x1x64x8xf32>
      %147 = vector.shape_cast %146 : vector<1x1x64x8xf32> to vector<64x8xf32>
      %cst_114 = arith.constant dense<0.000000e+00> : vector<16x8xf32>
      %148 = tpu.matmul %32, %147, %cst_114 {dimension_numbers = #tpu.dot_dimension_numbers<[1], [0], [0], [1], [0, 0, 1, 1], [], []>} : vector<16x64xf32>, vector<64x8xf32>, vector<16x8xf32> -> vector<16x8xf32>
      %c0_115 = arith.constant 0 : index
      %c3_116 = arith.constant 3 : index
      %c0_117 = arith.constant 0 : index
      %c0_118 = arith.constant 0 : index
      %149 = vector.load %arg7[%c0_115, %c3_116, %c0_117, %c0_118] : memref<1x8x1x8xf32, #tpu.memory_space<vmem>>, vector<1x1x1x8xf32>
      %150 = vector.shape_cast %149 : vector<1x1x1x8xf32> to vector<1x8xf32>
      %151 = vector.broadcast %150 : vector<1x8xf32> to vector<16x8xf32>
      %152 = arith.addf %148, %151 : vector<16x8xf32>
      %c0_119 = arith.constant 0 : index
      %c3_120 = arith.constant 3 : index
      %c0_121 = arith.constant 0 : index
      %c0_122 = arith.constant 0 : index
      %153 = vector.load %arg8[%c0_119, %c3_120, %c0_121, %c0_122] : memref<1x8x64x8xf32, #tpu.memory_space<vmem>>, vector<1x1x64x8xf32>
      %154 = vector.shape_cast %153 : vector<1x1x64x8xf32> to vector<64x8xf32>
      %cst_123 = arith.constant dense<0.000000e+00> : vector<16x8xf32>
      %155 = tpu.matmul %32, %154, %cst_123 {dimension_numbers = #tpu.dot_dimension_numbers<[1], [0], [0], [1], [0, 0, 1, 1], [], []>} : vector<16x64xf32>, vector<64x8xf32>, vector<16x8xf32> -> vector<16x8xf32>
      %c0_124 = arith.constant 0 : index
      %c3_125 = arith.constant 3 : index
      %c0_126 = arith.constant 0 : index
      %c0_127 = arith.constant 0 : index
      %156 = vector.load %arg9[%c0_124, %c3_125, %c0_126, %c0_127] : memref<1x8x1x8xf32, #tpu.memory_space<vmem>>, vector<1x1x1x8xf32>
      %157 = vector.shape_cast %156 : vector<1x1x1x8xf32> to vector<1x8xf32>
      %158 = vector.broadcast %157 : vector<1x8xf32> to vector<16x8xf32>
      %159 = arith.addf %155, %158 : vector<16x8xf32>
      %c0_128 = arith.constant 0 : index
      %c3_129 = arith.constant 3 : index
      %c0_130 = arith.constant 0 : index
      %c0_131 = arith.constant 0 : index
      %160 = vector.load %arg10[%c0_128, %c3_129, %c0_130, %c0_131] : memref<1x8x64x64xf32, #tpu.memory_space<vmem>>, vector<1x1x64x64xf32>
      %161 = vector.shape_cast %160 : vector<1x1x64x64xf32> to vector<64x64xf32>
      %cst_132 = arith.constant dense<0.000000e+00> : vector<16x64xf32>
      %162 = tpu.matmul %32, %161, %cst_132 {dimension_numbers = #tpu.dot_dimension_numbers<[1], [0], [0], [1], [0, 0, 1, 1], [], []>} : vector<16x64xf32>, vector<64x64xf32>, vector<16x64xf32> -> vector<16x64xf32>
      %163 = vector.shape_cast %152 : vector<16x8xf32> to vector<2x8x8xf32>
      %164 = vector.shape_cast %159 : vector<16x8xf32> to vector<2x8x8xf32>
      %165 = vector.shape_cast %162 : vector<16x64xf32> to vector<2x8x64xf32>
      "tpu.trace_start"() <{level = 10 : i32, message = "bqd,bkd->bqk"}> : () -> ()
      %cst_133 = arith.constant dense<0.000000e+00> : vector<2x8x8xf32>
      %166 = tpu.matmul %163, %164, %cst_133 {dimension_numbers = #tpu.dot_dimension_numbers<[2], [2], [1], [1], [0, 0, 0, 1, 1, 1], [0], [0]>} : vector<2x8x8xf32>, vector<2x8x8xf32>, vector<2x8x8xf32> -> vector<2x8x8xf32>
      "tpu.trace_stop"() : () -> ()
      %cst_134 = arith.constant 0.353553385 : f32
      %167 = vector.broadcast %cst_134 : f32 to vector<2x8x8xf32>
      %168 = arith.mulf %166, %167 : vector<2x8x8xf32>
      %cst_135 = arith.constant dense<0xFF800000> : vector<2x8xf32>
      %169 = vector.multi_reduction <maximumf>, %168, %cst_135 [2] : vector<2x8x8xf32> to vector<2x8xf32>
      %170 = vector.shape_cast %169 : vector<2x8xf32> to vector<2x8x1xf32>
      %171 = vector.broadcast %170 : vector<2x8x1xf32> to vector<2x8x8xf32>
      %172 = arith.subf %168, %171 : vector<2x8x8xf32>
      %173 = math.exp %172 : vector<2x8x8xf32>
      %cst_136 = arith.constant dense<0.000000e+00> : vector<2x8xf32>
      %174 = vector.multi_reduction <add>, %173, %cst_136 [2] : vector<2x8x8xf32> to vector<2x8xf32>
      %175 = vector.shape_cast %174 : vector<2x8xf32> to vector<2x8x1xf32>
      %176 = tpu.reciprocal %175 : vector<2x8x1xf32> -> vector<2x8x1xf32>
      %177 = vector.broadcast %176 : vector<2x8x1xf32> to vector<2x8x8xf32>
      %178 = arith.mulf %173, %177 : vector<2x8x8xf32>
      "tpu.trace_start"() <{level = 10 : i32, message = "bqk,bkd->bqd"}> : () -> ()
      %cst_137 = arith.constant dense<0.000000e+00> : vector<2x8x64xf32>
      %179 = tpu.matmul %178, %165, %cst_137 {dimension_numbers = #tpu.dot_dimension_numbers<[2], [1], [1], [2], [0, 0, 0, 1, 1, 2], [0], [0]>} : vector<2x8x8xf32>, vector<2x8x64xf32>, vector<2x8x64xf32> -> vector<2x8x64xf32>
      "tpu.trace_stop"() : () -> ()
      %180 = vector.shape_cast %179 : vector<2x8x64xf32> to vector<16x64xf32>
      %181 = arith.addf %145, %180 : vector<16x64xf32>
      %c0_138 = arith.constant 0 : index
      %c4 = arith.constant 4 : index
      %c0_139 = arith.constant 0 : index
      %c0_140 = arith.constant 0 : index
      %182 = vector.load %arg6[%c0_138, %c4, %c0_139, %c0_140] : memref<1x8x64x8xf32, #tpu.memory_space<vmem>>, vector<1x1x64x8xf32>
      %183 = vector.shape_cast %182 : vector<1x1x64x8xf32> to vector<64x8xf32>
      %cst_141 = arith.constant dense<0.000000e+00> : vector<16x8xf32>
      %184 = tpu.matmul %32, %183, %cst_141 {dimension_numbers = #tpu.dot_dimension_numbers<[1], [0], [0], [1], [0, 0, 1, 1], [], []>} : vector<16x64xf32>, vector<64x8xf32>, vector<16x8xf32> -> vector<16x8xf32>
      %c0_142 = arith.constant 0 : index
      %c4_143 = arith.constant 4 : index
      %c0_144 = arith.constant 0 : index
      %c0_145 = arith.constant 0 : index
      %185 = vector.load %arg7[%c0_142, %c4_143, %c0_144, %c0_145] : memref<1x8x1x8xf32, #tpu.memory_space<vmem>>, vector<1x1x1x8xf32>
      %186 = vector.shape_cast %185 : vector<1x1x1x8xf32> to vector<1x8xf32>
      %187 = vector.broadcast %186 : vector<1x8xf32> to vector<16x8xf32>
      %188 = arith.addf %184, %187 : vector<16x8xf32>
      %c0_146 = arith.constant 0 : index
      %c4_147 = arith.constant 4 : index
      %c0_148 = arith.constant 0 : index
      %c0_149 = arith.constant 0 : index
      %189 = vector.load %arg8[%c0_146, %c4_147, %c0_148, %c0_149] : memref<1x8x64x8xf32, #tpu.memory_space<vmem>>, vector<1x1x64x8xf32>
      %190 = vector.shape_cast %189 : vector<1x1x64x8xf32> to vector<64x8xf32>
      %cst_150 = arith.constant dense<0.000000e+00> : vector<16x8xf32>
      %191 = tpu.matmul %32, %190, %cst_150 {dimension_numbers = #tpu.dot_dimension_numbers<[1], [0], [0], [1], [0, 0, 1, 1], [], []>} : vector<16x64xf32>, vector<64x8xf32>, vector<16x8xf32> -> vector<16x8xf32>
      %c0_151 = arith.constant 0 : index
      %c4_152 = arith.constant 4 : index
      %c0_153 = arith.constant 0 : index
      %c0_154 = arith.constant 0 : index
      %192 = vector.load %arg9[%c0_151, %c4_152, %c0_153, %c0_154] : memref<1x8x1x8xf32, #tpu.memory_space<vmem>>, vector<1x1x1x8xf32>
      %193 = vector.shape_cast %192 : vector<1x1x1x8xf32> to vector<1x8xf32>
      %194 = vector.broadcast %193 : vector<1x8xf32> to vector<16x8xf32>
      %195 = arith.addf %191, %194 : vector<16x8xf32>
      %c0_155 = arith.constant 0 : index
      %c4_156 = arith.constant 4 : index
      %c0_157 = arith.constant 0 : index
      %c0_158 = arith.constant 0 : index
      %196 = vector.load %arg10[%c0_155, %c4_156, %c0_157, %c0_158] : memref<1x8x64x64xf32, #tpu.memory_space<vmem>>, vector<1x1x64x64xf32>
      %197 = vector.shape_cast %196 : vector<1x1x64x64xf32> to vector<64x64xf32>
      %cst_159 = arith.constant dense<0.000000e+00> : vector<16x64xf32>
      %198 = tpu.matmul %32, %197, %cst_159 {dimension_numbers = #tpu.dot_dimension_numbers<[1], [0], [0], [1], [0, 0, 1, 1], [], []>} : vector<16x64xf32>, vector<64x64xf32>, vector<16x64xf32> -> vector<16x64xf32>
      %199 = vector.shape_cast %188 : vector<16x8xf32> to vector<2x8x8xf32>
      %200 = vector.shape_cast %195 : vector<16x8xf32> to vector<2x8x8xf32>
      %201 = vector.shape_cast %198 : vector<16x64xf32> to vector<2x8x64xf32>
      "tpu.trace_start"() <{level = 10 : i32, message = "bqd,bkd->bqk"}> : () -> ()
      %cst_160 = arith.constant dense<0.000000e+00> : vector<2x8x8xf32>
      %202 = tpu.matmul %199, %200, %cst_160 {dimension_numbers = #tpu.dot_dimension_numbers<[2], [2], [1], [1], [0, 0, 0, 1, 1, 1], [0], [0]>} : vector<2x8x8xf32>, vector<2x8x8xf32>, vector<2x8x8xf32> -> vector<2x8x8xf32>
      "tpu.trace_stop"() : () -> ()
      %cst_161 = arith.constant 0.353553385 : f32
      %203 = vector.broadcast %cst_161 : f32 to vector<2x8x8xf32>
      %204 = arith.mulf %202, %203 : vector<2x8x8xf32>
      %cst_162 = arith.constant dense<0xFF800000> : vector<2x8xf32>
      %205 = vector.multi_reduction <maximumf>, %204, %cst_162 [2] : vector<2x8x8xf32> to vector<2x8xf32>
      %206 = vector.shape_cast %205 : vector<2x8xf32> to vector<2x8x1xf32>
      %207 = vector.broadcast %206 : vector<2x8x1xf32> to vector<2x8x8xf32>
      %208 = arith.subf %204, %207 : vector<2x8x8xf32>
      %209 = math.exp %208 : vector<2x8x8xf32>
      %cst_163 = arith.constant dense<0.000000e+00> : vector<2x8xf32>
      %210 = vector.multi_reduction <add>, %209, %cst_163 [2] : vector<2x8x8xf32> to vector<2x8xf32>
      %211 = vector.shape_cast %210 : vector<2x8xf32> to vector<2x8x1xf32>
      %212 = tpu.reciprocal %211 : vector<2x8x1xf32> -> vector<2x8x1xf32>
      %213 = vector.broadcast %212 : vector<2x8x1xf32> to vector<2x8x8xf32>
      %214 = arith.mulf %209, %213 : vector<2x8x8xf32>
      "tpu.trace_start"() <{level = 10 : i32, message = "bqk,bkd->bqd"}> : () -> ()
      %cst_164 = arith.constant dense<0.000000e+00> : vector<2x8x64xf32>
      %215 = tpu.matmul %214, %201, %cst_164 {dimension_numbers = #tpu.dot_dimension_numbers<[2], [1], [1], [2], [0, 0, 0, 1, 1, 2], [0], [0]>} : vector<2x8x8xf32>, vector<2x8x64xf32>, vector<2x8x64xf32> -> vector<2x8x64xf32>
      "tpu.trace_stop"() : () -> ()
      %216 = vector.shape_cast %215 : vector<2x8x64xf32> to vector<16x64xf32>
      %217 = arith.addf %181, %216 : vector<16x64xf32>
      %c0_165 = arith.constant 0 : index
      %c5 = arith.constant 5 : index
      %c0_166 = arith.constant 0 : index
      %c0_167 = arith.constant 0 : index
      %218 = vector.load %arg6[%c0_165, %c5, %c0_166, %c0_167] : memref<1x8x64x8xf32, #tpu.memory_space<vmem>>, vector<1x1x64x8xf32>
      %219 = vector.shape_cast %218 : vector<1x1x64x8xf32> to vector<64x8xf32>
      %cst_168 = arith.constant dense<0.000000e+00> : vector<16x8xf32>
      %220 = tpu.matmul %32, %219, %cst_168 {dimension_numbers = #tpu.dot_dimension_numbers<[1], [0], [0], [1], [0, 0, 1, 1], [], []>} : vector<16x64xf32>, vector<64x8xf32>, vector<16x8xf32> -> vector<16x8xf32>
      %c0_169 = arith.constant 0 : index
      %c5_170 = arith.constant 5 : index
      %c0_171 = arith.constant 0 : index
      %c0_172 = arith.constant 0 : index
      %221 = vector.load %arg7[%c0_169, %c5_170, %c0_171, %c0_172] : memref<1x8x1x8xf32, #tpu.memory_space<vmem>>, vector<1x1x1x8xf32>
      %222 = vector.shape_cast %221 : vector<1x1x1x8xf32> to vector<1x8xf32>
      %223 = vector.broadcast %222 : vector<1x8xf32> to vector<16x8xf32>
      %224 = arith.addf %220, %223 : vector<16x8xf32>
      %c0_173 = arith.constant 0 : index
      %c5_174 = arith.constant 5 : index
      %c0_175 = arith.constant 0 : index
      %c0_176 = arith.constant 0 : index
      %225 = vector.load %arg8[%c0_173, %c5_174, %c0_175, %c0_176] : memref<1x8x64x8xf32, #tpu.memory_space<vmem>>, vector<1x1x64x8xf32>
      %226 = vector.shape_cast %225 : vector<1x1x64x8xf32> to vector<64x8xf32>
      %cst_177 = arith.constant dense<0.000000e+00> : vector<16x8xf32>
      %227 = tpu.matmul %32, %226, %cst_177 {dimension_numbers = #tpu.dot_dimension_numbers<[1], [0], [0], [1], [0, 0, 1, 1], [], []>} : vector<16x64xf32>, vector<64x8xf32>, vector<16x8xf32> -> vector<16x8xf32>
      %c0_178 = arith.constant 0 : index
      %c5_179 = arith.constant 5 : index
      %c0_180 = arith.constant 0 : index
      %c0_181 = arith.constant 0 : index
      %228 = vector.load %arg9[%c0_178, %c5_179, %c0_180, %c0_181] : memref<1x8x1x8xf32, #tpu.memory_space<vmem>>, vector<1x1x1x8xf32>
      %229 = vector.shape_cast %228 : vector<1x1x1x8xf32> to vector<1x8xf32>
      %230 = vector.broadcast %229 : vector<1x8xf32> to vector<16x8xf32>
      %231 = arith.addf %227, %230 : vector<16x8xf32>
      %c0_182 = arith.constant 0 : index
      %c5_183 = arith.constant 5 : index
      %c0_184 = arith.constant 0 : index
      %c0_185 = arith.constant 0 : index
      %232 = vector.load %arg10[%c0_182, %c5_183, %c0_184, %c0_185] : memref<1x8x64x64xf32, #tpu.memory_space<vmem>>, vector<1x1x64x64xf32>
      %233 = vector.shape_cast %232 : vector<1x1x64x64xf32> to vector<64x64xf32>
      %cst_186 = arith.constant dense<0.000000e+00> : vector<16x64xf32>
      %234 = tpu.matmul %32, %233, %cst_186 {dimension_numbers = #tpu.dot_dimension_numbers<[1], [0], [0], [1], [0, 0, 1, 1], [], []>} : vector<16x64xf32>, vector<64x64xf32>, vector<16x64xf32> -> vector<16x64xf32>
      %235 = vector.shape_cast %224 : vector<16x8xf32> to vector<2x8x8xf32>
      %236 = vector.shape_cast %231 : vector<16x8xf32> to vector<2x8x8xf32>
      %237 = vector.shape_cast %234 : vector<16x64xf32> to vector<2x8x64xf32>
      "tpu.trace_start"() <{level = 10 : i32, message = "bqd,bkd->bqk"}> : () -> ()
      %cst_187 = arith.constant dense<0.000000e+00> : vector<2x8x8xf32>
      %238 = tpu.matmul %235, %236, %cst_187 {dimension_numbers = #tpu.dot_dimension_numbers<[2], [2], [1], [1], [0, 0, 0, 1, 1, 1], [0], [0]>} : vector<2x8x8xf32>, vector<2x8x8xf32>, vector<2x8x8xf32> -> vector<2x8x8xf32>
      "tpu.trace_stop"() : () -> ()
      %cst_188 = arith.constant 0.353553385 : f32
      %239 = vector.broadcast %cst_188 : f32 to vector<2x8x8xf32>
      %240 = arith.mulf %238, %239 : vector<2x8x8xf32>
      %cst_189 = arith.constant dense<0xFF800000> : vector<2x8xf32>
      %241 = vector.multi_reduction <maximumf>, %240, %cst_189 [2] : vector<2x8x8xf32> to vector<2x8xf32>
      %242 = vector.shape_cast %241 : vector<2x8xf32> to vector<2x8x1xf32>
      %243 = vector.broadcast %242 : vector<2x8x1xf32> to vector<2x8x8xf32>
      %244 = arith.subf %240, %243 : vector<2x8x8xf32>
      %245 = math.exp %244 : vector<2x8x8xf32>
      %cst_190 = arith.constant dense<0.000000e+00> : vector<2x8xf32>
      %246 = vector.multi_reduction <add>, %245, %cst_190 [2] : vector<2x8x8xf32> to vector<2x8xf32>
      %247 = vector.shape_cast %246 : vector<2x8xf32> to vector<2x8x1xf32>
      %248 = tpu.reciprocal %247 : vector<2x8x1xf32> -> vector<2x8x1xf32>
      %249 = vector.broadcast %248 : vector<2x8x1xf32> to vector<2x8x8xf32>
      %250 = arith.mulf %245, %249 : vector<2x8x8xf32>
      "tpu.trace_start"() <{level = 10 : i32, message = "bqk,bkd->bqd"}> : () -> ()
      %cst_191 = arith.constant dense<0.000000e+00> : vector<2x8x64xf32>
      %251 = tpu.matmul %250, %237, %cst_191 {dimension_numbers = #tpu.dot_dimension_numbers<[2], [1], [1], [2], [0, 0, 0, 1, 1, 2], [0], [0]>} : vector<2x8x8xf32>, vector<2x8x64xf32>, vector<2x8x64xf32> -> vector<2x8x64xf32>
      "tpu.trace_stop"() : () -> ()
      %252 = vector.shape_cast %251 : vector<2x8x64xf32> to vector<16x64xf32>
      %253 = arith.addf %217, %252 : vector<16x64xf32>
      %c0_192 = arith.constant 0 : index
      %c6 = arith.constant 6 : index
      %c0_193 = arith.constant 0 : index
      %c0_194 = arith.constant 0 : index
      %254 = vector.load %arg6[%c0_192, %c6, %c0_193, %c0_194] : memref<1x8x64x8xf32, #tpu.memory_space<vmem>>, vector<1x1x64x8xf32>
      %255 = vector.shape_cast %254 : vector<1x1x64x8xf32> to vector<64x8xf32>
      %cst_195 = arith.constant dense<0.000000e+00> : vector<16x8xf32>
      %256 = tpu.matmul %32, %255, %cst_195 {dimension_numbers = #tpu.dot_dimension_numbers<[1], [0], [0], [1], [0, 0, 1, 1], [], []>} : vector<16x64xf32>, vector<64x8xf32>, vector<16x8xf32> -> vector<16x8xf32>
      %c0_196 = arith.constant 0 : index
      %c6_197 = arith.constant 6 : index
      %c0_198 = arith.constant 0 : index
      %c0_199 = arith.constant 0 : index
      %257 = vector.load %arg7[%c0_196, %c6_197, %c0_198, %c0_199] : memref<1x8x1x8xf32, #tpu.memory_space<vmem>>, vector<1x1x1x8xf32>
      %258 = vector.shape_cast %257 : vector<1x1x1x8xf32> to vector<1x8xf32>
      %259 = vector.broadcast %258 : vector<1x8xf32> to vector<16x8xf32>
      %260 = arith.addf %256, %259 : vector<16x8xf32>
      %c0_200 = arith.constant 0 : index
      %c6_201 = arith.constant 6 : index
      %c0_202 = arith.constant 0 : index
      %c0_203 = arith.constant 0 : index
      %261 = vector.load %arg8[%c0_200, %c6_201, %c0_202, %c0_203] : memref<1x8x64x8xf32, #tpu.memory_space<vmem>>, vector<1x1x64x8xf32>
      %262 = vector.shape_cast %261 : vector<1x1x64x8xf32> to vector<64x8xf32>
      %cst_204 = arith.constant dense<0.000000e+00> : vector<16x8xf32>
      %263 = tpu.matmul %32, %262, %cst_204 {dimension_numbers = #tpu.dot_dimension_numbers<[1], [0], [0], [1], [0, 0, 1, 1], [], []>} : vector<16x64xf32>, vector<64x8xf32>, vector<16x8xf32> -> vector<16x8xf32>
      %c0_205 = arith.constant 0 : index
      %c6_206 = arith.constant 6 : index
      %c0_207 = arith.constant 0 : index
      %c0_208 = arith.constant 0 : index
      %264 = vector.load %arg9[%c0_205, %c6_206, %c0_207, %c0_208] : memref<1x8x1x8xf32, #tpu.memory_space<vmem>>, vector<1x1x1x8xf32>
      %265 = vector.shape_cast %264 : vector<1x1x1x8xf32> to vector<1x8xf32>
      %266 = vector.broadcast %265 : vector<1x8xf32> to vector<16x8xf32>
      %267 = arith.addf %263, %266 : vector<16x8xf32>
      %c0_209 = arith.constant 0 : index
      %c6_210 = arith.constant 6 : index
      %c0_211 = arith.constant 0 : index
      %c0_212 = arith.constant 0 : index
      %268 = vector.load %arg10[%c0_209, %c6_210, %c0_211, %c0_212] : memref<1x8x64x64xf32, #tpu.memory_space<vmem>>, vector<1x1x64x64xf32>
      %269 = vector.shape_cast %268 : vector<1x1x64x64xf32> to vector<64x64xf32>
      %cst_213 = arith.constant dense<0.000000e+00> : vector<16x64xf32>
      %270 = tpu.matmul %32, %269, %cst_213 {dimension_numbers = #tpu.dot_dimension_numbers<[1], [0], [0], [1], [0, 0, 1, 1], [], []>} : vector<16x64xf32>, vector<64x64xf32>, vector<16x64xf32> -> vector<16x64xf32>
      %271 = vector.shape_cast %260 : vector<16x8xf32> to vector<2x8x8xf32>
      %272 = vector.shape_cast %267 : vector<16x8xf32> to vector<2x8x8xf32>
      %273 = vector.shape_cast %270 : vector<16x64xf32> to vector<2x8x64xf32>
      "tpu.trace_start"() <{level = 10 : i32, message = "bqd,bkd->bqk"}> : () -> ()
      %cst_214 = arith.constant dense<0.000000e+00> : vector<2x8x8xf32>
      %274 = tpu.matmul %271, %272, %cst_214 {dimension_numbers = #tpu.dot_dimension_numbers<[2], [2], [1], [1], [0, 0, 0, 1, 1, 1], [0], [0]>} : vector<2x8x8xf32>, vector<2x8x8xf32>, vector<2x8x8xf32> -> vector<2x8x8xf32>
      "tpu.trace_stop"() : () -> ()
      %cst_215 = arith.constant 0.353553385 : f32
      %275 = vector.broadcast %cst_215 : f32 to vector<2x8x8xf32>
      %276 = arith.mulf %274, %275 : vector<2x8x8xf32>
      %cst_216 = arith.constant dense<0xFF800000> : vector<2x8xf32>
      %277 = vector.multi_reduction <maximumf>, %276, %cst_216 [2] : vector<2x8x8xf32> to vector<2x8xf32>
      %278 = vector.shape_cast %277 : vector<2x8xf32> to vector<2x8x1xf32>
      %279 = vector.broadcast %278 : vector<2x8x1xf32> to vector<2x8x8xf32>
      %280 = arith.subf %276, %279 : vector<2x8x8xf32>
      %281 = math.exp %280 : vector<2x8x8xf32>
      %cst_217 = arith.constant dense<0.000000e+00> : vector<2x8xf32>
      %282 = vector.multi_reduction <add>, %281, %cst_217 [2] : vector<2x8x8xf32> to vector<2x8xf32>
      %283 = vector.shape_cast %282 : vector<2x8xf32> to vector<2x8x1xf32>
      %284 = tpu.reciprocal %283 : vector<2x8x1xf32> -> vector<2x8x1xf32>
      %285 = vector.broadcast %284 : vector<2x8x1xf32> to vector<2x8x8xf32>
      %286 = arith.mulf %281, %285 : vector<2x8x8xf32>
      "tpu.trace_start"() <{level = 10 : i32, message = "bqk,bkd->bqd"}> : () -> ()
      %cst_218 = arith.constant dense<0.000000e+00> : vector<2x8x64xf32>
      %287 = tpu.matmul %286, %273, %cst_218 {dimension_numbers = #tpu.dot_dimension_numbers<[2], [1], [1], [2], [0, 0, 0, 1, 1, 2], [0], [0]>} : vector<2x8x8xf32>, vector<2x8x64xf32>, vector<2x8x64xf32> -> vector<2x8x64xf32>
      "tpu.trace_stop"() : () -> ()
      %288 = vector.shape_cast %287 : vector<2x8x64xf32> to vector<16x64xf32>
      %289 = arith.addf %253, %288 : vector<16x64xf32>
      %c0_219 = arith.constant 0 : index
      %c7 = arith.constant 7 : index
      %c0_220 = arith.constant 0 : index
      %c0_221 = arith.constant 0 : index
      %290 = vector.load %arg6[%c0_219, %c7, %c0_220, %c0_221] : memref<1x8x64x8xf32, #tpu.memory_space<vmem>>, vector<1x1x64x8xf32>
      %291 = vector.shape_cast %290 : vector<1x1x64x8xf32> to vector<64x8xf32>
      %cst_222 = arith.constant dense<0.000000e+00> : vector<16x8xf32>
      %292 = tpu.matmul %32, %291, %cst_222 {dimension_numbers = #tpu.dot_dimension_numbers<[1], [0], [0], [1], [0, 0, 1, 1], [], []>} : vector<16x64xf32>, vector<64x8xf32>, vector<16x8xf32> -> vector<16x8xf32>
      %c0_223 = arith.constant 0 : index
      %c7_224 = arith.constant 7 : index
      %c0_225 = arith.constant 0 : index
      %c0_226 = arith.constant 0 : index
      %293 = vector.load %arg7[%c0_223, %c7_224, %c0_225, %c0_226] : memref<1x8x1x8xf32, #tpu.memory_space<vmem>>, vector<1x1x1x8xf32>
      %294 = vector.shape_cast %293 : vector<1x1x1x8xf32> to vector<1x8xf32>
      %295 = vector.broadcast %294 : vector<1x8xf32> to vector<16x8xf32>
      %296 = arith.addf %292, %295 : vector<16x8xf32>
      %c0_227 = arith.constant 0 : index
      %c7_228 = arith.constant 7 : index
      %c0_229 = arith.constant 0 : index
      %c0_230 = arith.constant 0 : index
      %297 = vector.load %arg8[%c0_227, %c7_228, %c0_229, %c0_230] : memref<1x8x64x8xf32, #tpu.memory_space<vmem>>, vector<1x1x64x8xf32>
      %298 = vector.shape_cast %297 : vector<1x1x64x8xf32> to vector<64x8xf32>
      %cst_231 = arith.constant dense<0.000000e+00> : vector<16x8xf32>
      %299 = tpu.matmul %32, %298, %cst_231 {dimension_numbers = #tpu.dot_dimension_numbers<[1], [0], [0], [1], [0, 0, 1, 1], [], []>} : vector<16x64xf32>, vector<64x8xf32>, vector<16x8xf32> -> vector<16x8xf32>
      %c0_232 = arith.constant 0 : index
      %c7_233 = arith.constant 7 : index
      %c0_234 = arith.constant 0 : index
      %c0_235 = arith.constant 0 : index
      %300 = vector.load %arg9[%c0_232, %c7_233, %c0_234, %c0_235] : memref<1x8x1x8xf32, #tpu.memory_space<vmem>>, vector<1x1x1x8xf32>
      %301 = vector.shape_cast %300 : vector<1x1x1x8xf32> to vector<1x8xf32>
      %302 = vector.broadcast %301 : vector<1x8xf32> to vector<16x8xf32>
      %303 = arith.addf %299, %302 : vector<16x8xf32>
      %c0_236 = arith.constant 0 : index
      %c7_237 = arith.constant 7 : index
      %c0_238 = arith.constant 0 : index
      %c0_239 = arith.constant 0 : index
      %304 = vector.load %arg10[%c0_236, %c7_237, %c0_238, %c0_239] : memref<1x8x64x64xf32, #tpu.memory_space<vmem>>, vector<1x1x64x64xf32>
      %305 = vector.shape_cast %304 : vector<1x1x64x64xf32> to vector<64x64xf32>
      %cst_240 = arith.constant dense<0.000000e+00> : vector<16x64xf32>
      %306 = tpu.matmul %32, %305, %cst_240 {dimension_numbers = #tpu.dot_dimension_numbers<[1], [0], [0], [1], [0, 0, 1, 1], [], []>} : vector<16x64xf32>, vector<64x64xf32>, vector<16x64xf32> -> vector<16x64xf32>
      %307 = vector.shape_cast %296 : vector<16x8xf32> to vector<2x8x8xf32>
      %308 = vector.shape_cast %303 : vector<16x8xf32> to vector<2x8x8xf32>
      %309 = vector.shape_cast %306 : vector<16x64xf32> to vector<2x8x64xf32>
      "tpu.trace_start"() <{level = 10 : i32, message = "bqd,bkd->bqk"}> : () -> ()
      %cst_241 = arith.constant dense<0.000000e+00> : vector<2x8x8xf32>
      %310 = tpu.matmul %307, %308, %cst_241 {dimension_numbers = #tpu.dot_dimension_numbers<[2], [2], [1], [1], [0, 0, 0, 1, 1, 1], [0], [0]>} : vector<2x8x8xf32>, vector<2x8x8xf32>, vector<2x8x8xf32> -> vector<2x8x8xf32>
      "tpu.trace_stop"() : () -> ()
      %cst_242 = arith.constant 0.353553385 : f32
      %311 = vector.broadcast %cst_242 : f32 to vector<2x8x8xf32>
      %312 = arith.mulf %310, %311 : vector<2x8x8xf32>
      %cst_243 = arith.constant dense<0xFF800000> : vector<2x8xf32>
      %313 = vector.multi_reduction <maximumf>, %312, %cst_243 [2] : vector<2x8x8xf32> to vector<2x8xf32>
      %314 = vector.shape_cast %313 : vector<2x8xf32> to vector<2x8x1xf32>
      %315 = vector.broadcast %314 : vector<2x8x1xf32> to vector<2x8x8xf32>
      %316 = arith.subf %312, %315 : vector<2x8x8xf32>
      %317 = math.exp %316 : vector<2x8x8xf32>
      %cst_244 = arith.constant dense<0.000000e+00> : vector<2x8xf32>
      %318 = vector.multi_reduction <add>, %317, %cst_244 [2] : vector<2x8x8xf32> to vector<2x8xf32>
      %319 = vector.shape_cast %318 : vector<2x8xf32> to vector<2x8x1xf32>
      %320 = tpu.reciprocal %319 : vector<2x8x1xf32> -> vector<2x8x1xf32>
      %321 = vector.broadcast %320 : vector<2x8x1xf32> to vector<2x8x8xf32>
      %322 = arith.mulf %317, %321 : vector<2x8x8xf32>
      "tpu.trace_start"() <{level = 10 : i32, message = "bqk,bkd->bqd"}> : () -> ()
      %cst_245 = arith.constant dense<0.000000e+00> : vector<2x8x64xf32>
      %323 = tpu.matmul %322, %309, %cst_245 {dimension_numbers = #tpu.dot_dimension_numbers<[2], [1], [1], [2], [0, 0, 0, 1, 1, 2], [0], [0]>} : vector<2x8x8xf32>, vector<2x8x64xf32>, vector<2x8x64xf32> -> vector<2x8x64xf32>
      "tpu.trace_stop"() : () -> ()
      %324 = vector.shape_cast %323 : vector<2x8x64xf32> to vector<16x64xf32>
      %325 = arith.addf %289, %324 : vector<16x64xf32>
      %326 = arith.addf %32, %325 : vector<16x64xf32>
      %c0_246 = arith.constant 0 : index
      %c0_247 = arith.constant 0 : index
      %c0_248 = arith.constant 0 : index
      %327 = vector.load %arg12[%c0_246, %c0_247, %c0_248] : memref<1x1x64xf32, #tpu.memory_space<vmem>>, vector<1x1x64xf32>
      %328 = vector.shape_cast %327 : vector<1x1x64xf32> to vector<1x64xf32>
      %c0_249 = arith.constant 0 : index
      %c0_250 = arith.constant 0 : index
      %c0_251 = arith.constant 0 : index
      %329 = vector.load %arg13[%c0_249, %c0_250, %c0_251] : memref<1x1x64xf32, #tpu.memory_space<vmem>>, vector<1x1x64xf32>
      %330 = vector.shape_cast %329 : vector<1x1x64xf32> to vector<1x64xf32>
      %cst_252 = arith.constant dense<0.000000e+00> : vector<16xf32>
      %331 = vector.multi_reduction <add>, %326, %cst_252 [1] : vector<16x64xf32> to vector<16xf32>
      %332 = vector.shape_cast %331 : vector<16xf32> to vector<16x1xf32>
      %cst_253 = arith.constant 6.400000e+01 : f32
      %333 = vector.broadcast %cst_253 : f32 to vector<16x1xf32>
      %334 = arith.divf %332, %333 : vector<16x1xf32>
      %335 = vector.broadcast %334 : vector<16x1xf32> to vector<16x64xf32>
      %336 = arith.subf %326, %335 : vector<16x64xf32>
      %337 = arith.mulf %336, %336 : vector<16x64xf32>
      %cst_254 = arith.constant dense<0.000000e+00> : vector<16xf32>
      %338 = vector.multi_reduction <add>, %337, %cst_254 [1] : vector<16x64xf32> to vector<16xf32>
      %339 = vector.shape_cast %338 : vector<16xf32> to vector<16x1xf32>
      %cst_255 = arith.constant 6.400000e+01 : f32
      %340 = vector.broadcast %cst_255 : f32 to vector<16x1xf32>
      %341 = arith.divf %339, %340 : vector<16x1xf32>
      %342 = vector.broadcast %334 : vector<16x1xf32> to vector<16x64xf32>
      %343 = arith.subf %326, %342 : vector<16x64xf32>
      %cst_256 = arith.constant 9.99999974E-6 : f32
      %344 = vector.broadcast %cst_256 : f32 to vector<16x1xf32>
      %345 = arith.addf %341, %344 : vector<16x1xf32>
      %346 = math.rsqrt %345 : vector<16x1xf32>
      %347 = vector.broadcast %346 : vector<16x1xf32> to vector<16x64xf32>
      %348 = arith.mulf %343, %347 : vector<16x64xf32>
      %349 = vector.broadcast %328 : vector<1x64xf32> to vector<16x64xf32>
      %350 = arith.mulf %348, %349 : vector<16x64xf32>
      %351 = vector.broadcast %330 : vector<1x64xf32> to vector<16x64xf32>
      %352 = arith.addf %350, %351 : vector<16x64xf32>
      %c0_257 = arith.constant 0 : index
      %c0_258 = arith.constant 0 : index
      %353 = vector.load %arg26[%c0_257, %c0_258] : memref<16x64xf32, #tpu.memory_space<vmem>>, vector<16x64xf32>
      tpu.vector_store %arg26[%c0_257, %c0_258], %352 {strides = array<i32>} : memref<16x64xf32, #tpu.memory_space<vmem>>, vector<16x64xf32>,
      %cst_259 = arith.constant 0.000000e+00 : f32
      %354 = vector.broadcast %cst_259 : f32 to vector<16x64xf32>
      %c0_260 = arith.constant 0 : index
      %c0_261 = arith.constant 0 : index
      %c0_262 = arith.constant 0 : index
      %355 = vector.load %arg19[%c0_260, %c0_261, %c0_262] : memref<1x1x64xf32, #tpu.memory_space<vmem>>, vector<1x1x64xf32>
      %356 = vector.shape_cast %355 : vector<1x1x64xf32> to vector<1x64xf32>
      %357 = vector.broadcast %356 : vector<1x64xf32> to vector<16x64xf32>
      %358 = arith.addf %354, %357 : vector<16x64xf32>
      %c0_263 = arith.constant 0 : index
      %c0_264 = arith.constant 0 : index
      %359 = vector.load %arg27[%c0_263, %c0_264] : memref<16x64xf32, #tpu.memory_space<vmem>>, vector<16x64xf32>
      tpu.vector_store %arg27[%c0_263, %c0_264], %358 {strides = array<i32>} : memref<16x64xf32, #tpu.memory_space<vmem>>, vector<16x64xf32>,
    } else {
    }
    %c0 = arith.constant 0 : index
    %c0_4 = arith.constant 0 : index
    %8 = vector.load %arg26[%c0, %c0_4] : memref<16x64xf32, #tpu.memory_space<vmem>>, vector<16x64xf32>
    %c0_5 = arith.constant 0 : index
    %c0_6 = arith.constant 0 : index
    %c0_7 = arith.constant 0 : index
    %9 = vector.load %arg16[%c0_5, %c0_6, %c0_7] : memref<1x64x512xf32, #tpu.memory_space<vmem>>, vector<1x64x512xf32>
    %10 = vector.shape_cast %9 : vector<1x64x512xf32> to vector<64x512xf32>
    %cst = arith.constant dense<0.000000e+00> : vector<16x512xf32>
    %11 = tpu.matmul %8, %10, %cst {dimension_numbers = #tpu.dot_dimension_numbers<[1], [0], [0], [1], [0, 0, 1, 1], [], []>} : vector<16x64xf32>, vector<64x512xf32>, vector<16x512xf32> -> vector<16x512xf32>
    %c0_8 = arith.constant 0 : index
    %c0_9 = arith.constant 0 : index
    %c0_10 = arith.constant 0 : index
    %12 = vector.load %arg17[%c0_8, %c0_9, %c0_10] : memref<1x1x512xf32, #tpu.memory_space<vmem>>, vector<1x1x512xf32>
    %13 = vector.shape_cast %12 : vector<1x1x512xf32> to vector<1x512xf32>
    %14 = vector.broadcast %13 : vector<1x512xf32> to vector<16x512xf32>
    %15 = arith.addf %11, %14 : vector<16x512xf32>
    %cst_11 = arith.constant 0.000000e+00 : f32
    %16 = vector.broadcast %cst_11 : f32 to vector<16x512xf32>
    %17 = arith.maximumf %15, %16 : vector<16x512xf32>
    %c0_12 = arith.constant 0 : index
    %c0_13 = arith.constant 0 : index
    %18 = vector.load %arg27[%c0_12, %c0_13] : memref<16x64xf32, #tpu.memory_space<vmem>>, vector<16x64xf32>
    %c0_14 = arith.constant 0 : index
    %c0_15 = arith.constant 0 : index
    %c0_16 = arith.constant 0 : index
    %19 = vector.load %arg18[%c0_14, %c0_15, %c0_16] : memref<1x512x64xf32, #tpu.memory_space<vmem>>, vector<1x512x64xf32>
    %20 = vector.shape_cast %19 : vector<1x512x64xf32> to vector<512x64xf32>
    %cst_17 = arith.constant dense<0.000000e+00> : vector<16x64xf32>
    %21 = tpu.matmul %17, %20, %cst_17 {dimension_numbers = #tpu.dot_dimension_numbers<[1], [0], [0], [1], [0, 0, 1, 1], [], []>} : vector<16x512xf32>, vector<512x64xf32>, vector<16x64xf32> -> vector<16x64xf32>
    %22 = arith.addf %18, %21 : vector<16x64xf32>
    %c0_18 = arith.constant 0 : index
    %c0_19 = arith.constant 0 : index
    %23 = vector.load %arg27[%c0_18, %c0_19] : memref<16x64xf32, #tpu.memory_space<vmem>>, vector<16x64xf32>
    tpu.vector_store %arg27[%c0_18, %c0_19], %22 {strides = array<i32>} : memref<16x64xf32, #tpu.memory_space<vmem>>, vector<16x64xf32>,
    %c3_i32 = arith.constant 3 : i32
    %24 = arith.cmpi eq, %arg1, %c3_i32 : i32
    %25 = arith.extui %24 : i1 to i32
    %c0_i32_20 = arith.constant 0 : i32
    %26 = arith.cmpi ne, %25, %c0_i32_20 : i32
    scf.if %26 {
      %c0_23 = arith.constant 0 : index
      %c0_24 = arith.constant 0 : index
      %32 = vector.load %arg26[%c0_23, %c0_24] : memref<16x64xf32, #tpu.memory_space<vmem>>, vector<16x64xf32>
      %c0_25 = arith.constant 0 : index
      %c0_26 = arith.constant 0 : index
      %33 = vector.load %arg27[%c0_25, %c0_26] : memref<16x64xf32, #tpu.memory_space<vmem>>, vector<16x64xf32>
      %34 = arith.addf %32, %33 : vector<16x64xf32>
      %c0_27 = arith.constant 0 : index
      %c0_28 = arith.constant 0 : index
      %c0_29 = arith.constant 0 : index
      %35 = vector.load %arg14[%c0_27, %c0_28, %c0_29] : memref<1x1x64xf32, #tpu.memory_space<vmem>>, vector<1x1x64xf32>
      %36 = vector.shape_cast %35 : vector<1x1x64xf32> to vector<1x64xf32>
      %c0_30 = arith.constant 0 : index
      %c0_31 = arith.constant 0 : index
      %c0_32 = arith.constant 0 : index
      %37 = vector.load %arg15[%c0_30, %c0_31, %c0_32] : memref<1x1x64xf32, #tpu.memory_space<vmem>>, vector<1x1x64xf32>
      %38 = vector.shape_cast %37 : vector<1x1x64xf32> to vector<1x64xf32>
      %cst_33 = arith.constant dense<0.000000e+00> : vector<16xf32>
      %39 = vector.multi_reduction <add>, %34, %cst_33 [1] : vector<16x64xf32> to vector<16xf32>
      %40 = vector.shape_cast %39 : vector<16xf32> to vector<16x1xf32>
      %cst_34 = arith.constant 6.400000e+01 : f32
      %41 = vector.broadcast %cst_34 : f32 to vector<16x1xf32>
      %42 = arith.divf %40, %41 : vector<16x1xf32>
      %43 = vector.broadcast %42 : vector<16x1xf32> to vector<16x64xf32>
      %44 = arith.subf %34, %43 : vector<16x64xf32>
      %45 = arith.mulf %44, %44 : vector<16x64xf32>
      %cst_35 = arith.constant dense<0.000000e+00> : vector<16xf32>
      %46 = vector.multi_reduction <add>, %45, %cst_35 [1] : vector<16x64xf32> to vector<16xf32>
      %47 = vector.shape_cast %46 : vector<16xf32> to vector<16x1xf32>
      %cst_36 = arith.constant 6.400000e+01 : f32
      %48 = vector.broadcast %cst_36 : f32 to vector<16x1xf32>
      %49 = arith.divf %47, %48 : vector<16x1xf32>
      %50 = vector.broadcast %42 : vector<16x1xf32> to vector<16x64xf32>
      %51 = arith.subf %34, %50 : vector<16x64xf32>
      %cst_37 = arith.constant 9.99999974E-6 : f32
      %52 = vector.broadcast %cst_37 : f32 to vector<16x1xf32>
      %53 = arith.addf %49, %52 : vector<16x1xf32>
      %54 = math.rsqrt %53 : vector<16x1xf32>
      %55 = vector.broadcast %54 : vector<16x1xf32> to vector<16x64xf32>
      %56 = arith.mulf %51, %55 : vector<16x64xf32>
      %57 = vector.broadcast %36 : vector<1x64xf32> to vector<16x64xf32>
      %58 = arith.mulf %56, %57 : vector<16x64xf32>
      %59 = vector.broadcast %38 : vector<1x64xf32> to vector<16x64xf32>
      %60 = arith.addf %58, %59 : vector<16x64xf32>
      %c0_38 = arith.constant 0 : index
      %c0_39 = arith.constant 0 : index
      %61 = vector.load %arg26[%c0_38, %c0_39] : memref<16x64xf32, #tpu.memory_space<vmem>>, vector<16x64xf32>
      tpu.vector_store %arg26[%c0_38, %c0_39], %60 {strides = array<i32>} : memref<16x64xf32, #tpu.memory_space<vmem>>, vector<16x64xf32>,
    } else {
    }
    %c1_i32 = arith.constant 1 : i32
    %27 = arith.cmpi eq, %arg0, %c1_i32 : i32
    %c3_i32_21 = arith.constant 3 : i32
    %28 = arith.cmpi eq, %arg1, %c3_i32_21 : i32
    %29 = arith.andi %27, %28 : i1
    %30 = arith.extui %29 : i1 to i32
    %c0_i32_22 = arith.constant 0 : i32
    %31 = arith.cmpi ne, %30, %c0_i32_22 : i32
    scf.if %31 {
      %c0_23 = arith.constant 0 : index
      %c0_24 = arith.constant 0 : index
      %32 = vector.load %arg26[%c0_23, %c0_24] : memref<16x64xf32, #tpu.memory_space<vmem>>, vector<16x64xf32>
      %33 = vector.shape_cast %32 : vector<16x64xf32> to vector<2x8x64xf32>
      %cst_25 = arith.constant dense<0.000000e+00> : vector<2x64xf32>
      %34 = vector.multi_reduction <add>, %33, %cst_25 [1] : vector<2x8x64xf32> to vector<2x64xf32>
      %cst_26 = arith.constant 8.000000e+00 : f32
      %35 = vector.broadcast %cst_26 : f32 to vector<2x64xf32>
      %36 = arith.divf %34, %35 : vector<2x64xf32>
      %c0_27 = arith.constant 0 : index
      %c0_28 = arith.constant 0 : index
      %37 = vector.load %arg20[%c0_27, %c0_28] : memref<64x96xf32, #tpu.memory_space<vmem>>, vector<64x96xf32>
      %cst_29 = arith.constant dense<0.000000e+00> : vector<2x96xf32>
      %38 = tpu.matmul %36, %37, %cst_29 {dimension_numbers = #tpu.dot_dimension_numbers<[1], [0], [0], [1], [0, 0, 1, 1], [], []>} : vector<2x64xf32>, vector<64x96xf32>, vector<2x96xf32> -> vector<2x96xf32>
      %c0_30 = arith.constant 0 : index
      %c0_31 = arith.constant 0 : index
      %39 = vector.load %arg3[%c0_30, %c0_31] : memref<2x16xf32, #tpu.memory_space<vmem>>, vector<2x16xf32>
      %c0_32 = arith.constant 0 : index
      %c0_33 = arith.constant 0 : index
      %40 = vector.load %arg21[%c0_32, %c0_33] : memref<16x96xf32, #tpu.memory_space<vmem>>, vector<16x96xf32>
      %cst_34 = arith.constant dense<0.000000e+00> : vector<2x96xf32>
      %41 = tpu.matmul %39, %40, %cst_34 {dimension_numbers = #tpu.dot_dimension_numbers<[1], [0], [0], [1], [0, 0, 1, 1], [], []>} : vector<2x16xf32>, vector<16x96xf32>, vector<2x96xf32> -> vector<2x96xf32>
      %42 = arith.addf %38, %41 : vector<2x96xf32>
      %c0_35 = arith.constant 0 : index
      %c0_36 = arith.constant 0 : index
      %43 = vector.load %arg22[%c0_35, %c0_36] : memref<1x96xf32, #tpu.memory_space<vmem>>, vector<1x96xf32>
      %44 = vector.broadcast %43 : vector<1x96xf32> to vector<2x96xf32>
      %45 = arith.addf %42, %44 : vector<2x96xf32>
      %cst_37 = arith.constant 0.000000e+00 : f32
      %46 = vector.broadcast %cst_37 : f32 to vector<2x96xf32>
      %47 = arith.maximumf %45, %46 : vector<2x96xf32>
      %c0_38 = arith.constant 0 : index
      %c0_39 = arith.constant 0 : index
      %48 = vector.load %arg23[%c0_38, %c0_39] : memref<96x8xf32, #tpu.memory_space<vmem>>, vector<96x8xf32>
      %cst_40 = arith.constant dense<0.000000e+00> : vector<2x8xf32>
      %49 = tpu.matmul %47, %48, %cst_40 {dimension_numbers = #tpu.dot_dimension_numbers<[1], [0], [0], [1], [0, 0, 1, 1], [], []>} : vector<2x96xf32>, vector<96x8xf32>, vector<2x8xf32> -> vector<2x8xf32>
      %c0_41 = arith.constant 0 : index
      %c0_42 = arith.constant 0 : index
      %50 = vector.load %arg24[%c0_41, %c0_42] : memref<1x8xf32, #tpu.memory_space<vmem>>, vector<1x8xf32>
      %51 = vector.broadcast %50 : vector<1x8xf32> to vector<2x8xf32>
      %52 = arith.addf %49, %51 : vector<2x8xf32>
      %c0_43 = arith.constant 0 : index
      %c0_44 = arith.constant 0 : index
      %53 = vector.load %arg25[%c0_43, %c0_44] : memref<2x8xf32, #tpu.memory_space<vmem>>, vector<2x8xf32>
      tpu.vector_store %arg25[%c0_43, %c0_44], %52 {strides = array<i32>} : memref<2x8xf32, #tpu.memory_space<vmem>>, vector<2x8xf32>,
    } else {
    }
    return
  }
  func.func @transform_0(%arg0: i32, %arg1: i32) -> (i32, i32, i32) {
    %c0_i32 = arith.constant 0 : i32
    %c0_i32_0 = arith.constant 0 : i32
    %c0_i32_1 = arith.constant 0 : i32
    %c0_i32_2 = arith.constant 0 : i32
    return %c0_i32, %c0_i32_0, %c0_i32_1 : i32, i32, i32
  }
  func.func @transform_1(%arg0: i32, %arg1: i32) -> (i32, i32) {
    %c0_i32 = arith.constant 0 : i32
    %c0_i32_0 = arith.constant 0 : i32
    %c0_i32_1 = arith.constant 0 : i32
    return %c0_i32, %c0_i32_0 : i32, i32
  }
  func.func @transform_2(%arg0: i32, %arg1: i32) -> (i32, i32) {
    %c0_i32 = arith.constant 0 : i32
    %c0_i32_0 = arith.constant 0 : i32
    %c0_i32_1 = arith.constant 0 : i32
    return %c0_i32, %c0_i32_0 : i32, i32
  }
  func.func @transform_3(%arg0: i32, %arg1: i32) -> (i32, i32) {
    %c0_i32 = arith.constant 0 : i32
    %c0_i32_0 = arith.constant 0 : i32
    %c0_i32_1 = arith.constant 0 : i32
    return %c0_i32, %c0_i32_0 : i32, i32
  }
  func.func @transform_4(%arg0: i32, %arg1: i32) -> (i32, i32, i32, i32) {
    %c0_i32 = arith.constant 0 : i32
    %c0_i32_0 = arith.constant 0 : i32
    %c0_i32_1 = arith.constant 0 : i32
    %c0_i32_2 = arith.constant 0 : i32
    return %arg0, %c0_i32, %c0_i32_0, %c0_i32_1 : i32, i32, i32, i32
  }
  func.func @transform_5(%arg0: i32, %arg1: i32) -> (i32, i32, i32, i32) {
    %c0_i32 = arith.constant 0 : i32
    %c0_i32_0 = arith.constant 0 : i32
    %c0_i32_1 = arith.constant 0 : i32
    %c0_i32_2 = arith.constant 0 : i32
    return %arg0, %c0_i32, %c0_i32_0, %c0_i32_1 : i32, i32, i32, i32
  }
  func.func @transform_6(%arg0: i32, %arg1: i32) -> (i32, i32, i32, i32) {
    %c0_i32 = arith.constant 0 : i32
    %c0_i32_0 = arith.constant 0 : i32
    %c0_i32_1 = arith.constant 0 : i32
    %c0_i32_2 = arith.constant 0 : i32
    return %arg0, %c0_i32, %c0_i32_0, %c0_i32_1 : i32, i32, i32, i32
  }
  func.func @transform_7(%arg0: i32, %arg1: i32) -> (i32, i32, i32, i32) {
    %c0_i32 = arith.constant 0 : i32
    %c0_i32_0 = arith.constant 0 : i32
    %c0_i32_1 = arith.constant 0 : i32
    %c0_i32_2 = arith.constant 0 : i32
    return %arg0, %c0_i32, %c0_i32_0, %c0_i32_1 : i32, i32, i32, i32
  }
  func.func @transform_8(%arg0: i32, %arg1: i32) -> (i32, i32, i32, i32) {
    %c0_i32 = arith.constant 0 : i32
    %c0_i32_0 = arith.constant 0 : i32
    %c0_i32_1 = arith.constant 0 : i32
    %c0_i32_2 = arith.constant 0 : i32
    return %arg0, %c0_i32, %c0_i32_0, %c0_i32_1 : i32, i32, i32, i32
  }
  func.func @transform_9(%arg0: i32, %arg1: i32) -> (i32, i32, i32) {
    %c0_i32 = arith.constant 0 : i32
    %c0_i32_0 = arith.constant 0 : i32
    %c0_i32_1 = arith.constant 0 : i32
    return %arg0, %c0_i32, %c0_i32_0 : i32, i32, i32
  }
  func.func @transform_10(%arg0: i32, %arg1: i32) -> (i32, i32, i32) {
    %c0_i32 = arith.constant 0 : i32
    %c0_i32_0 = arith.constant 0 : i32
    %c0_i32_1 = arith.constant 0 : i32
    return %arg0, %c0_i32, %c0_i32_0 : i32, i32, i32
  }
  func.func @transform_11(%arg0: i32, %arg1: i32) -> (i32, i32, i32) {
    %c0_i32 = arith.constant 0 : i32
    %c0_i32_0 = arith.constant 0 : i32
    %c0_i32_1 = arith.constant 0 : i32
    return %arg0, %c0_i32, %c0_i32_0 : i32, i32, i32
  }
  func.func @transform_12(%arg0: i32, %arg1: i32) -> (i32, i32, i32) {
    %c0_i32 = arith.constant 0 : i32
    %c0_i32_0 = arith.constant 0 : i32
    %c0_i32_1 = arith.constant 0 : i32
    return %arg0, %c0_i32, %c0_i32_0 : i32, i32, i32
  }
  func.func @transform_13(%arg0: i32, %arg1: i32) -> (i32, i32, i32) {
    %c0_i32 = arith.constant 0 : i32
    %c0_i32_0 = arith.constant 0 : i32
    %c0_i32_1 = arith.constant 0 : i32
    return %arg0, %c0_i32, %c0_i32_0 : i32, i32, i32
  }
  func.func @transform_14(%arg0: i32, %arg1: i32) -> (i32, i32, i32) {
    %c0_i32 = arith.constant 0 : i32
    %c0_i32_0 = arith.constant 0 : i32
    return %arg0, %c0_i32, %arg1 : i32, i32, i32
  }
  func.func @transform_15(%arg0: i32, %arg1: i32) -> (i32, i32, i32) {
    %c0_i32 = arith.constant 0 : i32
    %c0_i32_0 = arith.constant 0 : i32
    return %arg0, %c0_i32, %arg1 : i32, i32, i32
  }
  func.func @transform_16(%arg0: i32, %arg1: i32) -> (i32, i32, i32) {
    %c0_i32 = arith.constant 0 : i32
    %c0_i32_0 = arith.constant 0 : i32
    return %arg0, %arg1, %c0_i32 : i32, i32, i32
  }
  func.func @transform_17(%arg0: i32, %arg1: i32) -> (i32, i32, i32) {
    %c0_i32 = arith.constant 0 : i32
    %c0_i32_0 = arith.constant 0 : i32
    %c0_i32_1 = arith.constant 0 : i32
    return %arg0, %c0_i32, %c0_i32_0 : i32, i32, i32
  }
  func.func @transform_18(%arg0: i32, %arg1: i32) -> (i32, i32) {
    %c0_i32 = arith.constant 0 : i32
    %c0_i32_0 = arith.constant 0 : i32
    %c0_i32_1 = arith.constant 0 : i32
    return %c0_i32, %c0_i32_0 : i32, i32
  }
  func.func @transform_19(%arg0: i32, %arg1: i32) -> (i32, i32) {
    %c0_i32 = arith.constant 0 : i32
    %c0_i32_0 = arith.constant 0 : i32
    %c0_i32_1 = arith.constant 0 : i32
    return %c0_i32, %c0_i32_0 : i32, i32
  }
  func.func @transform_20(%arg0: i32, %arg1: i32) -> (i32, i32) {
    %c0_i32 = arith.constant 0 : i32
    %c0_i32_0 = arith.constant 0 : i32
    %c0_i32_1 = arith.constant 0 : i32
    return %c0_i32, %c0_i32_0 : i32, i32
  }
  func.func @transform_21(%arg0: i32, %arg1: i32) -> (i32, i32) {
    %c0_i32 = arith.constant 0 : i32
    %c0_i32_0 = arith.constant 0 : i32
    %c0_i32_1 = arith.constant 0 : i32
    return %c0_i32, %c0_i32_0 : i32, i32
  }
  func.func @transform_22(%arg0: i32, %arg1: i32) -> (i32, i32) {
    %c0_i32 = arith.constant 0 : i32
    %c0_i32_0 = arith.constant 0 : i32
    %c0_i32_1 = arith.constant 0 : i32
    return %c0_i32, %c0_i32_0 : i32, i32
  }
  func.func @transform_23(%arg0: i32, %arg1: i32) -> (i32, i32) {
    %c0_i32 = arith.constant 0 : i32
    %c0_i32_0 = arith.constant 0 : i32
    %c0_i32_1 = arith.constant 0 : i32
    return %c0_i32, %c0_i32_0 : i32, i32
  }
}

</mosaic_0001>

<bundles_post_ra>
// kernel: tpu_custom_call.1
= control target key start
LH: loop header
LB: loop body
LE: loop exit
PB: predicated region body
PF: predicated region fallthrough
CT: control target
= control target key end

     0   :  { %s9797_s0 = inlined_call_operand.vmem [shape: f32[2,8,16], index: 0, kind: input, shape index: {}]   ;;  %s9798_s1 = inlined_call_operand.vmem [shape: f32[2,16], index: 1, kind: input, shape index: {}]   ;;  %s9799_s2 = inlined_call_operand.vmem [shape: f32[16,64], index: 2, kind: input, shape index: {}]   ;;  %s9800_s3 = inlined_call_operand.vmem [shape: f32[1,64], index: 3, kind: input, shape index: {}]   ;;  %s9801_s4 = inlined_call_operand.vmem [shape: f32[2,8,64,8], index: 4, kind: input, shape index: {}]   ;;  %s9802_s5 = inlined_call_operand.vmem [shape: f32[2,8,1,8], index: 5, kind: input, shape index: {}]   ;;  %s9803_s6 = inlined_call_operand.vmem [shape: f32[2,8,64,8], index: 6, kind: input, shape index: {}]   ;;  %s9804_s7 = inlined_call_operand.vmem [shape: f32[2,8,1,8], index: 7, kind: input, shape index: {}]   ;;  %s9805_s8 = inlined_call_operand.vmem [shape: f32[2,8,64,64], index: 8, kind: input, shape index: {}]   ;;  %s9806_s9 = inlined_call_operand.vmem [shape: f32[2,1,64], index: 9, kind: input, shape index: {}]   ;;  %s9807_s10 = inlined_call_operand.vmem [shape: f32[2,1,64], index: 10, kind: input, shape index: {}]   ;;  %s9808_s11 = inlined_call_operand.vmem [shape: f32[2,1,64], index: 11, kind: input, shape index: {}]   ;;  %s9809_s12 = inlined_call_operand.vmem [shape: f32[2,1,64], index: 12, kind: input, shape index: {}]   ;;  %s9810_s13 = inlined_call_operand.vmem [shape: f32[2,1,64], index: 13, kind: input, shape index: {}]   ;;  %s9811_s14 = inlined_call_operand.vmem [shape: f32[2,64,2048], index: 14, kind: input, shape index: {}]   ;;  %s9812_s15 = inlined_call_operand.vmem [shape: f32[2,1,2048], index: 15, kind: input, shape index: {}]   ;;  %s9813_s16 = inlined_call_operand.vmem [shape: f32[2,2048,64], index: 16, kind: input, shape index: {}]   ;;  %s9814_s17 = inlined_call_operand.vmem [shape: f32[2,1,64], index: 17, kind: input, shape index: {}]   ;;  %s9815_s18 = inlined_call_operand.vmem [shape: f32[64,96], index: 18, kind: input, shape index: {}]   ;;  %s9816_s19 = inlined_call_operand.vmem [shape: f32[16,96], index: 19, kind: input, shape index: {}]   ;;  %s9817_s20 = inlined_call_operand.vmem [shape: f32[1,96], index: 20, kind: input, shape index: {}]   ;;  %s9818_s21 = inlined_call_operand.vmem [shape: f32[96,8], index: 21, kind: input, shape index: {}]   ;;  %s9819_s22 = inlined_call_operand.vmem [shape: f32[1,8], index: 22, kind: input, shape index: {}]   ;;  %s9820_s23 = inlined_call_operand.hbm [shape: f32[2,8], index: 23, kind: output, shape index: {}]  }
   0x1   :  { %9834 = sst [smem:[#allocation17_spill]] %s9797_s0 }
   0x2   :  { %9835 = sst [smem:[#allocation18_spill]] %s9798_s1 }
   0x3   :  { %9836 = sst [smem:[#allocation19_spill]] %s9799_s2 }
   0x4   :  { %9837 = sst [smem:[#allocation20_spill]] %s9800_s3 }
   0x5   :  { %9838 = sst [smem:[#allocation21_spill]] %s9801_s4 }
   0x6   :  { %9839 = sst [smem:[#allocation22_spill]] %s9802_s5 }
   0x7   :  { %9840 = sst [smem:[#allocation23_spill]] %s9803_s6 }
   0x8   :  { %9841 = sst [smem:[#allocation24_spill]] %s9804_s7 }
   0x9   :  { %9842 = sst [smem:[#allocation25_spill]] %s9805_s8 }
   0xa   :  { %9843 = sst [smem:[#allocation26_spill]] %s9811_s14 }
   0xb   :  { %9844 = sst [smem:[#allocation27_spill]] %s9813_s16 }
   0xc   :  { %9845 = sst [smem:[#allocation28_spill]] %s9815_s18 }
   0xd   :  { %9846 = sst [smem:[#allocation29_spill]] %s9816_s19 }
   0xe   :  { %9847 = sst [smem:[#allocation30_spill]] %s9817_s20 }
   0xf   :  { %9848 = sst [smem:[#allocation31_spill]] %s9818_s21 }
  0x10   :  { %9849 = sst [smem:[#allocation32_spill]] %s9819_s22 }
  0x11   :  { %9850 = sst [smem:[#allocation33_spill]] %s9820_s23 }
  0x12   :  { %28 = vsyncpa [#allocation6], 0  ;;  %s8743_s4 = smov 0   ;;  %s8745_s30 = smov 0  }
  0x13   :  { %s8747_s24 = smov 0   ;;  %s8749_s25 = smov 0  }
  0x14   :  { %s8751_s5 = smov 0   ;;  %s8753_s1 = smov 0  }
  0x15   :  { %s8755_s26 = smov 0  }
  0x16 LB: > { %9851 = sst [smem:[#allocation8_spill]] %s8595_s30  ;;  %s43_s6 = sadd.s32 1, %s8607_s5  ;;  %s8615_s26 = sphi %s8755_s26, %s34_s26   ;;  %s8611_s1 = sphi %s8753_s1, %s9896_s1   ;;  %s8607_s5 = sphi %s8751_s5, %s9895_s5   ;;  %s8603_s25 = sphi %s8749_s25, %s9894_s25   ;;  %s8599_s24 = sphi %s8747_s24, %s9893_s24   ;;  %s8595_s30 = sphi %s8745_s30, %s9892_s30   ;;  %s8591_s4 = sphi %s8743_s4, %s9891_s4  }
  0x17   : > { %9852 = sst [smem:[#allocation9_spill]] %s8607_s5  ;;  %p44_p0 = scmp.ge.s32.totalorder %s43_s6, 4 }
  0x18   : > { %9853 = sst [smem:[#allocation10_spill]] %s8611_s1  ;;  %s46_s27 = sadd.s32 1, %s8611_s1 }
  0x19   : > { %9854 = sst [smem:[#allocation11_spill]] %s8615_s26  ;;  %p406_p1 = scmp.ne.s32.totalorder %s8595_s30, %s8591_s4 }
  0x1a   : > { %s9898_s6 = smov (%p44_p0, %s43_s6), 0  ;;  %s9900_s27 = smov (!%p44_p0, %s46_s27), %s8611_s1 }
  0x1b   : > { %9855 = sst [smem:[#allocation12_spill]] %s9898_s6  ;;  %p407_p2 = scmp.eq.s32.totalorder %s8615_s26, 0 }
  0x1c   : > { %p48_p3 = scmp.ge.s32.totalorder %s9900_s27, 2  ;;  %s395_s7 = ssub.s32 %s8607_s5, %s9898_s6 }
  0x1d   : > { %p408_p4 = por %p407_p2, %p406_p1  ;;  %s399_s3 = sadd.s32 1, %s8595_s30 }
  0x1e   : > { %s9902_s27 = smov (%p48_p3, %s9900_s27), 0  ;;  %p6963_p6 = scmp.ge.s32.totalorder %s8615_s26, 8 }
  0x1f   : > { %9856 = sst [smem:[#allocation13_spill]] %s9902_s27  ;;  %s394_s28 = ssub.s32 %s8611_s1, %s9902_s27 }
  0x20   : > { %s396_s29 = sor.u32 %s395_s7, %s394_s28 }
  0x21   : > { %p397_p5 = scmp.eq.s32.totalorder %s396_s29, 0  ;;  %667 = sbr.rel (%p6963_p6) target bundleno = 64 (0x40), region = 52 }
  0x23   : > { %s8795_s0 = scalar_select %p397_p5, %s8595_s30, %s399_s3  }
  0x25   : > { %9857 = sst [smem:[#allocation14_spill]] %s8795_s0 }
  0x26   : > { %738 = sbr.rel (!%p408_p4) target bundleno = 64 (0x40), region = 96  ;;  %s740_s2 = sand.u32 (%p408_p4), 1, %s8595_s30  }
  0x27   : > { %s6965_s23 = sshll.u32 (%p408_p4), %s8607_s5, 2  ;;  %s6964_s6 = sshll.u32 (%p408_p4), %s740_s2, 8 }
  0x28   : > { %s6966_s22 = sshll.u32 (%p408_p4), %s8611_s1, 7  ;;  %s9858_s14 = sld [smem:[#allocation26_spill]] (%p408_p4) }
  0x29   : > { %s745_s20 = sadd.s32 (%p408_p4), %s6966_s22, %s6965_s23  ;;  %s8809_s2 = scalar_lea.vmem (%p408_p4), [#allocation4], %s6964_s6 }
  0x2a   : > { %s6967_s21 = sshll.u32 (%p408_p4), %s745_s20, 3 }
  0x2e   : > { %s8804_s7 = scalar_lea.vmem %s9858_s14, %s6967_s21 }
  0x2f   : > { %v760_v0 = vld [vmem:[%s8804_s7] sm:$0xff]  ;;  %v762_v1 = vld [vmem:[%s8804_s7 + $0x8] sm:$0xff]  ;;  %v764_v2 = vld [vmem:[%s8804_s7 + $0x10] sm:$0xff] }
  0x30   : > { %761 = vst [vmem:[%s8809_s2] sm:$0xff] %v760_v0  ;;  %763 = vst [vmem:[%s8809_s2 + $0x8] sm:$0xff] %v762_v1  ;;  %v766_v3 = vld [vmem:[%s8804_s7 + $0x18] sm:$0xff]  ;;  %v768_v4 = vld [vmem:[%s8804_s7 + $0x80] sm:$0xff] }
  0x31   : > { %765 = vst [vmem:[%s8809_s2 + $0x10] sm:$0xff] %v764_v2  ;;  %v770_v5 = vld [vmem:[%s8804_s7 + $0x88] sm:$0xff]  ;;  %767 = vst [vmem:[%s8809_s2 + $0x18] sm:$0xff] %v766_v3  ;;  %v772_v6 = vld [vmem:[%s8804_s7 + $0x90] sm:$0xff] }
  0x32   : > { %769 = vst [vmem:[%s8809_s2 + $0x20] sm:$0xff] %v768_v4  ;;  %771 = vst [vmem:[%s8809_s2 + $0x28] sm:$0xff] %v770_v5  ;;  %v774_v7 = vld [vmem:[%s8804_s7 + $0x98] sm:$0xff]  ;;  %v776_v8 = vld [vmem:[%s8804_s7 + $0x100] sm:$0xff] }
  0x33   : > { %773 = vst [vmem:[%s8809_s2 + $0x30] sm:$0xff] %v772_v6  ;;  %775 = vst [vmem:[%s8809_s2 + $0x38] sm:$0xff] %v774_v7  ;;  %v778_v9 = vld [vmem:[%s8804_s7 + $0x108] sm:$0xff]  ;;  %v780_v10 = vld [vmem:[%s8804_s7 + $0x110] sm:$0xff] }
  0x34   : > { %777 = vst [vmem:[%s8809_s2 + $0x40] sm:$0xff] %v776_v8  ;;  %v782_v11 = vld [vmem:[%s8804_s7 + $0x118] sm:$0xff]  ;;  %779 = vst [vmem:[%s8809_s2 + $0x48] sm:$0xff] %v778_v9  ;;  %v784_v12 = vld [vmem:[%s8804_s7 + $0x180] sm:$0xff] }
  0x35   : > { %781 = vst [vmem:[%s8809_s2 + $0x50] sm:$0xff] %v780_v10  ;;  %783 = vst [vmem:[%s8809_s2 + $0x58] sm:$0xff] %v782_v11  ;;  %v786_v13 = vld [vmem:[%s8804_s7 + $0x188] sm:$0xff]  ;;  %v788_v14 = vld [vmem:[%s8804_s7 + $0x190] sm:$0xff] }
  0x36   : > { %785 = vst [vmem:[%s8809_s2 + $0x60] sm:$0xff] %v784_v12  ;;  %787 = vst [vmem:[%s8809_s2 + $0x68] sm:$0xff] %v786_v13  ;;  %v790_v15 = vld [vmem:[%s8804_s7 + $0x198] sm:$0xff]  ;;  %v792_v16 = vld [vmem:[%s8804_s7 + $0x200] sm:$0xff] }
  0x37   : > { %789 = vst [vmem:[%s8809_s2 + $0x70] sm:$0xff] %v788_v14  ;;  %v794_v17 = vld [vmem:[%s8804_s7 + $0x208] sm:$0xff]  ;;  %791 = vst [vmem:[%s8809_s2 + $0x78] sm:$0xff] %v790_v15  ;;  %v796_v18 = vld [vmem:[%s8804_s7 + $0x210] sm:$0xff] }
  0x38   : > { %793 = vst [vmem:[%s8809_s2 + $0x80] sm:$0xff] %v792_v16  ;;  %795 = vst [vmem:[%s8809_s2 + $0x88] sm:$0xff] %v794_v17  ;;  %v798_v19 = vld [vmem:[%s8804_s7 + $0x218] sm:$0xff]  ;;  %v800_v20 = vld [vmem:[%s8804_s7 + $0x280] sm:$0xff] }
  0x39   : > { %797 = vst [vmem:[%s8809_s2 + $0x90] sm:$0xff] %v796_v18  ;;  %799 = vst [vmem:[%s8809_s2 + $0x98] sm:$0xff] %v798_v19  ;;  %v802_v21 = vld [vmem:[%s8804_s7 + $0x288] sm:$0xff]  ;;  %v804_v22 = vld [vmem:[%s8804_s7 + $0x290] sm:$0xff] }
  0x3a   : > { %801 = vst [vmem:[%s8809_s2 + $0xa0] sm:$0xff] %v800_v20  ;;  %v806_v23 = vld [vmem:[%s8804_s7 + $0x298] sm:$0xff]  ;;  %803 = vst [vmem:[%s8809_s2 + $0xa8] sm:$0xff] %v802_v21  ;;  %v808_v24 = vld [vmem:[%s8804_s7 + $0x300] sm:$0xff] }
  0x3b   : > { %805 = vst [vmem:[%s8809_s2 + $0xb0] sm:$0xff] %v804_v22  ;;  %807 = vst [vmem:[%s8809_s2 + $0xb8] sm:$0xff] %v806_v23  ;;  %v810_v25 = vld [vmem:[%s8804_s7 + $0x308] sm:$0xff]  ;;  %v812_v26 = vld [vmem:[%s8804_s7 + $0x310] sm:$0xff] }
  0x3c   : > { %809 = vst [vmem:[%s8809_s2 + $0xc0] sm:$0xff] %v808_v24  ;;  %811 = vst [vmem:[%s8809_s2 + $0xc8] sm:$0xff] %v810_v25  ;;  %v814_v27 = vld [vmem:[%s8804_s7 + $0x318] sm:$0xff]  ;;  %v816_v28 = vld [vmem:[%s8804_s7 + $0x380] sm:$0xff] }
  0x3d   : > { %813 = vst [vmem:[%s8809_s2 + $0xd0] sm:$0xff] %v812_v26  ;;  %v818_v29 = vld [vmem:[%s8804_s7 + $0x388] sm:$0xff]  ;;  %815 = vst [vmem:[%s8809_s2 + $0xd8] sm:$0xff] %v814_v27  ;;  %v820_v30 = vld [vmem:[%s8804_s7 + $0x390] sm:$0xff] }
  0x3e   : > { %817 = vst [vmem:[%s8809_s2 + $0xe0] sm:$0xff] %v816_v28  ;;  %819 = vst [vmem:[%s8809_s2 + $0xe8] sm:$0xff] %v818_v29  ;;  %v822_v31 = vld [vmem:[%s8804_s7 + $0x398] sm:$0xff] }
  0x3f   : > { %821 = vst [vmem:[%s8809_s2 + $0xf0] sm:$0xff] %v820_v30  ;;  %823 = vst [vmem:[%s8809_s2 + $0xf8] sm:$0xff] %v822_v31 }
  0x40 PF: > { %p6968_p7 = scmp.ge.s32.totalorder %s8615_s26, 1  ;;  %p859_p8 = scmp.lt.s32.totalorder %s8615_s26, 9 }
  0x42   : > { %p860_p9 = pnand %p6968_p7, %p859_p8 }
  0x44   : > { %863 = sbr.rel (%p860_p9) target bundleno = 7823 (0x1e8f), region = 131 }
  0x49   : > { %s866_s18 = sand.u32 1, %s8591_s4   ;;  %p982_p10 = scmp.lt.s32.totalorder %s8603_s25, 1 }
  0x4a   : > { %s8876_s20 = sshll.u32 %s866_s18, 8  ;;  %s6978_s21 = sshll.u32 %s8599_s24, 2 }
  0x4b   : > { %p1024_p11 = scmp.lt.s32.totalorder %s6978_s21, 15  ;;  %s9859_s28 = sld [smem:[#allocation21_spill]] }
  0x4c   : > { %s8880_s22 = scalar_select %p982_p10, %s8603_s25, 1 }
  0x4d   : > { %s9904_s21 = smov (!%p1024_p11, %s6978_s21), 15  ;;  %s9861_s2 = sld [smem:[#allocation22_spill]] }
  0x4e   : > { %s7301_s23 = sshll.u32 %s8880_s22, 9  ;;  %s6972_s6 = sshll.u32 %s8880_s22, 3 }
  0x4f   : > { %s9863_s5 = sld [smem:[#allocation23_spill]]  ;;  %s6979_s3 = sshll.u32 %s8880_s22, 4 }
  0x50   : > { %s9864_s19 = sld [smem:[#allocation24_spill]]  ;;  %s6980_s7 = sshll.u32 %s8599_s24, 6 }
  0x51   : > { %s8887_s29 = scalar_lea.vmem %s9859_s28, %s7301_s23  ;;  %s9865_s8 = sld [smem:[#allocation25_spill]] }
  0x52   : > { %9860 = sst [smem:[#allocation15_spill]] %s8887_s29  ;;  %p1033_p12 = scmp.lt.s32.totalorder %s6980_s7, 255 }
  0x53   : > { %s8892_s18 = scalar_lea.vmem %s9861_s2, %s6972_s6  ;;  %s8931_s2 = sadd.s32 %s6979_s3, %s9904_s21 }
  0x54   : > { %9862 = sst [smem:[#allocation16_spill]] %s8892_s18  ;;  %s6981_s18 = sshll.u32 %s8880_s22, 8 }
  0x55   : > { %s8897_s0 = scalar_lea.vmem %s9863_s5, %s7301_s23  ;;  %s9906_s7 = smov (!%p1033_p12, %s6980_s7), 255 }
  0x56   : > { %s8902_s16 = scalar_lea.vmem %s9864_s19, %s6972_s6  ;;  %s1042_s26 = scalar_lea.vmem %s9814_s17, %s8880_s22 }
  0x57   : > { %s8907_s28 = scalar_lea.vmem %s9865_s8, %s7301_s23  ;;  %p1043_p13 = scmp.eq.s32.totalorder %s8603_s25, 0 }
  0x58   : > { %s1036_s4 = sadd.s32 %s6981_s18, %s9906_s7  ;;  %p1044_p0 = scmp.eq.s32.totalorder %s8599_s24, 0 }
  0x59   : > { %s6982_s23 = sshll.u32 %s1036_s4, 3  ;;  %s9866_s21 = sld [smem:[#allocation27_spill]] }
  0x5a   : > { %p1045_p1 = pnand %p1044_p0, %p1043_p13  ;;  %s8950_s5 = scalar_lea.vmem [#allocation4], %s8876_s20 }
  0x5b   : > { %s9867_s29 = sld [smem:[#allocation19_spill]] (!%p1045_p1) }
  0x5c   : > { %1048 = sbr.rel (%p1045_p1) target bundleno = 300 (0x12c), region = 139  ;;  %s9868_s19 = sld [smem:[#allocation17_spill]] (!%p1045_p1) }
  0x5f   : > { %s8947_s3 = scalar_lea.vmem %s9866_s21, %s6982_s23  ;;  %s9869_s23 = sld [smem:[#allocation20_spill]] (!%p1045_p1) }
  0x61   : > { %v1052_v32 = vld [vmem:[%s9867_s29 + $0x8] sm:$0xff]  ;;  %v1051_v33 = vld [vmem:[%s9867_s29] sm:$0xff]  ;;  %vm1060_vm0 = vcmask 130048   ;;  %vm1142_vm1 = vcmask 523264  }
  0x62   : > { %v1049_v34 = vld [vmem:[%s9868_s19] sm:$0xff]  ;;  %7713 = vmatprep.subr.mxu0 %v1052_v32  ;;  %v1050_v35 = vld [vmem:[%s9868_s19 + $0x8] sm:$0xff] }
  0x63   : > { %7717 = vmatprep.mubr.msk.f32.mxu0 %vm1060_vm0, %v1049_v34  ;;  %7714 = vmatpush3.msra.mxu0 %v1052_v32 }
  0x64   : > { %7715 = vmatprep.subr.mxu0 %v1051_v33 }
  0x65   : > { %7716 = vmatpush3.msra.mxu0 %v1051_v33  ;;  %v6983_v36 = vld [vmem:[%s9869_s23] ss:$0 sm:$0xff] }
  0x66   : > { %7718 = vmatmul.mubr.msk.f32.vlgmr.msra.gmra.mxu0 %vm1060_vm0, %v1050_v35 }
 0x126   : > { %v7719_v37 = vpop.f32.mrf.mxu0 }
 0x127   : > { %v1139_v38 = vadd.f32 %v7719_v37, %v6983_v36 }
 0x128   : > { %v1133_v39 = vpop.f32.mrf.mxu0 }
 0x129   : > { %1144 = vst.msk [vmem:[#allocation2 + $0x8] sm:$0xff] %vm1142_vm1, %v1139_v38  ;;  %v1134_v40 = vadd.f32 %v6983_v36, %v1133_v39 }
 0x12b   : > { %1143 = vst.msk [vmem:[#allocation2] sm:$0xff] %vm1142_vm1, %v1134_v40 }
 0x12c PF: > { %p6986_p2 = scmp.ne.s32.totalorder %s8599_s24, 0 }
 0x12d   : > { %s9870_s8 = sld [smem:[#allocation15_spill]] (!%p6986_p2)  ;;  %s9872_s30 = scalar_lea.vmem (!%p6986_p2), %s9806_s9, %s8880_s22 }
 0x12e   : > { %1147 = sbr.rel (%p6986_p2) target bundleno = 6631 (0x19e7), region = 143  ;;  %s9871_s21 = sld [smem:[#allocation16_spill]] (!%p6986_p2) }
 0x12f   : > { %s9873_s18 = scalar_lea.vmem (!%p6986_p2), %s9807_s10, %s8880_s22  ;;  %s9874_s20 = scalar_lea.vmem (!%p6986_p2), %s9808_s11, %s8880_s22 }
 0x133   : > { %v1262_v41 = vld [vmem:[%s8897_s0 + $0x38] sm:$0xff]  ;;  %v1261_v43 = vld [vmem:[%s8897_s0 + $0x30] sm:$0xff]  ;;  %v1260_v45 = vld [vmem:[%s8897_s0 + $0x28] sm:$0xff]  ;;  %vm1173_vm2 = vcmask 523264   ;;  %v8617_v59 = vmov 0.0   ;;  %vm8618_vm3 = vmmov 0  }
 0x134   : > { %v1165_v42 = vld [vmem:[%s9870_s8 + $0x38] sm:$0xff]  ;;  %7739 = vmatprep.subr.mxu1 %v1262_v41  ;;  %v1164_v44 = vld [vmem:[%s9870_s8 + $0x30] sm:$0xff]  ;;  %v1163_v46 = vld [vmem:[%s9870_s8 + $0x28] sm:$0xff]  ;;  %vm1428_vm4 = vcmask 64512  }
 0x135   : > { %7720 = vmatprep.subr.mxu0 %v1165_v42  ;;  %7740 = vmatpush3.msra.mxu1 %v1262_v41  ;;  %v1259_v47 = vld [vmem:[%s8897_s0 + $0x20] sm:$0xff]  ;;  %v1258_v49 = vld [vmem:[%s8897_s0 + $0x18] sm:$0xff]  ;;  %v1257_v51 = vld [vmem:[%s8897_s0 + $0x10] sm:$0xff] }
 0x136   : > { %7721 = vmatpush3.msra.mxu0 %v1165_v42  ;;  %7741 = vmatprep.subr.mxu1 %v1261_v43  ;;  %v1162_v48 = vld [vmem:[%s9870_s8 + $0x20] sm:$0xff]  ;;  %v1161_v50 = vld [vmem:[%s9870_s8 + $0x18] sm:$0xff]  ;;  %v1160_v52 = vld [vmem:[%s9870_s8 + $0x10] sm:$0xff] }
 0x137   : > { %7722 = vmatprep.subr.mxu0 %v1164_v44  ;;  %7742 = vmatpush3.msra.mxu1 %v1261_v43  ;;  %v1256_v53 = vld [vmem:[%s8897_s0 + $0x8] sm:$0xff]  ;;  %v1255_v55 = vld [vmem:[%s8897_s0] sm:$0xff]  ;;  %v1352_v6 = vld [vmem:[%s8907_s28 + $0x38] sm:$0xff] }
 0x138   : > { %7723 = vmatpush3.msra.mxu0 %v1164_v44  ;;  %7743 = vmatprep.subr.mxu1 %v1260_v45  ;;  %v1159_v54 = vld [vmem:[%s9870_s8 + $0x8] sm:$0xff]  ;;  %v1158_v56 = vld [vmem:[%s9870_s8] sm:$0xff]  ;;  %v1351_v7 = vld [vmem:[%s8907_s28 + $0x30] sm:$0xff] }
 0x139   : > { %7724 = vmatprep.subr.mxu0 %v1163_v46  ;;  %7744 = vmatpush3.msra.mxu1 %v1260_v45  ;;  %v8984_v57 = vld [vmem:[#allocation2] sm:$0xff]  ;;  %v8986_v58 = vld [vmem:[#allocation2 + $0x8] sm:$0xff]  ;;  %v1348_v10 = vld [vmem:[%s8907_s28 + $0x18] sm:$0xff] }
 0x13a   : > { %7725 = vmatpush3.msra.mxu0 %v1163_v46  ;;  %7745 = vmatprep.subr.mxu1 %v1259_v47  ;;  %v6991_v62 = vld [vmem:[%s8902_s16] ss:$0 sm:$0xff]  ;;  %v1350_v8 = vld [vmem:[%s8907_s28 + $0x28] sm:$0xff]  ;;  %v1347_v11 = vld [vmem:[%s8907_s28 + $0x10] sm:$0xff] }
 0x13b   : > { %7726 = vmatprep.subr.mxu0 %v1162_v48  ;;  %7746 = vmatpush3.msra.mxu1 %v1259_v47  ;;  %v6988_v0 = vld [vmem:[%s9871_s21] ss:$0 sm:$0xff]  ;;  %v1346_v12 = vld [vmem:[%s8907_s28 + $0x8] sm:$0xff]  ;;  %v7009_v34 = vld [vmem:[%s9870_s8 + $0x78] sm:$0xff] }
 0x13c   : > { %7727 = vmatpush3.msra.mxu0 %v1162_v48  ;;  %7747 = vmatprep.subr.mxu1 %v1258_v49  ;;  %v1349_v9 = vld [vmem:[%s8907_s28 + $0x20] sm:$0xff]  ;;  %v7008_v35 = vld [vmem:[%s9870_s8 + $0x70] sm:$0xff]  ;;  %v7007_v36 = vld [vmem:[%s9870_s8 + $0x68] sm:$0xff] }
 0x13d   : > { %7728 = vmatprep.subr.mxu0 %v1161_v50  ;;  %7748 = vmatpush3.msra.mxu1 %v1258_v49  ;;  %v1345_v13 = vld [vmem:[%s8907_s28] sm:$0xff]  ;;  %v7005_v38 = vld [vmem:[%s9870_s8 + $0x58] sm:$0xff]  ;;  %v7004_v39 = vld [vmem:[%s9870_s8 + $0x50] sm:$0xff] }
 0x13e   : > { %7729 = vmatpush3.msra.mxu0 %v1161_v50  ;;  %7749 = vmatprep.subr.mxu1 %v1257_v51  ;;  %v7006_v37 = vld [vmem:[%s9870_s8 + $0x60] sm:$0xff]  ;;  %v7003_v40 = vld [vmem:[%s9870_s8 + $0x48] sm:$0xff]  ;;  %v7021_v46 = vld [vmem:[%s8897_s0 + $0x78] sm:$0xff] }
 0x13f   : > { %7730 = vmatprep.subr.mxu0 %v1160_v52  ;;  %7750 = vmatpush3.msra.mxu1 %v1257_v51  ;;  %v7002_v41 = vld [vmem:[%s9870_s8 + $0x40] sm:$0xff]  ;;  %v7020_v49 = vld [vmem:[%s8897_s0 + $0x70] sm:$0xff]  ;;  %v7019_v50 = vld [vmem:[%s8897_s0 + $0x68] sm:$0xff] }
 0x140   : > { %7731 = vmatpush3.msra.mxu0 %v1160_v52  ;;  %7751 = vmatprep.subr.mxu1 %v1256_v53  ;;  %v7018_v51 = vld [vmem:[%s8897_s0 + $0x60] sm:$0xff]  ;;  %v7017_v52 = vld [vmem:[%s8897_s0 + $0x58] sm:$0xff] }
 0x141   : > { %7732 = vmatprep.subr.mxu0 %v1159_v54  ;;  %7752 = vmatpush3.msra.mxu1 %v1256_v53  ;;  %v7016_v53 = vld [vmem:[%s8897_s0 + $0x50] sm:$0xff] }
 0x142   : > { %7733 = vmatpush3.msra.mxu0 %v1159_v54  ;;  %7753 = vmatprep.subr.mxu1 %v1255_v55  ;;  %v7015_v54 = vld [vmem:[%s8897_s0 + $0x48] sm:$0xff] }
 0x143   : > { %7734 = vmatprep.subr.mxu0 %v1158_v56  ;;  %7754 = vmatpush3.msra.mxu1 %v1255_v55  ;;  %v7014_v55 = vld [vmem:[%s8897_s0 + $0x40] sm:$0xff] }
 0x144   : > { %7755 = vmatprep.mubr.msk.f32.mxu1 %vm1173_vm2, %v8984_v57  ;;  %7735 = vmatpush3.msra.mxu0 %v1158_v56 }
 0x145   : > { %7736 = vmatprep.mubr.msk.f32.mxu0 %vm1173_vm2, %v8984_v57  ;;  %7756 = vmatmul.mubr.msk.f32.vlgmr.msra.gmra.mxu1 %vm1173_vm2, %v8986_v58 }
 0x146   : > { %7737 = vmatmul.mubr.msk.f32.vlgmr.msra.gmra.mxu0 %vm1173_vm2, %v8986_v58  ;;  %7777 = vmatprep.subr.mxu1 %v8617_v59 }
 0x147   : > { %7774 = vmatprep.mubr.msk.f32.mxu0 %vm1173_vm2, %v8984_v57  ;;  %7779 = vmatprep.mubr.msk.f32.mxu1 %vm8618_vm3, %v8617_v59 }
 0x148   : > { %7758 = vmatprep.subr.mxu0 %v1352_v6 }
 0x149   : > { %7759 = vmatpush3.msra.mxu0 %v1352_v6 }
 0x14a   : > { %7760 = vmatprep.subr.mxu0 %v1351_v7 }
 0x14b   : > { %7761 = vmatpush3.msra.mxu0 %v1351_v7 }
 0x14c   : > { %7762 = vmatprep.subr.mxu0 %v1350_v8 }
 0x14d   : > { %7763 = vmatpush3.msra.mxu0 %v1350_v8 }
 0x14e   : > { %7764 = vmatprep.subr.mxu0 %v1349_v9 }
 0x14f   : > { %7765 = vmatpush3.msra.mxu0 %v1349_v9  ;;  %v7033_v9 = vld [vmem:[%s8907_s28 + $0x78] sm:$0xff] }
 0x150   : > { %7766 = vmatprep.subr.mxu0 %v1348_v10 }
 0x151   : > { %7767 = vmatpush3.msra.mxu0 %v1348_v10  ;;  %v7032_v10 = vld [vmem:[%s8907_s28 + $0x70] sm:$0xff] }
 0x152   : > { %7768 = vmatprep.subr.mxu0 %v1347_v11 }
 0x153   : > { %7769 = vmatpush3.msra.mxu0 %v1347_v11  ;;  %v7031_v11 = vld [vmem:[%s8907_s28 + $0x68] sm:$0xff] }
 0x154   : > { %7770 = vmatprep.subr.mxu0 %v1346_v12 }
 0x155   : > { %7771 = vmatpush3.msra.mxu0 %v1346_v12  ;;  %v7030_v12 = vld [vmem:[%s8907_s28 + $0x60] sm:$0xff] }
 0x156   : > { %7772 = vmatprep.subr.mxu0 %v1345_v13 }
 0x157   : > { %7773 = vmatpush3.msra.mxu0 %v1345_v13  ;;  %v7029_v13 = vld [vmem:[%s8907_s28 + $0x58] sm:$0xff] }
 0x158   : > { %7775 = vmatmul.mubr.msk.f32.vlgmr.msra.gmra.mxu0 %vm1173_vm2, %v8986_v58  ;;  %7797 = vmatprep.subr.mxu0 %v7009_v34 }
 0x159   : > { %7813 = vmatprep.mubr.msk.f32.mxu0 %vm1173_vm2, %v8984_v57  ;;  %7798 = vmatpush3.msra.mxu0 %v7009_v34 }
 0x15a   : > { %7799 = vmatprep.subr.mxu0 %v7008_v35 }
 0x15b   : > { %7800 = vmatpush3.msra.mxu0 %v7008_v35 }
 0x15c   : > { %7801 = vmatprep.subr.mxu0 %v7007_v36 }
 0x15d   : > { %7802 = vmatpush3.msra.mxu0 %v7007_v36 }
 0x15e   : > { %7803 = vmatprep.subr.mxu0 %v7006_v37 }
 0x15f   : > { %7804 = vmatpush3.msra.mxu0 %v7006_v37  ;;  %v7049_v37 = vld [vmem:[%s9870_s8 + $0xb8] sm:$0xff] }
 0x160   : > { %7805 = vmatprep.subr.mxu0 %v7005_v38 }
 0x161   : > { %7806 = vmatpush3.msra.mxu0 %v7005_v38  ;;  %v7048_v38 = vld [vmem:[%s9870_s8 + $0xb0] sm:$0xff] }
 0x162   : > { %7807 = vmatprep.subr.mxu0 %v7004_v39 }
 0x163   : > { %7808 = vmatpush3.msra.mxu0 %v7004_v39  ;;  %v7047_v39 = vld [vmem:[%s9870_s8 + $0xa8] sm:$0xff] }
 0x164   : > { %7809 = vmatprep.subr.mxu0 %v7003_v40 }
 0x165   : > { %7810 = vmatpush3.msra.mxu0 %v7003_v40  ;;  %v7046_v40 = vld [vmem:[%s9870_s8 + $0xa0] sm:$0xff] }
 0x166   : > { %7811 = vmatprep.subr.mxu0 %v7002_v41 }
 0x167   : > { %7812 = vmatpush3.msra.mxu0 %v7002_v41  ;;  %v7045_v41 = vld [vmem:[%s9870_s8 + $0x98] sm:$0xff] }
 0x168   : > { %7814 = vmatmul.mubr.msk.f32.vlgmr.msra.gmra.mxu0 %vm1173_vm2, %v8986_v58  ;;  %7835 = vmatprep.subr.mxu0 %v7033_v9 }
 0x169   : > { %7851 = vmatprep.mubr.msk.f32.mxu0 %vm1173_vm2, %v8984_v57  ;;  %7836 = vmatpush3.msra.mxu0 %v7033_v9 }
 0x16a   : > { %7837 = vmatprep.subr.mxu0 %v7032_v10 }
 0x16b   : > { %7838 = vmatpush3.msra.mxu0 %v7032_v10 }
 0x16c   : > { %7839 = vmatprep.subr.mxu0 %v7031_v11 }
 0x16d   : > { %7840 = vmatpush3.msra.mxu0 %v7031_v11  ;;  %v7063_v11 = vld [vmem:[%s8902_s16 + $0x2] ss:$0 sm:$0xff] }
 0x16e   : > { %7841 = vmatprep.subr.mxu0 %v7030_v12 }
 0x16f   : > { %7842 = vmatpush3.msra.mxu0 %v7030_v12 }
 0x170   : > { %7843 = vmatprep.subr.mxu0 %v7029_v13 }
 0x171   : > { %7844 = vmatpush3.msra.mxu0 %v7029_v13  ;;  %v7051_v13 = vld [vmem:[%s9871_s21 + $0x2] ss:$0 sm:$0xff] }
 0x205   : > { %v7757_v60 = vpop.f32.mrf.mxu1 }
 0x206   : > { %v7738_v61 = vpop.f32.mrf.mxu0  ;;  %v1342_v4 = vadd.f32 %v7757_v60, %v6991_v62 }
 0x207   : > { %v1336_v63 = vpop.f32.mrf.mxu1  ;;  %v1252_v5 = vadd.f32 %v7738_v61, %v6988_v0 }
 0x208   : > { %v1337_v1 = vadd.f32 %v6991_v62, %v1336_v63  ;;  %v1246_v2 = vpop.f32.mrf.mxu0 }
 0x209   : > { %v1247_v3 = vadd.f32 %v6988_v0, %v1246_v2 }
 0x20a   : > { %7778 = vmatpush3.xpose.msk.msra.mxu1 %vm1428_vm4, %v1337_v1  ;;  %v7023_v1 = vld [vmem:[%s8902_s16 + $0x1] ss:$0 sm:$0xff] }
 0x20b   : > { %7782 = vmatprep.subr.mxu1 %v8617_v59 }
 0x20d   : > { %7780 = vmatmul.mubr.msk.f32.vlgmr.msra.gmra.mxu1 %vm1428_vm4, %v1247_v3  ;;  %v7011_v3 = vld [vmem:[%s9871_s21 + $0x1] ss:$0 sm:$0xff] }
 0x20e   : > { %7783 = vmatpush3.xpose.msk.msra.mxu1 %vm1428_vm4, %v1342_v4  ;;  %7784 = vmatprep.mubr.msk.f32.mxu1 %vm8618_vm3, %v8617_v59 }
 0x20f   : > { %7787 = vmatprep.subr.mxu1 %v8617_v59 }
 0x211   : > { %7785 = vmatmul.mubr.msk.f32.vlgmr.msra.gmra.mxu1 %vm1428_vm4, %v1252_v5 }
 0x212   : > { %7789 = vmatprep.mubr.msk.f32.mxu1 %vm8618_vm3, %v8617_v59 }
 0x218   : > { %v7776_v32 = vpop.f32.mrf.mxu0 }
 0x21a   : > { %v1419_v33 = vpop.f32.mrf.mxu0 }
 0x21b   : > { %7788 = vmatpush3.msra.mxu1 %v1419_v33 }
 0x21c   : > { %7792 = vmatprep.subr.mxu1 %v8617_v59 }
 0x228   : > { %v7815_v63 = vpop.f32.mrf.mxu0 }
 0x229   : > { %v1842_v8 = vadd.f32 %v7815_v63, %v7011_v3  ;;  %v7054_v63 = vld [vmem:[%s8897_s0 + $0x80] sm:$0xff] }
 0x22a   : > { %v1836_v5 = vpop.f32.mrf.mxu0 }
 0x22b   : > { %v1837_v6 = vadd.f32 %v7011_v3, %v1836_v5 }
 0x2cd   : > { %v1501_v14 = vpop.f32.mrf.mxu1 }
 0x2ce   : > { %v1581_v15 = vmul.f32 0.35355338, %v1501_v14  ;;  %v7028_v14 = vld [vmem:[%s8907_s28 + $0x50] sm:$0xff] }
 0x2cf   : > { %v7781_v16 = vpop.f32.mrf.mxu1  ;;  %7845 = vmatprep.subr.mxu0 %v7028_v14 }
 0x2d0   : > { %v1583_v17 = vsel %vm1428_vm4, %v1581_v15, -inf  ;;  %7846 = vmatpush3.msra.mxu0 %v7028_v14  ;;  %v7026_v16 = vld [vmem:[%s8907_s28 + $0x40] sm:$0xff] }
 0x2d1   : > { %1584 = vmax.xlane.f32.xlu0 %v1583_v17  ;;  %v1577_v18 = vpop.f32.mrf.mxu1 }
 0x2d2   : > { %v1582_v19 = vmul.f32 0.35355338, %v1577_v18 }
 0x2d3   : > { %v7786_v20 = vpop.f32.mrf.mxu1 }
 0x2d4   : > { %v1586_v21 = vsel %vm1428_vm4, %v1582_v19, -inf }
 0x2d5   : > { %1587 = vmax.xlane.f32.xlu0 %v1586_v21 }
 0x35a   : > { %v1585_v22 = vpop.xlane.xlu0 %1584 }
 0x35b   : > { %v1589_v23 = vsub.f32 %v1581_v15, %v1585_v22  ;;  %v7027_v15 = vld [vmem:[%s8907_s28 + $0x48] sm:$0xff] }
 0x35c   : > { %7847 = vmatprep.subr.mxu0 %v7027_v15 }
 0x35d   : > { %v1591_v24 = vmul.f32 1.442695, %v1589_v23  ;;  %7848 = vmatpush3.msra.mxu0 %v7027_v15 }
 0x35e   : > { %v1588_v25 = vpop.xlane.xlu0 %1587  ;;  %7849 = vmatprep.subr.mxu0 %v7026_v16 }
 0x35f   : > { %8457 = vpow2.f32 %v1591_v24  ;;  %v1590_v26 = vsub.f32 %v1582_v19, %v1588_v25  ;;  %7850 = vmatpush3.msra.mxu0 %v7026_v16 }
 0x360   : > { %7852 = vmatmul.mubr.msk.f32.vlgmr.msra.gmra.mxu0 %vm1173_vm2, %v8986_v58  ;;  %7874 = vmatprep.subr.mxu0 %v7049_v37 }
 0x361   : > { %v1593_v27 = vmul.f32 1.442695, %v1590_v26  ;;  %7890 = vmatprep.mubr.msk.f32.mxu0 %vm1173_vm2, %v8984_v57  ;;  %7875 = vmatpush3.msra.mxu0 %v7049_v37 }
 0x362   : > { %7876 = vmatprep.subr.mxu0 %v7048_v38 }
 0x363   : > { %8459 = vpow2.f32 %v1593_v27  ;;  %7877 = vmatpush3.msra.mxu0 %v7048_v38 }
 0x364   : > { %7878 = vmatprep.subr.mxu0 %v7047_v39 }
 0x365   : > { %7879 = vmatpush3.msra.mxu0 %v7047_v39 }
 0x366   : > { %7880 = vmatprep.subr.mxu0 %v7046_v40 }
 0x367   : > { %7881 = vmatpush3.msra.mxu0 %v7046_v40 }
 0x368   : > { %7882 = vmatprep.subr.mxu0 %v7045_v41 }
 0x369   : > { %7883 = vmatpush3.msra.mxu0 %v7045_v41 }
 0x36c   : > { %v8458_v28 = vpop.eup %8457 }
 0x36d   : > { %v1595_v29 = vsel %vm1428_vm4, %v8458_v28, 0.0 }
 0x36e   : > { %1596 = vadd.xlane.f32.xlu1 %v1595_v29 }
 0x370   : > { %v8460_v30 = vpop.eup %8459 }
 0x371   : > { %v1598_v31 = vsel %vm1428_vm4, %v8460_v30, 0.0 }
 0x372   : > { %1599 = vadd.xlane.f32.xlu1 %v1598_v31 }
 0x3f7   : > { %v1597_v42 = vpop.xlane.xlu1 %1596 }
 0x3f8   : > { %8461 = vrcp.f32 %v1597_v42  ;;  %v7044_v42 = vld [vmem:[%s9870_s8 + $0x90] sm:$0xff] }
 0x3f9   : > { %7884 = vmatprep.subr.mxu0 %v7044_v42 }
 0x3fa   : > { %7885 = vmatpush3.msra.mxu0 %v7044_v42 }
 0x3fb   : > { %v1600_v43 = vpop.xlane.xlu1 %1599 }
 0x3fc   : > { %8463 = vrcp.f32 %v1600_v43  ;;  %v7043_v43 = vld [vmem:[%s9870_s8 + $0x88] sm:$0xff] }
 0x3fd   : > { %7886 = vmatprep.subr.mxu0 %v7043_v43 }
 0x3fe   : > { %7887 = vmatpush3.msra.mxu0 %v7043_v43 }
 0x405   : > { %v8462_v44 = vpop.eup %8461 }
 0x406   : > { %v1603_v45 = vmul.f32 %v8462_v44, %v8458_v28  ;;  %v7042_v44 = vld [vmem:[%s9870_s8 + $0x80] sm:$0xff] }
 0x407   : > { %7888 = vmatprep.subr.mxu0 %v7042_v44 }
 0x408   : > { %7790 = vmatmul.mubr.msk.f32.vlgmr.msra.gmra.mxu1 %vm1428_vm4, %v1603_v45  ;;  %7889 = vmatpush3.msra.mxu0 %v7042_v44 }
 0x409   : > { %v8464_v47 = vpop.eup %8463  ;;  %7793 = vmatpush3.msra.mxu1 %v7776_v32  ;;  %7794 = vmatprep.mubr.msk.f32.mxu1 %vm8618_vm3, %v8617_v59 }
 0x40a   : > { %7816 = vmatprep.subr.mxu1 %v7021_v46  ;;  %v1604_v48 = vmul.f32 %v8464_v47, %v8460_v30  ;;  %7891 = vmatmul.mubr.msk.f32.vlgmr.msra.gmra.mxu0 %vm1173_vm2, %v8986_v58 }
 0x40b   : > { %7928 = vmatprep.mubr.msk.f32.mxu0 %vm1173_vm2, %v8984_v57 }
 0x40c   : > { %7795 = vmatmul.mubr.msk.f32.vlgmr.msra.gmra.mxu1 %vm1428_vm4, %v1604_v48 }
 0x40d   : > { %7817 = vmatpush3.msra.mxu1 %v7021_v46  ;;  %7832 = vmatprep.mubr.msk.f32.mxu1 %vm1173_vm2, %v8984_v57 }
 0x40e   : > { %7818 = vmatprep.subr.mxu1 %v7020_v49 }
 0x40f   : > { %7819 = vmatpush3.msra.mxu1 %v7020_v49  ;;  %v7061_v49 = vld [vmem:[%s8897_s0 + $0xb8] sm:$0xff] }
 0x410   : > { %7820 = vmatprep.subr.mxu1 %v7019_v50 }
 0x411   : > { %7821 = vmatpush3.msra.mxu1 %v7019_v50 }
 0x412   : > { %7822 = vmatprep.subr.mxu1 %v7018_v51 }
 0x413   : > { %7823 = vmatpush3.msra.mxu1 %v7018_v51 }
 0x414   : > { %7824 = vmatprep.subr.mxu1 %v7017_v52 }
 0x415   : > { %7825 = vmatpush3.msra.mxu1 %v7017_v52  ;;  %v7060_v52 = vld [vmem:[%s8897_s0 + $0xb0] sm:$0xff] }
 0x416   : > { %7826 = vmatprep.subr.mxu1 %v7016_v53 }
 0x417   : > { %7827 = vmatpush3.msra.mxu1 %v7016_v53  ;;  %v7059_v53 = vld [vmem:[%s8897_s0 + $0xa8] sm:$0xff] }
 0x418   : > { %7828 = vmatprep.subr.mxu1 %v7015_v54 }
 0x419   : > { %7829 = vmatpush3.msra.mxu1 %v7015_v54  ;;  %v7058_v54 = vld [vmem:[%s8897_s0 + $0xa0] sm:$0xff] }
 0x41a   : > { %7830 = vmatprep.subr.mxu1 %v7014_v55 }
 0x41b   : > { %7831 = vmatpush3.msra.mxu1 %v7014_v55  ;;  %v7057_v55 = vld [vmem:[%s8897_s0 + $0x98] sm:$0xff] }
 0x41c   : > { %7833 = vmatmul.mubr.msk.f32.vlgmr.msra.gmra.mxu1 %vm1173_vm2, %v8986_v58  ;;  %7854 = vmatprep.subr.mxu1 %v8617_v59 }
 0x41d   : > { %7856 = vmatprep.mubr.msk.f32.mxu1 %vm8618_vm3, %v8617_v59 }
 0x420   : > { %v7853_v35 = vpop.f32.mrf.mxu0 }
 0x422   : > { %v2012_v36 = vpop.f32.mrf.mxu0 }
 0x4c8   : > { %v9061_v56 = vpop.f32.mrf.mxu1 }
 0x4ca   : > { %v7791_v60 = vpop.f32.mrf.mxu1  ;;  %v7892_v9 = vpop.f32.mrf.mxu0 }
 0x4cb   : > { %v7056_v60 = vld [vmem:[%s8897_s0 + $0x90] sm:$0xff]  ;;  %v2434_v16 = vadd.f32 %v7892_v9, %v7051_v13  ;;  %v7094_v9 = vld [vmem:[%s8897_s0 + $0xc0] sm:$0xff] }
 0x4cc   : > { %v9063_v61 = vpop.f32.mrf.mxu1  ;;  %v2428_v15 = vpop.f32.mrf.mxu0 }
 0x4ce   : > { %v7796_v62 = vpop.f32.mrf.mxu1 }
 0x4cf   : > { %v7055_v62 = vld [vmem:[%s8897_s0 + $0x88] sm:$0xff] }
 0x4dc   : > { %v7834_v0 = vpop.f32.mrf.mxu1 }
 0x4dd   : > { %v1934_v7 = vadd.f32 %v7834_v0, %v7023_v1  ;;  %v6987_v0 = vld [vmem:[%s9872_s30] ss:$0 sm:$0xff] }
 0x4de   : > { %v1928_v2 = vpop.f32.mrf.mxu1  ;;  %v1752_v5 = vadd.f32 %v6987_v0, %v9063_v61 }
 0x4df   : > { %v1929_v4 = vadd.f32 %v7023_v1, %v1928_v2  ;;  %v1751_v1 = vadd.f32 %v6987_v0, %v9061_v56  ;;  %v2429_v56 = vadd.f32 %v7051_v13, %v2428_v15 }
 0x4e1   : > { %7855 = vmatpush3.xpose.msk.msra.mxu1 %vm1428_vm4, %v1929_v4 }
 0x4e2   : > { %7859 = vmatprep.subr.mxu1 %v8617_v59 }
 0x4e4   : > { %7857 = vmatmul.mubr.msk.f32.vlgmr.msra.gmra.mxu1 %vm1428_vm4, %v1837_v6 }
 0x4e5   : > { %7860 = vmatpush3.xpose.msk.msra.mxu1 %vm1428_vm4, %v1934_v7  ;;  %7861 = vmatprep.mubr.msk.f32.mxu1 %vm8618_vm3, %v8617_v59 }
 0x4e6   : > { %7864 = vmatprep.subr.mxu1 %v8617_v59 }
 0x4e8   : > { %7862 = vmatmul.mubr.msk.f32.vlgmr.msra.gmra.mxu1 %vm1428_vm4, %v1842_v8 }
 0x4e9   : > { %7866 = vmatprep.mubr.msk.f32.mxu1 %vm8618_vm3, %v8617_v59  ;;  %7865 = vmatpush3.msra.mxu1 %v2012_v36 }
 0x4ea   : > { %7869 = vmatprep.subr.mxu1 %v8617_v59 }
 0x5a4   : > { %v2093_v17 = vpop.f32.mrf.mxu1 }
 0x5a5   : > { %v2173_v18 = vmul.f32 0.35355338, %v2093_v17  ;;  %v7073_v17 = vld [vmem:[%s8907_s28 + $0xb8] sm:$0xff] }
 0x5a6   : > { %v7858_v19 = vpop.f32.mrf.mxu1  ;;  %7912 = vmatprep.subr.mxu0 %v7073_v17 }
 0x5a7   : > { %v2175_v20 = vsel %vm1428_vm4, %v2173_v18, -inf  ;;  %7913 = vmatpush3.msra.mxu0 %v7073_v17  ;;  %v7071_v19 = vld [vmem:[%s8907_s28 + $0xa8] sm:$0xff] }
 0x5a8   : > { %2176 = vmax.xlane.f32.xlu0 %v2175_v20  ;;  %v2169_v21 = vpop.f32.mrf.mxu1  ;;  %v7070_v20 = vld [vmem:[%s8907_s28 + $0xa0] sm:$0xff] }
 0x5a9   : > { %v2174_v22 = vmul.f32 0.35355338, %v2169_v21  ;;  %v7069_v21 = vld [vmem:[%s8907_s28 + $0x98] sm:$0xff] }
 0x5aa   : > { %v7863_v23 = vpop.f32.mrf.mxu1 }
 0x5ab   : > { %v2178_v24 = vsel %vm1428_vm4, %v2174_v22, -inf  ;;  %v7067_v23 = vld [vmem:[%s8907_s28 + $0x88] sm:$0xff] }
 0x5ac   : > { %2179 = vmax.xlane.f32.xlu1 %v2178_v24  ;;  %v7066_v24 = vld [vmem:[%s8907_s28 + $0x80] sm:$0xff] }
 0x631   : > { %v2177_v25 = vpop.xlane.xlu0 %2176 }
 0x632   : > { %v2181_v26 = vsub.f32 %v2173_v18, %v2177_v25  ;;  %v7072_v18 = vld [vmem:[%s8907_s28 + $0xb0] sm:$0xff] }
 0x633   : > { %7914 = vmatprep.subr.mxu0 %v7072_v18 }
 0x634   : > { %v2183_v27 = vmul.f32 1.442695, %v2181_v26  ;;  %7915 = vmatpush3.msra.mxu0 %v7072_v18  ;;  %v7091_v18 = vld [vmem:[%s9871_s21 + $0x3] ss:$0 sm:$0xff] }
 0x635   : > { %v2180_v28 = vpop.xlane.xlu1 %2179  ;;  %7916 = vmatprep.subr.mxu0 %v7071_v19 }
 0x636   : > { %8465 = vpow2.f32 %v2183_v27  ;;  %v2182_v29 = vsub.f32 %v2174_v22, %v2180_v28  ;;  %7917 = vmatpush3.msra.mxu0 %v7071_v19  ;;  %v7068_v22 = vld [vmem:[%s8907_s28 + $0x90] sm:$0xff] }
 0x637   : > { %7918 = vmatprep.subr.mxu0 %v7070_v20 }
 0x638   : > { %v2185_v30 = vmul.f32 1.442695, %v2182_v29  ;;  %7919 = vmatpush3.msra.mxu0 %v7070_v20 }
 0x639   : > { %7920 = vmatprep.subr.mxu0 %v7069_v21 }
 0x63a   : > { %8467 = vpow2.f32 %v2185_v30  ;;  %7921 = vmatpush3.msra.mxu0 %v7069_v21 }
 0x63b   : > { %7922 = vmatprep.subr.mxu0 %v7068_v22 }
 0x63c   : > { %7923 = vmatpush3.msra.mxu0 %v7068_v22  ;;  %v7113_v22 = vld [vmem:[%s8907_s28 + $0xf8] sm:$0xff] }
 0x63d   : > { %7924 = vmatprep.subr.mxu0 %v7067_v23 }
 0x63e   : > { %7925 = vmatpush3.msra.mxu0 %v7067_v23  ;;  %v7112_v23 = vld [vmem:[%s8907_s28 + $0xf0] sm:$0xff] }
 0x63f   : > { %7926 = vmatprep.subr.mxu0 %v7066_v24 }
 0x640   : > { %7927 = vmatpush3.msra.mxu0 %v7066_v24  ;;  %v7111_v24 = vld [vmem:[%s8907_s28 + $0xe8] sm:$0xff] }
 0x641   : > { %7929 = vmatmul.mubr.msk.f32.vlgmr.msra.gmra.mxu0 %vm1173_vm2, %v8986_v58 }
 0x642   : > { %7967 = vmatprep.mubr.msk.f32.mxu0 %vm1173_vm2, %v8984_v57 }
 0x643   : > { %v8466_v31 = vpop.eup %8465 }
 0x644   : > { %v2187_v32 = vsel %vm1428_vm4, %v8466_v31, 0.0 }
 0x645   : > { %2188 = vadd.xlane.f32.xlu0 %v2187_v32 }
 0x647   : > { %v8468_v33 = vpop.eup %8467 }
 0x648   : > { %v2190_v34 = vsel %vm1428_vm4, %v8468_v33, 0.0 }
 0x649   : > { %2191 = vadd.xlane.f32.xlu1 %v2190_v34 }
 0x6ce   : > { %v2189_v45 = vpop.xlane.xlu0 %2188 }
 0x6cf   : > { %8469 = vrcp.f32 %v2189_v45  ;;  %v7089_v45 = vld [vmem:[%s9870_s8 + $0xf8] sm:$0xff] }
 0x6d0   : > { %7951 = vmatprep.subr.mxu0 %v7089_v45 }
 0x6d1   : > { %7952 = vmatpush3.msra.mxu0 %v7089_v45 }
 0x6d2   : > { %v2192_v46 = vpop.xlane.xlu1 %2191 }
 0x6d3   : > { %8471 = vrcp.f32 %v2192_v46  ;;  %v7088_v46 = vld [vmem:[%s9870_s8 + $0xf0] sm:$0xff] }
 0x6d4   : > { %7953 = vmatprep.subr.mxu0 %v7088_v46 }
 0x6d5   : > { %7954 = vmatpush3.msra.mxu0 %v7088_v46 }
 0x6dc   : > { %v8470_v47 = vpop.eup %8469 }
 0x6dd   : > { %v2195_v48 = vmul.f32 %v8470_v47, %v8466_v31  ;;  %v7087_v47 = vld [vmem:[%s9870_s8 + $0xe8] sm:$0xff] }
 0x6de   : > { %7955 = vmatprep.subr.mxu0 %v7087_v47 }
 0x6df   : > { %7867 = vmatmul.mubr.msk.f32.vlgmr.msra.gmra.mxu1 %vm1428_vm4, %v2195_v48  ;;  %7956 = vmatpush3.msra.mxu0 %v7087_v47  ;;  %v7086_v48 = vld [vmem:[%s9870_s8 + $0xe0] sm:$0xff] }
 0x6e0   : > { %v8472_v50 = vpop.eup %8471  ;;  %7870 = vmatpush3.msra.mxu1 %v7853_v35  ;;  %7871 = vmatprep.mubr.msk.f32.mxu1 %vm8618_vm3, %v8617_v59 }
 0x6e1   : > { %7893 = vmatprep.subr.mxu1 %v7061_v49  ;;  %v2196_v51 = vmul.f32 %v8472_v50, %v8468_v33  ;;  %7957 = vmatprep.subr.mxu0 %v7086_v48  ;;  %v7084_v50 = vld [vmem:[%s9870_s8 + $0xd0] sm:$0xff] }
 0x6e2   : > { %7958 = vmatpush3.msra.mxu0 %v7086_v48  ;;  %v7129_v48 = vld [vmem:[%s9870_s8 + $0x138] sm:$0xff] }
 0x6e3   : > { %7872 = vmatmul.mubr.msk.f32.vlgmr.msra.gmra.mxu1 %vm1428_vm4, %v2196_v51  ;;  %v7083_v51 = vld [vmem:[%s9870_s8 + $0xc8] sm:$0xff] }
 0x6e4   : > { %7894 = vmatpush3.msra.mxu1 %v7061_v49  ;;  %7909 = vmatprep.mubr.msk.f32.mxu1 %vm1173_vm2, %v8984_v57  ;;  %v7085_v49 = vld [vmem:[%s9870_s8 + $0xd8] sm:$0xff] }
 0x6e5   : > { %7895 = vmatprep.subr.mxu1 %v7060_v52  ;;  %7959 = vmatprep.subr.mxu0 %v7085_v49 }
 0x6e6   : > { %7896 = vmatpush3.msra.mxu1 %v7060_v52  ;;  %7960 = vmatpush3.msra.mxu0 %v7085_v49  ;;  %v7082_v52 = vld [vmem:[%s9870_s8 + $0xc0] sm:$0xff]  ;;  %v7128_v49 = vld [vmem:[%s9870_s8 + $0x130] sm:$0xff] }
 0x6e7   : > { %7897 = vmatprep.subr.mxu1 %v7059_v53  ;;  %7961 = vmatprep.subr.mxu0 %v7084_v50 }
 0x6e8   : > { %7898 = vmatpush3.msra.mxu1 %v7059_v53  ;;  %7962 = vmatpush3.msra.mxu0 %v7084_v50  ;;  %v7127_v50 = vld [vmem:[%s9870_s8 + $0x128] sm:$0xff] }
 0x6e9   : > { %7899 = vmatprep.subr.mxu1 %v7058_v54  ;;  %7963 = vmatprep.subr.mxu0 %v7083_v51 }
 0x6ea   : > { %7900 = vmatpush3.msra.mxu1 %v7058_v54  ;;  %7964 = vmatpush3.msra.mxu0 %v7083_v51  ;;  %v7126_v51 = vld [vmem:[%s9870_s8 + $0x120] sm:$0xff] }
 0x6eb   : > { %7901 = vmatprep.subr.mxu1 %v7057_v55  ;;  %7965 = vmatprep.subr.mxu0 %v7082_v52 }
 0x6ec   : > { %7902 = vmatpush3.msra.mxu1 %v7057_v55  ;;  %7966 = vmatpush3.msra.mxu0 %v7082_v52  ;;  %v7125_v52 = vld [vmem:[%s9870_s8 + $0x118] sm:$0xff] }
 0x6ed   : > { %7903 = vmatprep.subr.mxu1 %v7056_v60  ;;  %7968 = vmatmul.mubr.msk.f32.vlgmr.msra.gmra.mxu0 %vm1173_vm2, %v8986_v58 }
 0x6ee   : > { %7904 = vmatpush3.msra.mxu1 %v7056_v60  ;;  %8005 = vmatprep.mubr.msk.f32.mxu0 %vm1173_vm2, %v8984_v57 }
 0x6ef   : > { %7905 = vmatprep.subr.mxu1 %v7055_v62  ;;  %7989 = vmatprep.subr.mxu0 %v7113_v22 }
 0x6f0   : > { %7906 = vmatpush3.msra.mxu1 %v7055_v62  ;;  %v7101_v62 = vld [vmem:[%s8897_s0 + $0xf8] sm:$0xff]  ;;  %7990 = vmatpush3.msra.mxu0 %v7113_v22 }
 0x6f1   : > { %7907 = vmatprep.subr.mxu1 %v7054_v63  ;;  %7991 = vmatprep.subr.mxu0 %v7112_v23 }
 0x6f2   : > { %7908 = vmatpush3.msra.mxu1 %v7054_v63  ;;  %7992 = vmatpush3.msra.mxu0 %v7112_v23  ;;  %v7131_v23 = vld [vmem:[%s9871_s21 + $0x4] ss:$0 sm:$0xff] }
 0x6f3   : > { %7910 = vmatmul.mubr.msk.f32.vlgmr.msra.gmra.mxu1 %vm1173_vm2, %v8986_v58  ;;  %7931 = vmatprep.subr.mxu1 %v8617_v59 }
 0x6f4   : > { %7933 = vmatprep.mubr.msk.f32.mxu1 %vm8618_vm3, %v8617_v59  ;;  %7993 = vmatprep.subr.mxu0 %v7111_v24 }
 0x6f5   : > { %7994 = vmatpush3.msra.mxu0 %v7111_v24 }
 0x701   : > { %v7930_v43 = vpop.f32.mrf.mxu0 }
 0x703   : > { %v2604_v44 = vpop.f32.mrf.mxu0 }
 0x79f   : > { %v2266_v2 = vpop.f32.mrf.mxu1 }
 0x7a0   : > { %v9131_v3 = vadd.f32 %v2266_v2, %v1751_v1  ;;  %v7100_v1 = vld [vmem:[%s8897_s0 + $0xf0] sm:$0xff]  ;;  %v7099_v2 = vld [vmem:[%s8897_s0 + $0xe8] sm:$0xff] }
 0x7a1   : > { %v7868_v4 = vpop.f32.mrf.mxu1 }
 0x7a2   : > { %v7098_v4 = vld [vmem:[%s8897_s0 + $0xe0] sm:$0xff] }
 0x7a3   : > { %v2339_v6 = vpop.f32.mrf.mxu1 }
 0x7a4   : > { %v9134_v7 = vadd.f32 %v2339_v6, %v1752_v5  ;;  %v7097_v5 = vld [vmem:[%s8897_s0 + $0xd8] sm:$0xff]  ;;  %v7096_v6 = vld [vmem:[%s8897_s0 + $0xd0] sm:$0xff] }
 0x7a5   : > { %v7873_v8 = vpop.f32.mrf.mxu1 }
 0x7a6   : > { %v7095_v8 = vld [vmem:[%s8897_s0 + $0xc8] sm:$0xff] }
 0x7b3   : > { %v7911_v10 = vpop.f32.mrf.mxu1 }
 0x7b4   : > { %v2526_v61 = vadd.f32 %v7911_v10, %v7063_v11 }
 0x7b5   : > { %v2520_v12 = vpop.f32.mrf.mxu1 }
 0x7b6   : > { %v2521_v14 = vadd.f32 %v7063_v11, %v2520_v12 }
 0x7b8   : > { %7932 = vmatpush3.xpose.msk.msra.mxu1 %vm1428_vm4, %v2521_v14 }
 0x7b9   : > { %7936 = vmatprep.subr.mxu1 %v8617_v59 }
 0x7bb   : > { %7934 = vmatmul.mubr.msk.f32.vlgmr.msra.gmra.mxu1 %vm1428_vm4, %v2429_v56  ;;  %v7969_v56 = vpop.f32.mrf.mxu0 }
 0x7bc   : > { %7937 = vmatpush3.xpose.msk.msra.mxu1 %vm1428_vm4, %v2526_v61  ;;  %7938 = vmatprep.mubr.msk.f32.mxu1 %vm8618_vm3, %v8617_v59 }
 0x7bd   : > { %7941 = vmatprep.subr.mxu1 %v8617_v59  ;;  %v3020_v20 = vpop.f32.mrf.mxu0 }
 0x7bf   : > { %7939 = vmatmul.mubr.msk.f32.vlgmr.msra.gmra.mxu1 %vm1428_vm4, %v2434_v16  ;;  %v7103_v16 = vld [vmem:[%s8902_s16 + $0x3] ss:$0 sm:$0xff] }
 0x7c0   : > { %7943 = vmatprep.mubr.msk.f32.mxu1 %vm8618_vm3, %v8617_v59  ;;  %7942 = vmatpush3.msra.mxu1 %v2604_v44 }
 0x7c1   : > { %7946 = vmatprep.subr.mxu1 %v8617_v59 }
 0x87b   : > { %v2685_v25 = vpop.f32.mrf.mxu1 }
 0x87c   : > { %v2765_v26 = vmul.f32 0.35355338, %v2685_v25  ;;  %v7110_v25 = vld [vmem:[%s8907_s28 + $0xe0] sm:$0xff] }
 0x87d   : > { %v7935_v27 = vpop.f32.mrf.mxu1  ;;  %7995 = vmatprep.subr.mxu0 %v7110_v25 }
 0x87e   : > { %v2767_v28 = vsel %vm1428_vm4, %v2765_v26, -inf  ;;  %7996 = vmatpush3.msra.mxu0 %v7110_v25  ;;  %v7108_v27 = vld [vmem:[%s8907_s28 + $0xd0] sm:$0xff] }
 0x87f   : > { %2768 = vmax.xlane.f32.xlu0 %v2767_v28  ;;  %v2761_v29 = vpop.f32.mrf.mxu1  ;;  %v7107_v28 = vld [vmem:[%s8907_s28 + $0xc8] sm:$0xff] }
 0x880   : > { %v2766_v30 = vmul.f32 0.35355338, %v2761_v29  ;;  %v7106_v29 = vld [vmem:[%s8907_s28 + $0xc0] sm:$0xff] }
 0x881   : > { %v7940_v31 = vpop.f32.mrf.mxu1 }
 0x882   : > { %v2770_v32 = vsel %vm1428_vm4, %v2766_v30, -inf }
 0x883   : > { %2771 = vmax.xlane.f32.xlu1 %v2770_v32 }
 0x908   : > { %v2769_v33 = vpop.xlane.xlu0 %2768 }
 0x909   : > { %v2773_v34 = vsub.f32 %v2765_v26, %v2769_v33  ;;  %v7109_v26 = vld [vmem:[%s8907_s28 + $0xd8] sm:$0xff] }
 0x90a   : > { %7997 = vmatprep.subr.mxu0 %v7109_v26 }
 0x90b   : > { %v2775_v35 = vmul.f32 1.442695, %v2773_v34  ;;  %7998 = vmatpush3.msra.mxu0 %v7109_v26 }
 0x90c   : > { %v2772_v36 = vpop.xlane.xlu1 %2771  ;;  %7999 = vmatprep.subr.mxu0 %v7108_v27 }
 0x90d   : > { %8473 = vpow2.f32 %v2775_v35  ;;  %v2774_v37 = vsub.f32 %v2766_v30, %v2772_v36  ;;  %8000 = vmatpush3.msra.mxu0 %v7108_v27  ;;  %v7153_v27 = vld [vmem:[%s8907_s28 + $0x138] sm:$0xff] }
 0x90e   : > { %8001 = vmatprep.subr.mxu0 %v7107_v28 }
 0x90f   : > { %v2777_v38 = vmul.f32 1.442695, %v2774_v37  ;;  %8002 = vmatpush3.msra.mxu0 %v7107_v28  ;;  %v7152_v28 = vld [vmem:[%s8907_s28 + $0x130] sm:$0xff] }
 0x910   : > { %8003 = vmatprep.subr.mxu0 %v7106_v29 }
 0x911   : > { %8475 = vpow2.f32 %v2777_v38  ;;  %8004 = vmatpush3.msra.mxu0 %v7106_v29  ;;  %v7151_v29 = vld [vmem:[%s8907_s28 + $0x128] sm:$0xff] }
 0x912   : > { %8006 = vmatmul.mubr.msk.f32.vlgmr.msra.gmra.mxu0 %vm1173_vm2, %v8986_v58  ;;  %8028 = vmatprep.subr.mxu0 %v7129_v48 }
 0x913   : > { %8044 = vmatprep.mubr.msk.f32.mxu0 %vm1173_vm2, %v8984_v57  ;;  %8029 = vmatpush3.msra.mxu0 %v7129_v48 }
 0x914   : > { %8030 = vmatprep.subr.mxu0 %v7128_v49 }
 0x915   : > { %8031 = vmatpush3.msra.mxu0 %v7128_v49 }
 0x916   : > { %8032 = vmatprep.subr.mxu0 %v7127_v50 }
 0x917   : > { %8033 = vmatpush3.msra.mxu0 %v7127_v50 }
 0x918   : > { %8034 = vmatprep.subr.mxu0 %v7126_v51 }
 0x919   : > { %8035 = vmatpush3.msra.mxu0 %v7126_v51 }
 0x91a   : > { %v8474_v39 = vpop.eup %8473  ;;  %8036 = vmatprep.subr.mxu0 %v7125_v52 }
 0x91b   : > { %v2779_v40 = vsel %vm1428_vm4, %v8474_v39, 0.0  ;;  %8037 = vmatpush3.msra.mxu0 %v7125_v52 }
 0x91c   : > { %2780 = vadd.xlane.f32.xlu0 %v2779_v40 }
 0x91e   : > { %v8476_v41 = vpop.eup %8475 }
 0x91f   : > { %v2782_v42 = vsel %vm1428_vm4, %v8476_v41, 0.0 }
 0x920   : > { %2783 = vadd.xlane.f32.xlu1 %v2782_v42 }
 0x9a5   : > { %v2781_v53 = vpop.xlane.xlu0 %2780 }
 0x9a6   : > { %8477 = vrcp.f32 %v2781_v53  ;;  %v7124_v53 = vld [vmem:[%s9870_s8 + $0x110] sm:$0xff] }
 0x9a7   : > { %8038 = vmatprep.subr.mxu0 %v7124_v53 }
 0x9a8   : > { %8039 = vmatpush3.msra.mxu0 %v7124_v53  ;;  %v7169_v53 = vld [vmem:[%s9870_s8 + $0x178] sm:$0xff] }
 0x9a9   : > { %v2784_v54 = vpop.xlane.xlu1 %2783 }
 0x9aa   : > { %8479 = vrcp.f32 %v2784_v54  ;;  %v7123_v54 = vld [vmem:[%s9870_s8 + $0x108] sm:$0xff] }
 0x9ab   : > { %8040 = vmatprep.subr.mxu0 %v7123_v54 }
 0x9ac   : > { %8041 = vmatpush3.msra.mxu0 %v7123_v54  ;;  %v7168_v54 = vld [vmem:[%s9870_s8 + $0x170] sm:$0xff] }
 0x9b3   : > { %v8478_v55 = vpop.eup %8477 }
 0x9b4   : > { %v2787_v60 = vmul.f32 %v8478_v55, %v8474_v39  ;;  %v7122_v55 = vld [vmem:[%s9870_s8 + $0x100] sm:$0xff] }
 0x9b5   : > { %8042 = vmatprep.subr.mxu0 %v7122_v55 }
 0x9b6   : > { %7944 = vmatmul.mubr.msk.f32.vlgmr.msra.gmra.mxu1 %vm1428_vm4, %v2787_v60  ;;  %8043 = vmatpush3.msra.mxu0 %v7122_v55  ;;  %v9239_v60 = vld [vmem:[#allocation2 + $0x8] sm:$0xff] }
 0x9b7   : > { %v8480_v63 = vpop.eup %8479  ;;  %7947 = vmatpush3.msra.mxu1 %v7930_v43  ;;  %7948 = vmatprep.mubr.msk.f32.mxu1 %vm8618_vm3, %v8617_v59  ;;  %v7167_v55 = vld [vmem:[%s9870_s8 + $0x168] sm:$0xff] }
 0x9b8   : > { %7970 = vmatprep.subr.mxu1 %v7101_v62  ;;  %v2788_v0 = vmul.f32 %v8480_v63, %v8476_v41  ;;  %8045 = vmatmul.mubr.msk.f32.vlgmr.msra.gmra.mxu0 %vm1173_vm2, %v9239_v60 }
 0x9b9   : > { %8066 = vmatprep.subr.mxu0 %v7153_v27 }
 0x9ba   : > { %7949 = vmatmul.mubr.msk.f32.vlgmr.msra.gmra.mxu1 %vm1428_vm4, %v2788_v0  ;;  %8067 = vmatpush3.msra.mxu0 %v7153_v27 }
 0x9bb   : > { %7971 = vmatpush3.msra.mxu1 %v7101_v62  ;;  %7986 = vmatprep.mubr.msk.f32.mxu1 %vm1173_vm2, %v8984_v57  ;;  %v9243_v62 = vld [vmem:[#allocation2] sm:$0xff] }
 0x9bc   : > { %7972 = vmatprep.subr.mxu1 %v7100_v1  ;;  %8082 = vmatprep.mubr.msk.f32.mxu0 %vm1173_vm2, %v9243_v62 }
 0x9bd   : > { %7973 = vmatpush3.msra.mxu1 %v7100_v1  ;;  %8068 = vmatprep.subr.mxu0 %v7152_v28 }
 0x9be   : > { %7974 = vmatprep.subr.mxu1 %v7099_v2  ;;  %8069 = vmatpush3.msra.mxu0 %v7152_v28  ;;  %v7171_v28 = vld [vmem:[%s9871_s21 + $0x5] ss:$0 sm:$0xff] }
 0x9bf   : > { %7975 = vmatpush3.msra.mxu1 %v7099_v2  ;;  %8070 = vmatprep.subr.mxu0 %v7151_v29 }
 0x9c0   : > { %7976 = vmatprep.subr.mxu1 %v7098_v4  ;;  %8071 = vmatpush3.msra.mxu0 %v7151_v29 }
 0x9c1   : > { %7977 = vmatpush3.msra.mxu1 %v7098_v4  ;;  %v7141_v4 = vld [vmem:[%s8897_s0 + $0x138] sm:$0xff] }
 0x9c2   : > { %7978 = vmatprep.subr.mxu1 %v7097_v5 }
 0x9c3   : > { %7979 = vmatpush3.msra.mxu1 %v7097_v5 }
 0x9c4   : > { %7980 = vmatprep.subr.mxu1 %v7096_v6 }
 0x9c5   : > { %7981 = vmatpush3.msra.mxu1 %v7096_v6 }
 0x9c6   : > { %7982 = vmatprep.subr.mxu1 %v7095_v8 }
 0x9c7   : > { %7983 = vmatpush3.msra.mxu1 %v7095_v8  ;;  %v7140_v8 = vld [vmem:[%s8897_s0 + $0x130] sm:$0xff] }
 0x9c8   : > { %7984 = vmatprep.subr.mxu1 %v7094_v9 }
 0x9c9   : > { %7985 = vmatpush3.msra.mxu1 %v7094_v9  ;;  %v7139_v9 = vld [vmem:[%s8897_s0 + $0x128] sm:$0xff] }
 0x9ca   : > { %7987 = vmatmul.mubr.msk.f32.vlgmr.msra.gmra.mxu1 %vm1173_vm2, %v8986_v58  ;;  %8008 = vmatprep.subr.mxu1 %v8617_v59 }
 0x9cb   : > { %8010 = vmatprep.mubr.msk.f32.mxu1 %vm8618_vm3, %v8617_v59 }
 0x9d2   : > { %v8007_v46 = vpop.f32.mrf.mxu0 }
 0x9d4   : > { %v3196_v47 = vpop.f32.mrf.mxu0 }
 0xa76   : > { %v2858_v10 = vpop.f32.mrf.mxu1 }
 0xa77   : > { %v9197_v11 = vadd.f32 %v2858_v10, %v9131_v3  ;;  %v3021_v3 = vadd.f32 %v7091_v18, %v3020_v20  ;;  %v7138_v10 = vld [vmem:[%s8897_s0 + $0x120] sm:$0xff] }
 0xa78   : > { %v7945_v12 = vpop.f32.mrf.mxu1 }
 0xa79   : > { %v7137_v12 = vld [vmem:[%s8897_s0 + $0x118] sm:$0xff] }
 0xa7a   : > { %v2931_v13 = vpop.f32.mrf.mxu1 }
 0xa7b   : > { %v9200_v14 = vadd.f32 %v2931_v13, %v9134_v7  ;;  %v3026_v7 = vadd.f32 %v7969_v56, %v7091_v18  ;;  %v7136_v13 = vld [vmem:[%s8897_s0 + $0x110] sm:$0xff]  ;;  %v7134_v56 = vld [vmem:[%s8897_s0 + $0x100] sm:$0xff] }
 0xa7c   : > { %v7950_v15 = vpop.f32.mrf.mxu1 }
 0xa7d   : > { %v7135_v15 = vld [vmem:[%s8897_s0 + $0x108] sm:$0xff] }
 0xa8a   : > { %v7988_v61 = vpop.f32.mrf.mxu1 }
 0xa8b   : > { %v3118_v21 = vadd.f32 %v7988_v61, %v7103_v16 }
 0xa8c   : > { %v3112_v17 = vpop.f32.mrf.mxu1 }
 0xa8d   : > { %v3113_v19 = vadd.f32 %v7103_v16, %v3112_v17 }
 0xa8f   : > { %8009 = vmatpush3.xpose.msk.msra.mxu1 %vm1428_vm4, %v3113_v19 }
 0xa90   : > { %8013 = vmatprep.subr.mxu1 %v8617_v59 }
 0xa92   : > { %8011 = vmatmul.mubr.msk.f32.vlgmr.msra.gmra.mxu1 %vm1428_vm4, %v3021_v3  ;;  %v8046_v3 = vpop.f32.mrf.mxu0 }
 0xa93   : > { %8014 = vmatpush3.xpose.msk.msra.mxu1 %vm1428_vm4, %v3118_v21  ;;  %8015 = vmatprep.mubr.msk.f32.mxu1 %vm8618_vm3, %v8617_v59 }
 0xa94   : > { %8018 = vmatprep.subr.mxu1 %v8617_v59  ;;  %v3612_v25 = vpop.f32.mrf.mxu0 }
 0xa96   : > { %8016 = vmatmul.mubr.msk.f32.vlgmr.msra.gmra.mxu1 %vm1428_vm4, %v3026_v7  ;;  %v7143_v7 = vld [vmem:[%s8902_s16 + $0x4] ss:$0 sm:$0xff] }
 0xa97   : > { %8020 = vmatprep.mubr.msk.f32.mxu1 %vm8618_vm3, %v8617_v59  ;;  %8019 = vmatpush3.msra.mxu1 %v3196_v47 }
 0xa98   : > { %8023 = vmatprep.subr.mxu1 %v8617_v59 }
 0xb52   : > { %v3277_v30 = vpop.f32.mrf.mxu1 }
 0xb53   : > { %v3357_v31 = vmul.f32 0.35355338, %v3277_v30  ;;  %v7150_v30 = vld [vmem:[%s8907_s28 + $0x120] sm:$0xff] }
 0xb54   : > { %v8012_v32 = vpop.f32.mrf.mxu1  ;;  %8072 = vmatprep.subr.mxu0 %v7150_v30 }
 0xb55   : > { %v3359_v33 = vsel %vm1428_vm4, %v3357_v31, -inf  ;;  %8073 = vmatpush3.msra.mxu0 %v7150_v30  ;;  %v7148_v32 = vld [vmem:[%s8907_s28 + $0x110] sm:$0xff] }
 0xb56   : > { %3360 = vmax.xlane.f32.xlu0 %v3359_v33  ;;  %v3353_v34 = vpop.f32.mrf.mxu1  ;;  %v7147_v33 = vld [vmem:[%s8907_s28 + $0x108] sm:$0xff] }
 0xb57   : > { %v3358_v35 = vmul.f32 0.35355338, %v3353_v34  ;;  %v7146_v34 = vld [vmem:[%s8907_s28 + $0x100] sm:$0xff] }
 0xb58   : > { %v8017_v36 = vpop.f32.mrf.mxu1 }
 0xb59   : > { %v3362_v37 = vsel %vm1428_vm4, %v3358_v35, -inf }
 0xb5a   : > { %3363 = vmax.xlane.f32.xlu1 %v3362_v37 }
 0xbdf   : > { %v3361_v38 = vpop.xlane.xlu0 %3360 }
 0xbe0   : > { %v3365_v39 = vsub.f32 %v3357_v31, %v3361_v38  ;;  %v7149_v31 = vld [vmem:[%s8907_s28 + $0x118] sm:$0xff] }
 0xbe1   : > { %8074 = vmatprep.subr.mxu0 %v7149_v31 }
 0xbe2   : > { %v3367_v40 = vmul.f32 1.442695, %v3365_v39  ;;  %8075 = vmatpush3.msra.mxu0 %v7149_v31 }
 0xbe3   : > { %v3364_v58 = vpop.xlane.xlu1 %3363  ;;  %8076 = vmatprep.subr.mxu0 %v7148_v32 }
 0xbe4   : > { %8481 = vpow2.f32 %v3367_v40  ;;  %v3366_v41 = vsub.f32 %v3358_v35, %v3364_v58  ;;  %8077 = vmatpush3.msra.mxu0 %v7148_v32  ;;  %v7193_v32 = vld [vmem:[%s8907_s28 + $0x178] sm:$0xff] }
 0xbe5   : > { %8078 = vmatprep.subr.mxu0 %v7147_v33 }
 0xbe6   : > { %v3369_v57 = vmul.f32 1.442695, %v3366_v41  ;;  %8079 = vmatpush3.msra.mxu0 %v7147_v33  ;;  %v7192_v33 = vld [vmem:[%s8907_s28 + $0x170] sm:$0xff] }
 0xbe7   : > { %8080 = vmatprep.subr.mxu0 %v7146_v34 }
 0xbe8   : > { %8483 = vpow2.f32 %v3369_v57  ;;  %8081 = vmatpush3.msra.mxu0 %v7146_v34  ;;  %v7191_v34 = vld [vmem:[%s8907_s28 + $0x168] sm:$0xff] }
 0xbe9   : > { %8083 = vmatmul.mubr.msk.f32.vlgmr.msra.gmra.mxu0 %vm1173_vm2, %v9239_v60  ;;  %8105 = vmatprep.subr.mxu0 %v7169_v53 }
 0xbea   : > { %8121 = vmatprep.mubr.msk.f32.mxu0 %vm1173_vm2, %v9243_v62  ;;  %8106 = vmatpush3.msra.mxu0 %v7169_v53 }
 0xbeb   : > { %8107 = vmatprep.subr.mxu0 %v7168_v54 }
 0xbec   : > { %8108 = vmatpush3.msra.mxu0 %v7168_v54 }
 0xbed   : > { %8109 = vmatprep.subr.mxu0 %v7167_v55 }
 0xbee   : > { %8110 = vmatpush3.msra.mxu0 %v7167_v55 }
 0xbf1   : > { %v8482_v42 = vpop.eup %8481 }
 0xbf2   : > { %v3371_v43 = vsel %vm1428_vm4, %v8482_v42, 0.0 }
 0xbf3   : > { %3372 = vadd.xlane.f32.xlu0 %v3371_v43 }
 0xbf5   : > { %v8484_v44 = vpop.eup %8483 }
 0xbf6   : > { %v3374_v45 = vsel %vm1428_vm4, %v8484_v44, 0.0 }
 0xbf7   : > { %3375 = vadd.xlane.f32.xlu1 %v3374_v45 }
 0xc7c   : > { %v3373_v63 = vpop.xlane.xlu0 %3372 }
 0xc7d   : > { %8485 = vrcp.f32 %v3373_v63  ;;  %v7166_v63 = vld [vmem:[%s9870_s8 + $0x160] sm:$0xff] }
 0xc7e   : > { %8111 = vmatprep.subr.mxu0 %v7166_v63 }
 0xc7f   : > { %8112 = vmatpush3.msra.mxu0 %v7166_v63 }
 0xc80   : > { %v3376_v0 = vpop.xlane.xlu1 %3375 }
 0xc81   : > { %8487 = vrcp.f32 %v3376_v0  ;;  %v7165_v0 = vld [vmem:[%s9870_s8 + $0x158] sm:$0xff] }
 0xc82   : > { %8113 = vmatprep.subr.mxu0 %v7165_v0 }
 0xc83   : > { %8114 = vmatpush3.msra.mxu0 %v7165_v0 }
 0xc8a   : > { %v8486_v1 = vpop.eup %8485 }
 0xc8b   : > { %v3379_v2 = vmul.f32 %v8486_v1, %v8482_v42  ;;  %v7164_v1 = vld [vmem:[%s9870_s8 + $0x150] sm:$0xff] }
 0xc8c   : > { %8115 = vmatprep.subr.mxu0 %v7164_v1 }
 0xc8d   : > { %8021 = vmatmul.mubr.msk.f32.vlgmr.msra.gmra.mxu1 %vm1428_vm4, %v3379_v2  ;;  %8116 = vmatpush3.msra.mxu0 %v7164_v1  ;;  %v7163_v2 = vld [vmem:[%s9870_s8 + $0x148] sm:$0xff]  ;;  %v7209_v1 = vld [vmem:[%s9870_s8 + $0x1b8] sm:$0xff] }
 0xc8e   : > { %v8488_v5 = vpop.eup %8487  ;;  %8024 = vmatpush3.msra.mxu1 %v8007_v46  ;;  %8025 = vmatprep.mubr.msk.f32.mxu1 %vm8618_vm3, %v8617_v59 }
 0xc8f   : > { %8047 = vmatprep.subr.mxu1 %v7141_v4  ;;  %v3380_v6 = vmul.f32 %v8488_v5, %v8484_v44  ;;  %8117 = vmatprep.subr.mxu0 %v7163_v2 }
 0xc90   : > { %8118 = vmatpush3.msra.mxu0 %v7163_v2  ;;  %v7208_v2 = vld [vmem:[%s9870_s8 + $0x1b0] sm:$0xff] }
 0xc91   : > { %8026 = vmatmul.mubr.msk.f32.vlgmr.msra.gmra.mxu1 %vm1428_vm4, %v3380_v6 }
 0xc92   : > { %8048 = vmatpush3.msra.mxu1 %v7141_v4  ;;  %8063 = vmatprep.mubr.msk.f32.mxu1 %vm1173_vm2, %v9243_v62  ;;  %v7162_v4 = vld [vmem:[%s9870_s8 + $0x140] sm:$0xff] }
 0xc93   : > { %8049 = vmatprep.subr.mxu1 %v7140_v8  ;;  %8119 = vmatprep.subr.mxu0 %v7162_v4 }
 0xc94   : > { %8050 = vmatpush3.msra.mxu1 %v7140_v8  ;;  %8120 = vmatpush3.msra.mxu0 %v7162_v4  ;;  %v7207_v4 = vld [vmem:[%s9870_s8 + $0x1a8] sm:$0xff] }
 0xc95   : > { %8051 = vmatprep.subr.mxu1 %v7139_v9  ;;  %8122 = vmatmul.mubr.msk.f32.vlgmr.msra.gmra.mxu0 %vm1173_vm2, %v9239_v60 }
 0xc96   : > { %8052 = vmatpush3.msra.mxu1 %v7139_v9  ;;  %8159 = vmatprep.mubr.msk.f32.mxu0 %vm1173_vm2, %v9243_v62 }
 0xc97   : > { %8053 = vmatprep.subr.mxu1 %v7138_v10  ;;  %8143 = vmatprep.subr.mxu0 %v7193_v32 }
 0xc98   : > { %8054 = vmatpush3.msra.mxu1 %v7138_v10  ;;  %v7181_v10 = vld [vmem:[%s8897_s0 + $0x178] sm:$0xff]  ;;  %8144 = vmatpush3.msra.mxu0 %v7193_v32 }
 0xc99   : > { %8055 = vmatprep.subr.mxu1 %v7137_v12  ;;  %8145 = vmatprep.subr.mxu0 %v7192_v33 }
 0xc9a   : > { %8056 = vmatpush3.msra.mxu1 %v7137_v12  ;;  %8146 = vmatpush3.msra.mxu0 %v7192_v33  ;;  %v7211_v33 = vld [vmem:[%s9871_s21 + $0x6] ss:$0 sm:$0xff] }
 0xc9b   : > { %8057 = vmatprep.subr.mxu1 %v7136_v13  ;;  %8147 = vmatprep.subr.mxu0 %v7191_v34 }
 0xc9c   : > { %8058 = vmatpush3.msra.mxu1 %v7136_v13  ;;  %8148 = vmatpush3.msra.mxu0 %v7191_v34 }
 0xc9d   : > { %8059 = vmatprep.subr.mxu1 %v7135_v15 }
 0xc9e   : > { %8060 = vmatpush3.msra.mxu1 %v7135_v15  ;;  %v7180_v15 = vld [vmem:[%s8897_s0 + $0x170] sm:$0xff] }
 0xc9f   : > { %8061 = vmatprep.subr.mxu1 %v7134_v56 }
 0xca0   : > { %8062 = vmatpush3.msra.mxu1 %v7134_v56  ;;  %v7179_v56 = vld [vmem:[%s8897_s0 + $0x168] sm:$0xff] }
 0xca1   : > { %8064 = vmatmul.mubr.msk.f32.vlgmr.msra.gmra.mxu1 %vm1173_vm2, %v9239_v60  ;;  %8085 = vmatprep.subr.mxu1 %v8617_v59 }
 0xca2   : > { %8087 = vmatprep.mubr.msk.f32.mxu1 %vm8618_vm3, %v8617_v59 }
 0xca9   : > { %v8084_v51 = vpop.f32.mrf.mxu0 }
 0xcab   : > { %v3788_v52 = vpop.f32.mrf.mxu0 }
 0xd4d   : > { %v3450_v61 = vpop.f32.mrf.mxu1 }
 0xd4e   : > { %v9267_v16 = vadd.f32 %v3450_v61, %v9197_v11  ;;  %v3613_v11 = vadd.f32 %v7131_v23, %v3612_v25  ;;  %v7178_v61 = vld [vmem:[%s8897_s0 + $0x160] sm:$0xff] }
 0xd4f   : > { %v8022_v17 = vpop.f32.mrf.mxu1 }
 0xd50   : > { %v7177_v17 = vld [vmem:[%s8897_s0 + $0x158] sm:$0xff] }
 0xd51   : > { %v3523_v18 = vpop.f32.mrf.mxu1 }
 0xd52   : > { %v9270_v19 = vadd.f32 %v3523_v18, %v9200_v14  ;;  %v3618_v14 = vadd.f32 %v8046_v3, %v7131_v23  ;;  %v7176_v18 = vld [vmem:[%s8897_s0 + $0x150] sm:$0xff]  ;;  %v7174_v3 = vld [vmem:[%s8897_s0 + $0x140] sm:$0xff] }
 0xd53   : > { %v8027_v20 = vpop.f32.mrf.mxu1 }
 0xd54   : > { %v7175_v20 = vld [vmem:[%s8897_s0 + $0x148] sm:$0xff] }
 0xd61   : > { %v8065_v21 = vpop.f32.mrf.mxu1 }
 0xd62   : > { %v3710_v26 = vadd.f32 %v8065_v21, %v7143_v7 }
 0xd63   : > { %v3704_v22 = vpop.f32.mrf.mxu1 }
 0xd64   : > { %v3705_v24 = vadd.f32 %v7143_v7, %v3704_v22 }
 0xd66   : > { %8086 = vmatpush3.xpose.msk.msra.mxu1 %vm1428_vm4, %v3705_v24 }
 0xd67   : > { %8090 = vmatprep.subr.mxu1 %v8617_v59 }
 0xd69   : > { %8088 = vmatmul.mubr.msk.f32.vlgmr.msra.gmra.mxu1 %vm1428_vm4, %v3613_v11  ;;  %v8123_v11 = vpop.f32.mrf.mxu0 }
 0xd6a   : > { %8091 = vmatpush3.xpose.msk.msra.mxu1 %vm1428_vm4, %v3710_v26  ;;  %8092 = vmatprep.mubr.msk.f32.mxu1 %vm8618_vm3, %v8617_v59 }
 0xd6b   : > { %8095 = vmatprep.subr.mxu1 %v8617_v59  ;;  %v4204_v30 = vpop.f32.mrf.mxu0 }
 0xd6d   : > { %8093 = vmatmul.mubr.msk.f32.vlgmr.msra.gmra.mxu1 %vm1428_vm4, %v3618_v14  ;;  %v7183_v14 = vld [vmem:[%s8902_s16 + $0x5] ss:$0 sm:$0xff] }
 0xd6e   : > { %8097 = vmatprep.mubr.msk.f32.mxu1 %vm8618_vm3, %v8617_v59  ;;  %8096 = vmatpush3.msra.mxu1 %v3788_v52 }
 0xd6f   : > { %8100 = vmatprep.subr.mxu1 %v8617_v59 }
 0xe29   : > { %v3869_v35 = vpop.f32.mrf.mxu1 }
 0xe2a   : > { %v3949_v36 = vmul.f32 0.35355338, %v3869_v35  ;;  %v7190_v35 = vld [vmem:[%s8907_s28 + $0x160] sm:$0xff] }
 0xe2b   : > { %v8089_v37 = vpop.f32.mrf.mxu1  ;;  %8149 = vmatprep.subr.mxu0 %v7190_v35 }
 0xe2c   : > { %v3951_v38 = vsel %vm1428_vm4, %v3949_v36, -inf  ;;  %8150 = vmatpush3.msra.mxu0 %v7190_v35  ;;  %v7188_v37 = vld [vmem:[%s8907_s28 + $0x150] sm:$0xff] }
 0xe2d   : > { %3952 = vmax.xlane.f32.xlu0 %v3951_v38  ;;  %v3945_v39 = vpop.f32.mrf.mxu1  ;;  %v7187_v38 = vld [vmem:[%s8907_s28 + $0x148] sm:$0xff] }
 0xe2e   : > { %v3950_v40 = vmul.f32 0.35355338, %v3945_v39  ;;  %v7186_v39 = vld [vmem:[%s8907_s28 + $0x140] sm:$0xff] }
 0xe2f   : > { %v8094_v58 = vpop.f32.mrf.mxu1 }
 0xe30   : > { %v3954_v41 = vsel %vm1428_vm4, %v3950_v40, -inf }
 0xe31   : > { %3955 = vmax.xlane.f32.xlu1 %v3954_v41 }
 0xeb6   : > { %v3953_v57 = vpop.xlane.xlu0 %3952 }
 0xeb7   : > { %v3957_v42 = vsub.f32 %v3949_v36, %v3953_v57  ;;  %v7189_v36 = vld [vmem:[%s8907_s28 + $0x158] sm:$0xff] }
 0xeb8   : > { %8151 = vmatprep.subr.mxu0 %v7189_v36 }
 0xeb9   : > { %v3959_v43 = vmul.f32 1.442695, %v3957_v42  ;;  %8152 = vmatpush3.msra.mxu0 %v7189_v36 }
 0xeba   : > { %v3956_v44 = vpop.xlane.xlu1 %3955  ;;  %8153 = vmatprep.subr.mxu0 %v7188_v37 }
 0xebb   : > { %8489 = vpow2.f32 %v3959_v43  ;;  %v3958_v45 = vsub.f32 %v3950_v40, %v3956_v44  ;;  %8154 = vmatpush3.msra.mxu0 %v7188_v37  ;;  %v7233_v37 = vld [vmem:[%s8907_s28 + $0x1b8] sm:$0xff] }
 0xebc   : > { %8155 = vmatprep.subr.mxu0 %v7187_v38 }
 0xebd   : > { %v3961_v46 = vmul.f32 1.442695, %v3958_v45  ;;  %8156 = vmatpush3.msra.mxu0 %v7187_v38  ;;  %v7232_v38 = vld [vmem:[%s8907_s28 + $0x1b0] sm:$0xff] }
 0xebe   : > { %8157 = vmatprep.subr.mxu0 %v7186_v39 }
 0xebf   : > { %8491 = vpow2.f32 %v3961_v46  ;;  %8158 = vmatpush3.msra.mxu0 %v7186_v39  ;;  %v7231_v39 = vld [vmem:[%s8907_s28 + $0x1a8] sm:$0xff] }
 0xec0   : > { %8160 = vmatmul.mubr.msk.f32.vlgmr.msra.gmra.mxu0 %vm1173_vm2, %v9239_v60  ;;  %8182 = vmatprep.subr.mxu0 %v7209_v1 }
 0xec1   : > { %8198 = vmatprep.mubr.msk.f32.mxu0 %vm1173_vm2, %v9243_v62  ;;  %8183 = vmatpush3.msra.mxu0 %v7209_v1 }
 0xec2   : > { %8184 = vmatprep.subr.mxu0 %v7208_v2 }
 0xec3   : > { %8185 = vmatpush3.msra.mxu0 %v7208_v2 }
 0xec4   : > { %8186 = vmatprep.subr.mxu0 %v7207_v4 }
 0xec5   : > { %8187 = vmatpush3.msra.mxu0 %v7207_v4 }
 0xec8   : > { %v8490_v47 = vpop.eup %8489 }
 0xec9   : > { %v3963_v48 = vsel %vm1428_vm4, %v8490_v47, 0.0 }
 0xeca   : > { %3964 = vadd.xlane.f32.xlu0 %v3963_v48 }
 0xecc   : > { %v8492_v49 = vpop.eup %8491 }
 0xecd   : > { %v3966_v50 = vsel %vm1428_vm4, %v8492_v49, 0.0 }
 0xece   : > { %3967 = vadd.xlane.f32.xlu1 %v3966_v50 }
 0xf53   : > { %v3965_v5 = vpop.xlane.xlu0 %3964 }
 0xf54   : > { %8493 = vrcp.f32 %v3965_v5  ;;  %v7206_v5 = vld [vmem:[%s9870_s8 + $0x1a0] sm:$0xff] }
 0xf55   : > { %8188 = vmatprep.subr.mxu0 %v7206_v5 }
 0xf56   : > { %8189 = vmatpush3.msra.mxu0 %v7206_v5 }
 0xf57   : > { %v3968_v6 = vpop.xlane.xlu1 %3967 }
 0xf58   : > { %8495 = vrcp.f32 %v3968_v6  ;;  %v7205_v6 = vld [vmem:[%s9870_s8 + $0x198] sm:$0xff] }
 0xf59   : > { %8190 = vmatprep.subr.mxu0 %v7205_v6 }
 0xf5a   : > { %8191 = vmatpush3.msra.mxu0 %v7205_v6 }
 0xf61   : > { %v8494_v8 = vpop.eup %8493 }
 0xf62   : > { %v3971_v9 = vmul.f32 %v8494_v8, %v8490_v47  ;;  %v7204_v8 = vld [vmem:[%s9870_s8 + $0x190] sm:$0xff] }
 0xf63   : > { %8192 = vmatprep.subr.mxu0 %v7204_v8 }
 0xf64   : > { %8098 = vmatmul.mubr.msk.f32.vlgmr.msra.gmra.mxu1 %vm1428_vm4, %v3971_v9  ;;  %8193 = vmatpush3.msra.mxu0 %v7204_v8  ;;  %v7203_v9 = vld [vmem:[%s9870_s8 + $0x188] sm:$0xff]  ;;  %v7249_v8 = vld [vmem:[%s9870_s8 + $0x1f8] sm:$0xff] }
 0xf65   : > { %v8496_v12 = vpop.eup %8495  ;;  %8101 = vmatpush3.msra.mxu1 %v8084_v51  ;;  %8102 = vmatprep.mubr.msk.f32.mxu1 %vm8618_vm3, %v8617_v59 }
 0xf66   : > { %8124 = vmatprep.subr.mxu1 %v7181_v10  ;;  %v3972_v13 = vmul.f32 %v8496_v12, %v8492_v49  ;;  %8194 = vmatprep.subr.mxu0 %v7203_v9 }
 0xf67   : > { %8195 = vmatpush3.msra.mxu0 %v7203_v9  ;;  %v7248_v9 = vld [vmem:[%s9870_s8 + $0x1f0] sm:$0xff] }
 0xf68   : > { %8103 = vmatmul.mubr.msk.f32.vlgmr.msra.gmra.mxu1 %vm1428_vm4, %v3972_v13 }
 0xf69   : > { %8125 = vmatpush3.msra.mxu1 %v7181_v10  ;;  %8140 = vmatprep.mubr.msk.f32.mxu1 %vm1173_vm2, %v9243_v62  ;;  %v7202_v10 = vld [vmem:[%s9870_s8 + $0x180] sm:$0xff] }
 0xf6a   : > { %8126 = vmatprep.subr.mxu1 %v7180_v15  ;;  %8196 = vmatprep.subr.mxu0 %v7202_v10 }
 0xf6b   : > { %8127 = vmatpush3.msra.mxu1 %v7180_v15  ;;  %8197 = vmatpush3.msra.mxu0 %v7202_v10  ;;  %v7247_v10 = vld [vmem:[%s9870_s8 + $0x1e8] sm:$0xff] }
 0xf6c   : > { %8128 = vmatprep.subr.mxu1 %v7179_v56  ;;  %8199 = vmatmul.mubr.msk.f32.vlgmr.msra.gmra.mxu0 %vm1173_vm2, %v9239_v60 }
 0xf6d   : > { %8129 = vmatpush3.msra.mxu1 %v7179_v56  ;;  %8236 = vmatprep.mubr.msk.f32.mxu0 %vm1173_vm2, %v9243_v62 }
 0xf6e   : > { %8130 = vmatprep.subr.mxu1 %v7178_v61  ;;  %8220 = vmatprep.subr.mxu0 %v7233_v37 }
 0xf6f   : > { %8131 = vmatpush3.msra.mxu1 %v7178_v61  ;;  %v7221_v61 = vld [vmem:[%s8897_s0 + $0x1b8] sm:$0xff]  ;;  %8221 = vmatpush3.msra.mxu0 %v7233_v37 }
 0xf70   : > { %8132 = vmatprep.subr.mxu1 %v7177_v17  ;;  %8222 = vmatprep.subr.mxu0 %v7232_v38 }
 0xf71   : > { %8133 = vmatpush3.msra.mxu1 %v7177_v17  ;;  %8223 = vmatpush3.msra.mxu0 %v7232_v38 }
 0xf72   : > { %8134 = vmatprep.subr.mxu1 %v7176_v18  ;;  %8224 = vmatprep.subr.mxu0 %v7231_v39 }
 0xf73   : > { %8135 = vmatpush3.msra.mxu1 %v7176_v18  ;;  %8225 = vmatpush3.msra.mxu0 %v7231_v39 }
 0xf74   : > { %8136 = vmatprep.subr.mxu1 %v7175_v20 }
 0xf75   : > { %8137 = vmatpush3.msra.mxu1 %v7175_v20  ;;  %v7220_v20 = vld [vmem:[%s8897_s0 + $0x1b0] sm:$0xff] }
 0xf76   : > { %8138 = vmatprep.subr.mxu1 %v7174_v3 }
 0xf77   : > { %8139 = vmatpush3.msra.mxu1 %v7174_v3  ;;  %v7219_v3 = vld [vmem:[%s8897_s0 + $0x1a8] sm:$0xff] }
 0xf78   : > { %8141 = vmatmul.mubr.msk.f32.vlgmr.msra.gmra.mxu1 %vm1173_vm2, %v9239_v60  ;;  %8162 = vmatprep.subr.mxu1 %v8617_v59 }
 0xf79   : > { %8164 = vmatprep.mubr.msk.f32.mxu1 %vm8618_vm3, %v8617_v59 }
 0xf80   : > { %v8161_v63 = vpop.f32.mrf.mxu0 }
 0xf82   : > { %v4380_v0 = vpop.f32.mrf.mxu0 }
0x1024   : > { %v4042_v21 = vpop.f32.mrf.mxu1 }
0x1025   : > { %v9333_v7 = vadd.f32 %v4042_v21, %v9267_v16  ;;  %v4205_v16 = vadd.f32 %v7171_v28, %v4204_v30  ;;  %v7218_v21 = vld [vmem:[%s8897_s0 + $0x1a0] sm:$0xff] }
0x1026   : > { %v8099_v22 = vpop.f32.mrf.mxu1 }
0x1027   : > { %v7217_v22 = vld [vmem:[%s8897_s0 + $0x198] sm:$0xff] }
0x1028   : > { %v4115_v23 = vpop.f32.mrf.mxu1 }
0x1029   : > { %v9336_v24 = vadd.f32 %v4115_v23, %v9270_v19  ;;  %v4210_v19 = vadd.f32 %v8123_v11, %v7171_v28  ;;  %v7216_v23 = vld [vmem:[%s8897_s0 + $0x190] sm:$0xff]  ;;  %v7214_v11 = vld [vmem:[%s8897_s0 + $0x180] sm:$0xff] }
0x102a   : > { %v8104_v25 = vpop.f32.mrf.mxu1 }
0x102b   : > { %v7215_v25 = vld [vmem:[%s8897_s0 + $0x188] sm:$0xff] }
0x1038   : > { %v8142_v26 = vpop.f32.mrf.mxu1 }
0x1039   : > { %v4302_v31 = vadd.f32 %v8142_v26, %v7183_v14 }
0x103a   : > { %v4296_v27 = vpop.f32.mrf.mxu1 }
0x103b   : > { %v4297_v29 = vadd.f32 %v7183_v14, %v4296_v27 }
0x103d   : > { %8163 = vmatpush3.xpose.msk.msra.mxu1 %vm1428_vm4, %v4297_v29 }
0x103e   : > { %8167 = vmatprep.subr.mxu1 %v8617_v59 }
0x1040   : > { %8165 = vmatmul.mubr.msk.f32.vlgmr.msra.gmra.mxu1 %vm1428_vm4, %v4205_v16  ;;  %v8200_v16 = vpop.f32.mrf.mxu0 }
0x1041   : > { %8168 = vmatpush3.xpose.msk.msra.mxu1 %vm1428_vm4, %v4302_v31  ;;  %8169 = vmatprep.mubr.msk.f32.mxu1 %vm8618_vm3, %v8617_v59 }
0x1042   : > { %8172 = vmatprep.subr.mxu1 %v8617_v59  ;;  %v4796_v35 = vpop.f32.mrf.mxu0 }
0x1044   : > { %8170 = vmatmul.mubr.msk.f32.vlgmr.msra.gmra.mxu1 %vm1428_vm4, %v4210_v19  ;;  %v7223_v19 = vld [vmem:[%s8902_s16 + $0x6] ss:$0 sm:$0xff] }
0x1045   : > { %8174 = vmatprep.mubr.msk.f32.mxu1 %vm8618_vm3, %v8617_v59  ;;  %8173 = vmatpush3.msra.mxu1 %v4380_v0 }
0x1046   : > { %8177 = vmatprep.subr.mxu1 %v8617_v59 }
0x1100   : > { %v4461_v40 = vpop.f32.mrf.mxu1 }
0x1101   : > { %v4541_v58 = vmul.f32 0.35355338, %v4461_v40  ;;  %v7230_v40 = vld [vmem:[%s8907_s28 + $0x1a0] sm:$0xff] }
0x1102   : > { %v8166_v41 = vpop.f32.mrf.mxu1  ;;  %8226 = vmatprep.subr.mxu0 %v7230_v40 }
0x1103   : > { %v4543_v57 = vsel %vm1428_vm4, %v4541_v58, -inf  ;;  %8227 = vmatpush3.msra.mxu0 %v7230_v40  ;;  %v7228_v41 = vld [vmem:[%s8907_s28 + $0x190] sm:$0xff]  ;;  %v7273_v40 = vld [vmem:[%s8907_s28 + $0x1f8] sm:$0xff] }
0x1104   : > { %4544 = vmax.xlane.f32.xlu0 %v4543_v57  ;;  %v4537_v42 = vpop.f32.mrf.mxu1  ;;  %v7227_v57 = vld [vmem:[%s8907_s28 + $0x188] sm:$0xff] }
0x1105   : > { %v4542_v43 = vmul.f32 0.35355338, %v4537_v42  ;;  %v7226_v42 = vld [vmem:[%s8907_s28 + $0x180] sm:$0xff] }
0x1106   : > { %v8171_v44 = vpop.f32.mrf.mxu1 }
0x1107   : > { %v4546_v45 = vsel %vm1428_vm4, %v4542_v43, -inf }
0x1108   : > { %4547 = vmax.xlane.f32.xlu1 %v4546_v45 }
0x118d   : > { %v4545_v46 = vpop.xlane.xlu0 %4544 }
0x118e   : > { %v4549_v47 = vsub.f32 %v4541_v58, %v4545_v46  ;;  %v7229_v58 = vld [vmem:[%s8907_s28 + $0x198] sm:$0xff] }
0x118f   : > { %8228 = vmatprep.subr.mxu0 %v7229_v58 }
0x1190   : > { %v4551_v48 = vmul.f32 1.442695, %v4549_v47  ;;  %8229 = vmatpush3.msra.mxu0 %v7229_v58  ;;  %v7272_v58 = vld [vmem:[%s8907_s28 + $0x1f0] sm:$0xff] }
0x1191   : > { %v4548_v49 = vpop.xlane.xlu1 %4547  ;;  %8230 = vmatprep.subr.mxu0 %v7228_v41 }
0x1192   : > { %8497 = vpow2.f32 %v4551_v48  ;;  %v4550_v50 = vsub.f32 %v4542_v43, %v4548_v49  ;;  %8231 = vmatpush3.msra.mxu0 %v7228_v41  ;;  %v7271_v41 = vld [vmem:[%s8907_s28 + $0x1e8] sm:$0xff] }
0x1193   : > { %8232 = vmatprep.subr.mxu0 %v7227_v57 }
0x1194   : > { %v4553_v51 = vmul.f32 1.442695, %v4550_v50  ;;  %8233 = vmatpush3.msra.mxu0 %v7227_v57  ;;  %v7270_v57 = vld [vmem:[%s8907_s28 + $0x1e0] sm:$0xff] }
0x1195   : > { %8234 = vmatprep.subr.mxu0 %v7226_v42 }
0x1196   : > { %8499 = vpow2.f32 %v4553_v51  ;;  %8235 = vmatpush3.msra.mxu0 %v7226_v42  ;;  %v7269_v42 = vld [vmem:[%s8907_s28 + $0x1d8] sm:$0xff] }
0x1197   : > { %8237 = vmatmul.mubr.msk.f32.vlgmr.msra.gmra.mxu0 %vm1173_vm2, %v9239_v60  ;;  %8259 = vmatprep.subr.mxu0 %v7249_v8 }
0x1198   : > { %8275 = vmatprep.mubr.msk.f32.mxu0 %vm1173_vm2, %v9243_v62  ;;  %8260 = vmatpush3.msra.mxu0 %v7249_v8 }
0x1199   : > { %8261 = vmatprep.subr.mxu0 %v7248_v9 }
0x119a   : > { %8262 = vmatpush3.msra.mxu0 %v7248_v9 }
0x119b   : > { %8263 = vmatprep.subr.mxu0 %v7247_v10 }
0x119c   : > { %8264 = vmatpush3.msra.mxu0 %v7247_v10 }
0x119f   : > { %v8498_v52 = vpop.eup %8497 }
0x11a0   : > { %v4555_v53 = vsel %vm1428_vm4, %v8498_v52, 0.0 }
0x11a1   : > { %4556 = vadd.xlane.f32.xlu0 %v4555_v53 }
0x11a3   : > { %v8500_v54 = vpop.eup %8499 }
0x11a4   : > { %v4558_v55 = vsel %vm1428_vm4, %v8500_v54, 0.0 }
0x11a5   : > { %4559 = vadd.xlane.f32.xlu1 %v4558_v55 }
0x122a   : > { %v4557_v12 = vpop.xlane.xlu0 %4556 }
0x122b   : > { %8501 = vrcp.f32 %v4557_v12  ;;  %v7246_v12 = vld [vmem:[%s9870_s8 + $0x1e0] sm:$0xff] }
0x122c   : > { %8265 = vmatprep.subr.mxu0 %v7246_v12 }
0x122d   : > { %8266 = vmatpush3.msra.mxu0 %v7246_v12 }
0x122e   : > { %v4560_v13 = vpop.xlane.xlu1 %4559 }
0x122f   : > { %8503 = vrcp.f32 %v4560_v13  ;;  %v7245_v13 = vld [vmem:[%s9870_s8 + $0x1d8] sm:$0xff] }
0x1230   : > { %8267 = vmatprep.subr.mxu0 %v7245_v13 }
0x1231   : > { %8268 = vmatpush3.msra.mxu0 %v7245_v13 }
0x1238   : > { %v8502_v15 = vpop.eup %8501 }
0x1239   : > { %v4563_v56 = vmul.f32 %v8502_v15, %v8498_v52  ;;  %v7244_v15 = vld [vmem:[%s9870_s8 + $0x1d0] sm:$0xff] }
0x123a   : > { %8269 = vmatprep.subr.mxu0 %v7244_v15 }
0x123b   : > { %8175 = vmatmul.mubr.msk.f32.vlgmr.msra.gmra.mxu1 %vm1428_vm4, %v4563_v56  ;;  %8270 = vmatpush3.msra.mxu0 %v7244_v15  ;;  %v7243_v56 = vld [vmem:[%s9870_s8 + $0x1c8] sm:$0xff] }
0x123c   : > { %v8504_v17 = vpop.eup %8503  ;;  %8178 = vmatpush3.msra.mxu1 %v8161_v63  ;;  %8179 = vmatprep.mubr.msk.f32.mxu1 %vm8618_vm3, %v8617_v59 }
0x123d   : > { %8201 = vmatprep.subr.mxu1 %v7221_v61  ;;  %v4564_v18 = vmul.f32 %v8504_v17, %v8500_v54  ;;  %8271 = vmatprep.subr.mxu0 %v7243_v56 }
0x123e   : > { %8272 = vmatpush3.msra.mxu0 %v7243_v56 }
0x123f   : > { %8180 = vmatmul.mubr.msk.f32.vlgmr.msra.gmra.mxu1 %vm1428_vm4, %v4564_v18 }
0x1240   : > { %8202 = vmatpush3.msra.mxu1 %v7221_v61  ;;  %8217 = vmatprep.mubr.msk.f32.mxu1 %vm1173_vm2, %v9243_v62  ;;  %v7242_v61 = vld [vmem:[%s9870_s8 + $0x1c0] sm:$0xff] }
0x1241   : > { %8203 = vmatprep.subr.mxu1 %v7220_v20  ;;  %8273 = vmatprep.subr.mxu0 %v7242_v61 }
0x1242   : > { %8204 = vmatpush3.msra.mxu1 %v7220_v20  ;;  %8274 = vmatpush3.msra.mxu0 %v7242_v61 }
0x1243   : > { %8205 = vmatprep.subr.mxu1 %v7219_v3  ;;  %8276 = vmatmul.mubr.msk.f32.vlgmr.msra.gmra.mxu0 %vm1173_vm2, %v9239_v60 }
0x1244   : > { %8206 = vmatpush3.msra.mxu1 %v7219_v3  ;;  %8313 = vmatprep.mubr.msk.f32.mxu0 %vm1173_vm2, %v9243_v62 }
0x1245   : > { %8207 = vmatprep.subr.mxu1 %v7218_v21  ;;  %8297 = vmatprep.subr.mxu0 %v7273_v40 }
0x1246   : > { %8208 = vmatpush3.msra.mxu1 %v7218_v21  ;;  %v7261_v21 = vld [vmem:[%s8897_s0 + $0x1f8] sm:$0xff]  ;;  %8298 = vmatpush3.msra.mxu0 %v7273_v40  ;;  %v7282_v40 = vld [vmem:[%s9873_s18] ss:$0 sm:$0xff] }
0x1247   : > { %8209 = vmatprep.subr.mxu1 %v7217_v22  ;;  %8299 = vmatprep.subr.mxu0 %v7272_v58 }
0x1248   : > { %8210 = vmatpush3.msra.mxu1 %v7217_v22  ;;  %8300 = vmatpush3.msra.mxu0 %v7272_v58 }
0x1249   : > { %8211 = vmatprep.subr.mxu1 %v7216_v23  ;;  %8301 = vmatprep.subr.mxu0 %v7271_v41 }
0x124a   : > { %8212 = vmatpush3.msra.mxu1 %v7216_v23  ;;  %8302 = vmatpush3.msra.mxu0 %v7271_v41  ;;  %v7283_v41 = vld [vmem:[%s9874_s20] ss:$0 sm:$0xff] }
0x124b   : > { %8213 = vmatprep.subr.mxu1 %v7215_v25  ;;  %8303 = vmatprep.subr.mxu0 %v7270_v57 }
0x124c   : > { %8214 = vmatpush3.msra.mxu1 %v7215_v25  ;;  %v7260_v25 = vld [vmem:[%s8897_s0 + $0x1f0] sm:$0xff]  ;;  %8304 = vmatpush3.msra.mxu0 %v7270_v57 }
0x124d   : > { %8215 = vmatprep.subr.mxu1 %v7214_v11  ;;  %8305 = vmatprep.subr.mxu0 %v7269_v42 }
0x124e   : > { %8216 = vmatpush3.msra.mxu1 %v7214_v11  ;;  %v7259_v11 = vld [vmem:[%s8897_s0 + $0x1e8] sm:$0xff]  ;;  %8306 = vmatpush3.msra.mxu0 %v7269_v42 }
0x124f   : > { %8218 = vmatmul.mubr.msk.f32.vlgmr.msra.gmra.mxu1 %vm1173_vm2, %v9239_v60  ;;  %8239 = vmatprep.subr.mxu1 %v8617_v59 }
0x1250   : > { %8241 = vmatprep.mubr.msk.f32.mxu1 %vm8618_vm3, %v8617_v59 }
0x1257   : > { %v8238_v5 = vpop.f32.mrf.mxu0 }
0x1259   : > { %v4972_v6 = vpop.f32.mrf.mxu0 }
0x12fb   : > { %v4634_v26 = vpop.f32.mrf.mxu1 }
0x12fc   : > { %v9399_v14 = vadd.f32 %v4634_v26, %v9333_v7  ;;  %v4797_v7 = vadd.f32 %v7211_v33, %v4796_v35  ;;  %v7258_v26 = vld [vmem:[%s8897_s0 + $0x1e0] sm:$0xff] }
0x12fd   : > { %v8176_v27 = vpop.f32.mrf.mxu1 }
0x12fe   : > { %v7257_v27 = vld [vmem:[%s8897_s0 + $0x1d8] sm:$0xff] }
0x12ff   : > { %v4707_v28 = vpop.f32.mrf.mxu1 }
0x1300   : > { %v9402_v29 = vadd.f32 %v4707_v28, %v9336_v24  ;;  %v4802_v24 = vadd.f32 %v8200_v16, %v7211_v33  ;;  %v7256_v28 = vld [vmem:[%s8897_s0 + $0x1d0] sm:$0xff]  ;;  %v7254_v16 = vld [vmem:[%s8897_s0 + $0x1c0] sm:$0xff] }
0x1301   : > { %v8181_v30 = vpop.f32.mrf.mxu1 }
0x1302   : > { %v7255_v30 = vld [vmem:[%s8897_s0 + $0x1c8] sm:$0xff] }
0x1303   : > { %v8277_v35 = vpop.f32.mrf.mxu0 }
0x1305   : > { %v5388_v38 = vpop.f32.mrf.mxu0 }
0x130f   : > { %v8219_v31 = vpop.f32.mrf.mxu1 }
0x1310   : > { %v4894_v36 = vadd.f32 %v8219_v31, %v7223_v19 }
0x1311   : > { %v4888_v32 = vpop.f32.mrf.mxu1 }
0x1312   : > { %v4889_v34 = vadd.f32 %v7223_v19, %v4888_v32 }
0x1314   : > { %8240 = vmatpush3.xpose.msk.msra.mxu1 %vm1428_vm4, %v4889_v34 }
0x1315   : > { %8244 = vmatprep.subr.mxu1 %v8617_v59 }
0x1317   : > { %8242 = vmatmul.mubr.msk.f32.vlgmr.msra.gmra.mxu1 %vm1428_vm4, %v4797_v7 }
0x1318   : > { %8245 = vmatpush3.xpose.msk.msra.mxu1 %vm1428_vm4, %v4894_v36  ;;  %8246 = vmatprep.mubr.msk.f32.mxu1 %vm8618_vm3, %v8617_v59  ;;  %v7263_v36 = vld [vmem:[%s8902_s16 + $0x7] ss:$0 sm:$0xff] }
0x1319   : > { %8249 = vmatprep.subr.mxu1 %v8617_v59 }
0x131b   : > { %8247 = vmatmul.mubr.msk.f32.vlgmr.msra.gmra.mxu1 %vm1428_vm4, %v4802_v24  ;;  %v7251_v24 = vld [vmem:[%s9871_s21 + $0x7] ss:$0 sm:$0xff] }
0x131c   : > { %8251 = vmatprep.mubr.msk.f32.mxu1 %vm8618_vm3, %v8617_v59  ;;  %8250 = vmatpush3.msra.mxu1 %v4972_v6 }
0x131d   : > { %8254 = vmatprep.subr.mxu1 %v8617_v59 }
0x13d7   : > { %v5053_v43 = vpop.f32.mrf.mxu1 }
0x13d8   : > { %v5133_v44 = vmul.f32 0.35355338, %v5053_v43  ;;  %v7268_v43 = vld [vmem:[%s8907_s28 + $0x1d0] sm:$0xff] }
0x13d9   : > { %v8243_v45 = vpop.f32.mrf.mxu1  ;;  %8307 = vmatprep.subr.mxu0 %v7268_v43 }
0x13da   : > { %v5135_v46 = vsel %vm1428_vm4, %v5133_v44, -inf  ;;  %8308 = vmatpush3.msra.mxu0 %v7268_v43  ;;  %v7266_v45 = vld [vmem:[%s8907_s28 + $0x1c0] sm:$0xff] }
0x13db   : > { %5136 = vmax.xlane.f32.xlu0 %v5135_v46  ;;  %v5129_v47 = vpop.f32.mrf.mxu1  ;;  %v8527_v46 = vld [vmem:[#allocation2 + $0x8] sm:$0xff] }
0x13dc   : > { %v5134_v48 = vmul.f32 0.35355338, %v5129_v47 }
0x13dd   : > { %v8248_v49 = vpop.f32.mrf.mxu1 }
0x13de   : > { %v5138_v50 = vsel %vm1428_vm4, %v5134_v48, -inf }
0x13df   : > { %5139 = vmax.xlane.f32.xlu1 %v5138_v50 }
0x1464   : > { %v5137_v51 = vpop.xlane.xlu0 %5136 }
0x1465   : > { %v5141_v52 = vsub.f32 %v5133_v44, %v5137_v51  ;;  %v7267_v44 = vld [vmem:[%s8907_s28 + $0x1c8] sm:$0xff] }
0x1466   : > { %8309 = vmatprep.subr.mxu0 %v7267_v44 }
0x1467   : > { %v5143_v53 = vmul.f32 1.442695, %v5141_v52  ;;  %8310 = vmatpush3.msra.mxu0 %v7267_v44 }
0x1468   : > { %v5140_v54 = vpop.xlane.xlu1 %5139  ;;  %8311 = vmatprep.subr.mxu0 %v7266_v45 }
0x1469   : > { %8505 = vpow2.f32 %v5143_v53  ;;  %v5142_v55 = vsub.f32 %v5134_v48, %v5140_v54  ;;  %8312 = vmatpush3.msra.mxu0 %v7266_v45 }
0x146a   : > { %8314 = vmatmul.mubr.msk.f32.vlgmr.msra.gmra.mxu0 %vm1173_vm2, %v8527_v46 }
0x146b   : > { %v5145_v63 = vmul.f32 1.442695, %v5142_v55 }
0x146d   : > { %8507 = vpow2.f32 %v5145_v63 }
0x1476   : > { %v8506_v0 = vpop.eup %8505 }
0x1477   : > { %v5147_v1 = vsel %vm1428_vm4, %v8506_v0, 0.0 }
0x1478   : > { %5148 = vadd.xlane.f32.xlu0 %v5147_v1 }
0x147a   : > { %v8508_v2 = vpop.eup %8507 }
0x147b   : > { %v5150_v4 = vsel %vm1428_vm4, %v8508_v2, 0.0 }
0x147c   : > { %5151 = vadd.xlane.f32.xlu1 %v5150_v4 }
0x1501   : > { %v5149_v17 = vpop.xlane.xlu0 %5148 }
0x1502   : > { %8509 = vrcp.f32 %v5149_v17 }
0x1505   : > { %v5152_v18 = vpop.xlane.xlu1 %5151 }
0x1506   : > { %8511 = vrcp.f32 %v5152_v18 }
0x150f   : > { %v8510_v20 = vpop.eup %8509 }
0x1510   : > { %v5155_v3 = vmul.f32 %v8510_v20, %v8506_v0 }
0x1512   : > { %8252 = vmatmul.mubr.msk.f32.vlgmr.msra.gmra.mxu1 %vm1428_vm4, %v5155_v3 }
0x1513   : > { %v8512_v22 = vpop.eup %8511  ;;  %8255 = vmatpush3.msra.mxu1 %v8238_v5  ;;  %8256 = vmatprep.mubr.msk.f32.mxu1 %vm8618_vm3, %v8617_v59 }
0x1514   : > { %8278 = vmatprep.subr.mxu1 %v7261_v21  ;;  %v5156_v23 = vmul.f32 %v8512_v22, %v8508_v2  ;;  %v8528_v22 = vld [vmem:[#allocation2] sm:$0xff] }
0x1516   : > { %8257 = vmatmul.mubr.msk.f32.vlgmr.msra.gmra.mxu1 %vm1428_vm4, %v5156_v23 }
0x1517   : > { %8279 = vmatpush3.msra.mxu1 %v7261_v21  ;;  %8294 = vmatprep.mubr.msk.f32.mxu1 %vm1173_vm2, %v9243_v62 }
0x1518   : > { %8280 = vmatprep.subr.mxu1 %v7260_v25 }
0x1519   : > { %8281 = vmatpush3.msra.mxu1 %v7260_v25 }
0x151a   : > { %8282 = vmatprep.subr.mxu1 %v7259_v11 }
0x151b   : > { %8283 = vmatpush3.msra.mxu1 %v7259_v11 }
0x151c   : > { %8284 = vmatprep.subr.mxu1 %v7258_v26 }
0x151d   : > { %8285 = vmatpush3.msra.mxu1 %v7258_v26 }
0x151e   : > { %8286 = vmatprep.subr.mxu1 %v7257_v27 }
0x151f   : > { %8287 = vmatpush3.msra.mxu1 %v7257_v27 }
0x1520   : > { %8288 = vmatprep.subr.mxu1 %v7256_v28 }
0x1521   : > { %8289 = vmatpush3.msra.mxu1 %v7256_v28 }
0x1522   : > { %8290 = vmatprep.subr.mxu1 %v7255_v30 }
0x1523   : > { %8291 = vmatpush3.msra.mxu1 %v7255_v30 }
0x1524   : > { %8292 = vmatprep.subr.mxu1 %v7254_v16 }
0x1525   : > { %8293 = vmatpush3.msra.mxu1 %v7254_v16 }
0x1526   : > { %8295 = vmatmul.mubr.msk.f32.vlgmr.msra.gmra.mxu1 %vm1173_vm2, %v9239_v60  ;;  %8316 = vmatprep.subr.mxu1 %v8617_v59 }
0x1527   : > { %8318 = vmatprep.mubr.msk.f32.mxu1 %vm8618_vm3, %v8617_v59 }
0x152a   : > { %v8315_v10 = vpop.f32.mrf.mxu0 }
0x152c   : > { %v5564_v12 = vpop.f32.mrf.mxu0 }
0x15d2   : > { %v5226_v62 = vpop.f32.mrf.mxu1 }
0x15d3   : > { %v9465_v31 = vadd.f32 %v5226_v62, %v9399_v14  ;;  %v5389_v14 = vadd.f32 %v7251_v24, %v5388_v38 }
0x15d4   : > { %v8253_v19 = vpop.f32.mrf.mxu1 }
0x15d6   : > { %v5299_v32 = vpop.f32.mrf.mxu1 }
0x15d7   : > { %v9468_v33 = vadd.f32 %v5299_v32, %v9402_v29  ;;  %v5394_v29 = vadd.f32 %v8277_v35, %v7251_v24 }
0x15d8   : > { %v8258_v34 = vpop.f32.mrf.mxu1 }
0x15e6   : > { %v8296_v7 = vpop.f32.mrf.mxu1 }
0x15e7   : > { %v5486_v39 = vadd.f32 %v8296_v7, %v7263_v36 }
0x15e8   : > { %v5480_v60 = vpop.f32.mrf.mxu1 }
0x15e9   : > { %v5481_v37 = vadd.f32 %v7263_v36, %v5480_v60  ;;  %v7284_v36 = vld [vmem:[%s1042_s26] ss:$0 sm:$0xff] }
0x15ea   : > { %5954 = vst.msk [vmem:[#allocation3] sm:$0xff] %vm1173_vm2, %v7284_v36  ;;  %5955 = vst.msk [vmem:[#allocation3 + $0x8] sm:$0xff] %vm1173_vm2, %v7284_v36 }
0x15eb   : > { %8317 = vmatpush3.xpose.msk.msra.mxu1 %vm1428_vm4, %v5481_v37 }
0x15ec   : > { %8321 = vmatprep.subr.mxu1 %v8617_v59 }
0x15ee   : > { %8319 = vmatmul.mubr.msk.f32.vlgmr.msra.gmra.mxu1 %vm1428_vm4, %v5389_v14 }
0x15ef   : > { %8322 = vmatpush3.xpose.msk.msra.mxu1 %vm1428_vm4, %v5486_v39  ;;  %8323 = vmatprep.mubr.msk.f32.mxu1 %vm8618_vm3, %v8617_v59 }
0x15f0   : > { %8326 = vmatprep.subr.mxu1 %v8617_v59 }
0x15f2   : > { %8324 = vmatmul.mubr.msk.f32.vlgmr.msra.gmra.mxu1 %vm1428_vm4, %v5394_v29 }
0x15f3   : > { %8328 = vmatprep.mubr.msk.f32.mxu1 %vm8618_vm3, %v8617_v59  ;;  %8327 = vmatpush3.msra.mxu1 %v5564_v12 }
0x15f4   : > { %8331 = vmatprep.subr.mxu1 %v8617_v59 }
0x16ae   : > { %v5645_v47 = vpop.f32.mrf.mxu1 }
0x16af   : > { %v5725_v48 = vmul.f32 0.35355338, %v5645_v47 }
0x16b0   : > { %v8320_v49 = vpop.f32.mrf.mxu1 }
0x16b1   : > { %v5727_v50 = vsel %vm1428_vm4, %v5725_v48, -inf }
0x16b2   : > { %5728 = vmax.xlane.f32.xlu0 %v5727_v50  ;;  %v5721_v51 = vpop.f32.mrf.mxu1 }
0x16b3   : > { %v5726_v52 = vmul.f32 0.35355338, %v5721_v51 }
0x16b4   : > { %v8325_v53 = vpop.f32.mrf.mxu1 }
0x16b5   : > { %v5730_v54 = vsel %vm1428_vm4, %v5726_v52, -inf }
0x16b6   : > { %5731 = vmax.xlane.f32.xlu1 %v5730_v54 }
0x173b   : > { %v5729_v55 = vpop.xlane.xlu0 %5728 }
0x173c   : > { %v5733_v63 = vsub.f32 %v5725_v48, %v5729_v55 }
0x173e   : > { %v5735_v0 = vmul.f32 1.442695, %v5733_v63 }
0x173f   : > { %v5732_v1 = vpop.xlane.xlu1 %5731 }
0x1740   : > { %8513 = vpow2.f32 %v5735_v0  ;;  %v5734_v2 = vsub.f32 %v5726_v52, %v5732_v1 }
0x1742   : > { %v5737_v4 = vmul.f32 1.442695, %v5734_v2 }
0x1744   : > { %8515 = vpow2.f32 %v5737_v4 }
0x174d   : > { %v8514_v5 = vpop.eup %8513 }
0x174e   : > { %v5739_v6 = vsel %vm1428_vm4, %v8514_v5, 0.0 }
0x174f   : > { %5740 = vadd.xlane.f32.xlu0 %v5739_v6 }
0x1751   : > { %v8516_v8 = vpop.eup %8515 }
0x1752   : > { %v5742_v9 = vsel %vm1428_vm4, %v8516_v8, 0.0 }
0x1753   : > { %5743 = vadd.xlane.f32.xlu1 %v5742_v9 }
0x17d8   : > { %v5741_v13 = vpop.xlane.xlu0 %5740 }
0x17d9   : > { %8517 = vrcp.f32 %v5741_v13 }
0x17dc   : > { %v5744_v15 = vpop.xlane.xlu1 %5743 }
0x17dd   : > { %8519 = vrcp.f32 %v5744_v15 }
0x17e6   : > { %v8518_v56 = vpop.eup %8517 }
0x17e7   : > { %v5747_v61 = vmul.f32 %v8518_v56, %v8514_v5 }
0x17e9   : > { %8329 = vmatmul.mubr.msk.f32.vlgmr.msra.gmra.mxu1 %vm1428_vm4, %v5747_v61 }
0x17ea   : > { %v8520_v17 = vpop.eup %8519  ;;  %8332 = vmatpush3.msra.mxu1 %v8315_v10  ;;  %8333 = vmatprep.mubr.msk.f32.mxu1 %vm8618_vm3, %v8617_v59 }
0x17eb   : > { %v5748_v18 = vmul.f32 %v8520_v17, %v8516_v8 }
0x17ed   : > { %8334 = vmatmul.mubr.msk.f32.vlgmr.msra.gmra.mxu1 %vm1428_vm4, %v5748_v18 }
0x18a9   : > { %v5818_v20 = vpop.f32.mrf.mxu1 }
0x18aa   : > { %v5895_v3 = vadd.f32 %v5818_v20, %v9465_v31 }
0x18ab   : > { %v8330_v21 = vpop.f32.mrf.mxu1 }
0x18ac   : > { %v5897_v23 = vadd.f32 %v8528_v22, %v5895_v3 }
0x18ad   : > { %v5891_v25 = vpop.f32.mrf.mxu1 }
0x18ae   : > { %v5896_v11 = vadd.f32 %v5891_v25, %v9468_v33  ;;  %v5901_v26 = vsel %vm1173_vm2, %v5897_v23, 0.0 }
0x18af   : > { %5902 = vadd.xlane.f32.xlu0 %v5901_v26  ;;  %v8335_v27 = vpop.f32.mrf.mxu1 }
0x18b0   : > { %v5898_v28 = vadd.f32 %v8527_v46, %v5896_v11 }
0x18b2   : > { %v5904_v59 = vsel %vm1173_vm2, %v5898_v28, 0.0 }
0x18b3   : > { %5905 = vadd.xlane.f32.xlu1 %v5904_v59 }
0x1938   : > { %v5903_v30 = vpop.xlane.xlu0 %5902 }
0x1939   : > { %v5908_v16 = vmul.f32 0.015625, %v5903_v30 }
0x193b   : > { %v5910_v62 = vsub.f32 %v5897_v23, %v5908_v16 }
0x193c   : > { %v5906_v19 = vpop.xlane.xlu1 %5905 }
0x193d   : > { %v5909_v31 = vmul.f32 0.015625, %v5906_v19  ;;  %v5912_v32 = vmul.f32 %v5910_v62, %v5910_v62 }
0x193f   : > { %v5911_v34 = vsub.f32 %v5898_v28, %v5909_v31  ;;  %v5914_v35 = vsel %vm1173_vm2, %v5912_v32, 0.0 }
0x1940   : > { %5915 = vadd.xlane.f32.xlu0 %v5914_v35 }
0x1941   : > { %v5913_v33 = vmul.f32 %v5911_v34, %v5911_v34 }
0x1943   : > { %v5917_v7 = vsel %vm1173_vm2, %v5913_v33, 0.0 }
0x1944   : > { %5918 = vadd.xlane.f32.xlu1 %v5917_v7 }
0x19c9   : > { %v5916_v60 = vpop.xlane.xlu0 %5915 }
0x19ca   : > { %v5920_v24 = vmul.f32 0.015625, %v5916_v60 }
0x19cc   : > { %v5922_v37 = vadd.f32 1e-05, %v5920_v24 }
0x19cd   : > { %v5919_v38 = vpop.xlane.xlu1 %5918 }
0x19ce   : > { %8521 = vrsqrt.f32 %v5922_v37  ;;  %v5921_v14 = vmul.f32 0.015625, %v5919_v38 }
0x19d0   : > { %v5923_v39 = vadd.f32 1e-05, %v5921_v14 }
0x19d2   : > { %8523 = vrsqrt.f32 %v5923_v39 }
0x19db   : > { %v8522_v29 = vpop.eup %8521 }
0x19dc   : > { %v5926_v58 = vmul.f32 %v8522_v29, %v5910_v62 }
0x19de   : > { %v5934_v57 = vmul.f32 %v7282_v40, %v5926_v58 }
0x19df   : > { %v8524_v42 = vpop.eup %8523 }
0x19e0   : > { %v5942_v43 = vadd.f32 %v7283_v41, %v5934_v57  ;;  %v5927_v44 = vmul.f32 %v8524_v42, %v5911_v34 }
0x19e2   : > { %5944 = vst.msk [vmem:[#allocation2] sm:$0xff] %vm1173_vm2, %v5942_v43  ;;  %v5935_v45 = vmul.f32 %v7282_v40, %v5927_v44 }
0x19e4   : > { %v5943_v46 = vadd.f32 %v7283_v41, %v5935_v45 }
0x19e6   : > { %5945 = vst.msk [vmem:[#allocation2 + $0x8] sm:$0xff] %vm1173_vm2, %v5943_v46 }
0x19e7 PF: > { %v5987_v47 = vld [vmem:[%s8950_s5 + $0xe8] sm:$0xff]  ;;  %v5989_v48 = vld [vmem:[%s8950_s5 + $0xf8] sm:$0xff]  ;;  %v5986_v49 = vld [vmem:[%s8950_s5 + $0xe0] sm:$0xff]  ;;  %vm6012_vm5 = vcmask 523264   ;;  %v8619_v26 = vmov 0.0   ;;  %s9875_s4 = scalar_lea.vmem %s9812_s15, %s8931_s2  ;;  %p6401_p3 = scmp.eq.s32.totalorder %s8599_s24, 3 }
0x19e8   : > { %6035 = vmatprep.subr.mxu0 %v5987_v47  ;;  %6112 = vmatprep.subr.mxu1 %v5989_v48  ;;  %v5988_v50 = vld [vmem:[%s8950_s5 + $0xf0] sm:$0xff]  ;;  %v5983_v51 = vld [vmem:[%s8950_s5 + $0xc8] sm:$0xff]  ;;  %v5985_v52 = vld [vmem:[%s8950_s5 + $0xd8] sm:$0xff]  ;;  %p7289_p4 = scmp.ne.s32.totalorder %s8599_s24, 3 }
0x19e9   : > { %6036 = vmatpush1.msra.mxu0 %v5986_v49  ;;  %6113 = vmatpush1.msra.mxu1 %v5988_v50  ;;  %v5982_v53 = vld [vmem:[%s8950_s5 + $0xc0] sm:$0xff]  ;;  %v5984_v54 = vld [vmem:[%s8950_s5 + $0xd0] sm:$0xff]  ;;  %v5979_v55 = vld [vmem:[%s8950_s5 + $0xa8] sm:$0xff]  ;;  %s9876_s23 = scalar_lea.vmem (!%p7289_p4), %s9809_s12, %s8880_s22  ;;  %s9877_s14 = scalar_lea.vmem (!%p7289_p4), %s9810_s13, %s8880_s22 }
0x19ea   : > { %6037 = vmatprep.subr.mxu0 %v5983_v51  ;;  %6114 = vmatprep.subr.mxu1 %v5985_v52  ;;  %v5981_v63 = vld [vmem:[%s8950_s5 + $0xb8] sm:$0xff]  ;;  %v5978_v0 = vld [vmem:[%s8950_s5 + $0xa0] sm:$0xff]  ;;  %v5980_v1 = vld [vmem:[%s8950_s5 + $0xb0] sm:$0xff] }
0x19eb   : > { %6038 = vmatpush1.msra.mxu0 %v5982_v53  ;;  %6115 = vmatpush1.msra.mxu1 %v5984_v54  ;;  %v5975_v2 = vld [vmem:[%s8950_s5 + $0x88] sm:$0xff]  ;;  %v5977_v4 = vld [vmem:[%s8950_s5 + $0x98] sm:$0xff]  ;;  %v5974_v5 = vld [vmem:[%s8950_s5 + $0x80] sm:$0xff] }
0x19ec   : > { %6039 = vmatprep.subr.mxu0 %v5979_v55  ;;  %6116 = vmatprep.subr.mxu1 %v5981_v63  ;;  %v5976_v6 = vld [vmem:[%s8950_s5 + $0x90] sm:$0xff]  ;;  %v5971_v8 = vld [vmem:[%s8950_s5 + $0x68] sm:$0xff]  ;;  %v5973_v9 = vld [vmem:[%s8950_s5 + $0x78] sm:$0xff] }
0x19ed   : > { %6040 = vmatpush1.msra.mxu0 %v5978_v0  ;;  %6117 = vmatpush1.msra.mxu1 %v5980_v1  ;;  %v5970_v10 = vld [vmem:[%s8950_s5 + $0x60] sm:$0xff]  ;;  %v5972_v12 = vld [vmem:[%s8950_s5 + $0x70] sm:$0xff]  ;;  %v5967_v13 = vld [vmem:[%s8950_s5 + $0x48] sm:$0xff] }
0x19ee   : > { %6041 = vmatprep.subr.mxu0 %v5975_v2  ;;  %6118 = vmatprep.subr.mxu1 %v5977_v4  ;;  %v5969_v15 = vld [vmem:[%s8950_s5 + $0x58] sm:$0xff]  ;;  %v5966_v56 = vld [vmem:[%s8950_s5 + $0x40] sm:$0xff]  ;;  %v5968_v61 = vld [vmem:[%s8950_s5 + $0x50] sm:$0xff] }
0x19ef   : > { %6042 = vmatpush1.msra.mxu0 %v5974_v5  ;;  %6119 = vmatpush1.msra.mxu1 %v5976_v6  ;;  %v5963_v17 = vld [vmem:[%s8950_s5 + $0x28] sm:$0xff]  ;;  %v5965_v18 = vld [vmem:[%s8950_s5 + $0x38] sm:$0xff]  ;;  %v5962_v20 = vld [vmem:[%s8950_s5 + $0x20] sm:$0xff] }
0x19f0   : > { %6043 = vmatprep.subr.mxu0 %v5971_v8  ;;  %6120 = vmatprep.subr.mxu1 %v5973_v9  ;;  %v5964_v3 = vld [vmem:[%s8950_s5 + $0x30] sm:$0xff]  ;;  %v5959_v21 = vld [vmem:[%s8950_s5 + $0x8] sm:$0xff]  ;;  %v5961_v22 = vld [vmem:[%s8950_s5 + $0x18] sm:$0xff] }
0x19f1   : > { %6044 = vmatpush1.msra.mxu0 %v5970_v10  ;;  %6121 = vmatpush1.msra.mxu1 %v5972_v12  ;;  %v5958_v23 = vld [vmem:[%s8950_s5] sm:$0xff]  ;;  %v5960_v25 = vld [vmem:[%s8950_s5 + $0x10] sm:$0xff]  ;;  %v6214_v27 = vld [vmem:[%s8947_s3 + $0xf8] sm:$0xff] }
0x19f2   : > { %6045 = vmatprep.subr.mxu0 %v5967_v13  ;;  %6122 = vmatprep.subr.mxu1 %v5969_v15  ;;  %v5956_v11 = vld [vmem:[#allocation2] sm:$0xff]  ;;  %v6246_v28 = vld [vmem:[%s8947_s3 + $0x1f8] sm:$0xff]  ;;  %v5957_v16 = vld [vmem:[#allocation2 + $0x8] sm:$0xff] }
0x19f3   : > { %6046 = vmatpush1.msra.mxu0 %v5966_v56  ;;  %6123 = vmatpush1.msra.mxu1 %v5968_v61  ;;  %v6198_v59 = vld [vmem:[%s8947_s3 + $0x78] sm:$0xff]  ;;  %v6213_v62 = vld [vmem:[%s8947_s3 + $0xf0] sm:$0xff]  ;;  %v6212_v34 = vld [vmem:[%s8947_s3 + $0xe8] sm:$0xff] }
0x19f4   : > { %6047 = vmatprep.subr.mxu0 %v5963_v17  ;;  %6124 = vmatprep.subr.mxu1 %v5965_v18  ;;  %v6230_v30 = vld [vmem:[%s8947_s3 + $0x178] sm:$0xff]  ;;  %v6245_v19 = vld [vmem:[%s8947_s3 + $0x1f0] sm:$0xff]  ;;  %v6244_v35 = vld [vmem:[%s8947_s3 + $0x1e8] sm:$0xff] }
0x19f5   : > { %6048 = vmatpush1.msra.mxu0 %v5962_v20  ;;  %6125 = vmatpush1.msra.mxu1 %v5964_v3  ;;  %v6197_v31 = vld [vmem:[%s8947_s3 + $0x70] sm:$0xff]  ;;  %v6196_v33 = vld [vmem:[%s8947_s3 + $0x68] sm:$0xff]  ;;  %v6211_v36 = vld [vmem:[%s8947_s3 + $0xe0] sm:$0xff] }
0x19f6   : > { %6049 = vmatprep.subr.mxu0 %v5959_v21  ;;  %6126 = vmatprep.subr.mxu1 %v5961_v22  ;;  %v6229_v32 = vld [vmem:[%s8947_s3 + $0x170] sm:$0xff]  ;;  %v6228_v7 = vld [vmem:[%s8947_s3 + $0x168] sm:$0xff]  ;;  %v6243_v60 = vld [vmem:[%s8947_s3 + $0x1e0] sm:$0xff] }
0x19f7   : > { %6050 = vmatpush1.msra.mxu0 %v5958_v23  ;;  %6083 = vmatprep.mubr.f32.mxu0 %v8619_v26  ;;  %v6195_v24 = vld [vmem:[%s8947_s3 + $0x60] sm:$0xff]  ;;  %v6210_v38 = vld [vmem:[%s8947_s3 + $0xd8] sm:$0xff]  ;;  %v6209_v40 = vld [vmem:[%s8947_s3 + $0xd0] sm:$0xff] }
0x19f8   : > { %6127 = vmatpush1.msra.mxu1 %v5960_v25  ;;  %6160 = vmatprep.mubr.f32.mxu1 %v8619_v26  ;;  %v6227_v37 = vld [vmem:[%s8947_s3 + $0x160] sm:$0xff]  ;;  %v6242_v14 = vld [vmem:[%s8947_s3 + $0x1d8] sm:$0xff]  ;;  %v6241_v58 = vld [vmem:[%s8947_s3 + $0x1d0] sm:$0xff] }
0x19f9   : > { %7285 = vmatmul.mubr.msk.f32.vlgmr.msra.gmra.mxu0 %vm6012_vm5, %v5956_v11  ;;  %7287 = vmatmul.mubr.msk.f32.vlgmr.msra.gmra.mxu1 %vm6012_vm5, %v5956_v11  ;;  %v6194_v39 = vld [vmem:[%s8947_s3 + $0x58] sm:$0xff]  ;;  %v6193_v41 = vld [vmem:[%s8947_s3 + $0x50] sm:$0xff]  ;;  %v6208_v42 = vld [vmem:[%s8947_s3 + $0xc8] sm:$0xff] }
0x19fa   : > { %6089 = vmatprep.mubr.f32.mxu0 %v8619_v26  ;;  %6166 = vmatprep.mubr.f32.mxu1 %v8619_v26  ;;  %v6226_v29 = vld [vmem:[%s8947_s3 + $0x158] sm:$0xff]  ;;  %v6225_v57 = vld [vmem:[%s8947_s3 + $0x150] sm:$0xff]  ;;  %v6240_v43 = vld [vmem:[%s8947_s3 + $0x1c8] sm:$0xff] }
0x19fb   : > { %7612 = vmatprep.subr.mxu0 %v6214_v27  ;;  %7650 = vmatprep.subr.mxu1 %v6246_v28  ;;  %v6192_v44 = vld [vmem:[%s8947_s3 + $0x48] sm:$0xff]  ;;  %v6207_v46 = vld [vmem:[%s8947_s3 + $0xc0] sm:$0xff]  ;;  %v6206_v50 = vld [vmem:[%s8947_s3 + $0xb8] sm:$0xff]  ;;  %v5992_v28 = vlaneseq }
0x19fc   : > { %7613 = vmatpush3.msra.mxu0 %v6198_v59  ;;  %7651 = vmatpush3.msra.mxu1 %v6230_v30  ;;  %v6224_v45 = vld [vmem:[%s8947_s3 + $0x148] sm:$0xff]  ;;  %v6239_v47 = vld [vmem:[%s8947_s3 + $0x1c0] sm:$0xff]  ;;  %v6238_v51 = vld [vmem:[%s8947_s3 + $0x1b8] sm:$0xff] }
0x19fd   : > { %7286 = vmatmul.mubr.msk.f32.gmra.mxu0 %vm6012_vm5, %v5957_v16  ;;  %7288 = vmatmul.mubr.msk.f32.gmra.mxu1 %vm6012_vm5, %v5957_v16  ;;  %v6191_v48 = vld [vmem:[%s8947_s3 + $0x40] sm:$0xff]  ;;  %v6190_v52 = vld [vmem:[%s8947_s3 + $0x38] sm:$0xff]  ;;  %v6205_v54 = vld [vmem:[%s8947_s3 + $0xb0] sm:$0xff]  ;;  %v5993_v59 = vshrl.u32 %v5992_v28, 7 }
0x19fe   : > { %7614 = vmatprep.subr.mxu0 %v6213_v62  ;;  %7652 = vmatprep.subr.mxu1 %v6245_v19  ;;  %v6223_v49 = vld [vmem:[%s8947_s3 + $0x140] sm:$0xff]  ;;  %v6222_v53 = vld [vmem:[%s8947_s3 + $0x138] sm:$0xff]  ;;  %v6237_v55 = vld [vmem:[%s8947_s3 + $0x1b0] sm:$0xff] }
0x19ff   : > { %7615 = vmatpush3.msra.mxu0 %v6197_v31  ;;  %7653 = vmatpush3.msra.mxu1 %v6229_v32  ;;  %v6189_v63 = vld [vmem:[%s8947_s3 + $0x30] sm:$0xff]  ;;  %v6204_v1 = vld [vmem:[%s8947_s3 + $0xa8] sm:$0xff]  ;;  %v6203_v6 = vld [vmem:[%s8947_s3 + $0xa0] sm:$0xff]  ;;  %v5994_v30 = vsub.s32 0, %v5993_v59  ;;  %v6002_v16 = vsub.s32 2, %v5993_v59  ;;  %v5998_v19 = vsub.s32 1, %v5993_v59 }
0x1a00   : > { %7616 = vmatprep.subr.mxu0 %v6212_v34  ;;  %7654 = vmatprep.subr.mxu1 %v6244_v35  ;;  %v6221_v0 = vld [vmem:[%s8947_s3 + $0x130] sm:$0xff]  ;;  %v6236_v2 = vld [vmem:[%s8947_s3 + $0x1a8] sm:$0xff]  ;;  %v6235_v8 = vld [vmem:[%s8947_s3 + $0x1a0] sm:$0xff]  ;;  %v6006_v31 = vsub.s32 3, %v5993_v59 }
0x1a01   : > { %7617 = vmatpush3.msra.mxu0 %v6196_v33  ;;  %7655 = vmatpush3.msra.mxu1 %v6228_v7  ;;  %v6188_v4 = vld [vmem:[%s8947_s3 + $0x28] sm:$0xff]  ;;  %v6187_v9 = vld [vmem:[%s8947_s3 + $0x20] sm:$0xff]  ;;  %v6202_v12 = vld [vmem:[%s8947_s3 + $0x98] sm:$0xff] }
0x1a02   : > { %7618 = vmatprep.subr.mxu0 %v6211_v36  ;;  %7656 = vmatprep.subr.mxu1 %v6243_v60  ;;  %v6220_v5 = vld [vmem:[%s8947_s3 + $0x128] sm:$0xff]  ;;  %v6219_v10 = vld [vmem:[%s8947_s3 + $0x120] sm:$0xff]  ;;  %v6234_v13 = vld [vmem:[%s8947_s3 + $0x198] sm:$0xff] }
0x1a03   : > { %7619 = vmatpush3.msra.mxu0 %v6195_v24  ;;  %7657 = vmatpush3.msra.mxu1 %v6227_v37  ;;  %v6186_v15 = vld [vmem:[%s8947_s3 + $0x18] sm:$0xff]  ;;  %v6201_v61 = vld [vmem:[%s8947_s3 + $0x90] sm:$0xff]  ;;  %v6200_v3 = vld [vmem:[%s8947_s3 + $0x88] sm:$0xff] }
0x1a04   : > { %7620 = vmatprep.subr.mxu0 %v6210_v38  ;;  %7658 = vmatprep.subr.mxu1 %v6242_v14  ;;  %v6218_v56 = vld [vmem:[%s8947_s3 + $0x118] sm:$0xff]  ;;  %v6233_v17 = vld [vmem:[%s8947_s3 + $0x190] sm:$0xff]  ;;  %v6232_v21 = vld [vmem:[%s8947_s3 + $0x188] sm:$0xff] }
0x1a05   : > { %7621 = vmatpush3.msra.mxu0 %v6194_v39  ;;  %7659 = vmatpush3.msra.mxu1 %v6226_v29  ;;  %v6185_v18 = vld [vmem:[%s8947_s3 + $0x10] sm:$0xff]  ;;  %v6184_v22 = vld [vmem:[%s8947_s3 + $0x8] sm:$0xff]  ;;  %v6199_v25 = vld [vmem:[%s8947_s3 + $0x80] sm:$0xff] }
0x1a06   : > { %7622 = vmatprep.subr.mxu0 %v6209_v40  ;;  %7660 = vmatprep.subr.mxu1 %v6241_v58  ;;  %v6217_v20 = vld [vmem:[%s8947_s3 + $0x110] sm:$0xff]  ;;  %v6216_v23 = vld [vmem:[%s8947_s3 + $0x108] sm:$0xff]  ;;  %v6231_v11 = vld [vmem:[%s8947_s3 + $0x180] sm:$0xff] }
0x1a07   : > { %7623 = vmatpush3.msra.mxu0 %v6193_v41  ;;  %7661 = vmatpush3.msra.mxu1 %v6225_v57  ;;  %v6183_v26 = vld [vmem:[%s8947_s3] sm:$0xff] }
0x1a08   : > { %7624 = vmatprep.subr.mxu0 %v6208_v42  ;;  %7662 = vmatprep.subr.mxu1 %v6240_v43  ;;  %v6215_v27 = vld [vmem:[%s8947_s3 + $0x100] sm:$0xff] }
0x1a09   : > { %7625 = vmatpush3.msra.mxu0 %v6192_v44  ;;  %7663 = vmatpush3.msra.mxu1 %v6224_v45  ;;  %v5990_v62 = vld [vmem:[%s9875_s4] sm:$0xf] }
0x1a0a   : > { %7626 = vmatprep.subr.mxu0 %v6207_v46  ;;  %7664 = vmatprep.subr.mxu1 %v6239_v47  ;;  %v5995_v32 = vrot.slane %v5990_v62, %v5994_v30  ;;  %v6003_v34 = vrot.slane %v5990_v62, %v6002_v16  ;;  %v5999_v35 = vrot.slane %v5990_v62, %v5998_v19 }
0x1a0b   : > { %7627 = vmatpush3.msra.mxu0 %v6191_v48  ;;  %7665 = vmatpush3.msra.mxu1 %v6223_v49  ;;  %v6007_v33 = vrot.slane %v5990_v62, %v6006_v31 }
0x1a0c   : > { %7628 = vmatprep.subr.mxu0 %v6206_v50  ;;  %7666 = vmatprep.subr.mxu1 %v6238_v51 }
0x1a0d   : > { %7629 = vmatpush3.msra.mxu0 %v6190_v52  ;;  %7667 = vmatpush3.msra.mxu1 %v6222_v53 }
0x1a0e   : > { %7630 = vmatprep.subr.mxu0 %v6205_v54  ;;  %7668 = vmatprep.subr.mxu1 %v6237_v55 }
0x1a0f   : > { %7631 = vmatpush3.msra.mxu0 %v6189_v63  ;;  %7669 = vmatpush3.msra.mxu1 %v6221_v0 }
0x1a10   : > { %7632 = vmatprep.subr.mxu0 %v6204_v1  ;;  %7670 = vmatprep.subr.mxu1 %v6236_v2  ;;  %v6181_v2 = vld [vmem:[#allocation3] sm:$0xff] }
0x1a11   : > { %7633 = vmatpush3.msra.mxu0 %v6188_v4  ;;  %7671 = vmatpush3.msra.mxu1 %v6220_v5 }
0x1a12   : > { %7634 = vmatprep.subr.mxu0 %v6203_v6  ;;  %7672 = vmatprep.subr.mxu1 %v6235_v8 }
0x1a13   : > { %7635 = vmatpush3.msra.mxu0 %v6187_v9  ;;  %7673 = vmatpush3.msra.mxu1 %v6219_v10 }
0x1a14   : > { %7636 = vmatprep.subr.mxu0 %v6202_v12  ;;  %7674 = vmatprep.subr.mxu1 %v6234_v13 }
0x1a15   : > { %7637 = vmatpush3.msra.mxu0 %v6186_v15  ;;  %7675 = vmatpush3.msra.mxu1 %v6218_v56  ;;  %v6182_v15 = vld [vmem:[#allocation3 + $0x8] sm:$0xff] }
0x1a16   : > { %7638 = vmatprep.subr.mxu0 %v6201_v61  ;;  %7676 = vmatprep.subr.mxu1 %v6233_v17 }
0x1a17   : > { %7639 = vmatpush3.msra.mxu0 %v6185_v18  ;;  %7677 = vmatpush3.msra.mxu1 %v6217_v20 }
0x1a18   : > { %7640 = vmatprep.subr.mxu0 %v6200_v3  ;;  %7678 = vmatprep.subr.mxu1 %v6232_v21 }
0x1a19   : > { %7641 = vmatpush3.msra.mxu0 %v6184_v22  ;;  %7679 = vmatpush3.msra.mxu1 %v6216_v23 }
0x1a1a   : > { %7642 = vmatprep.subr.mxu0 %v6199_v25  ;;  %7680 = vmatprep.subr.mxu1 %v6231_v11 }
0x1a1b   : > { %7643 = vmatpush3.msra.mxu0 %v6183_v26  ;;  %7681 = vmatpush3.msra.mxu1 %v6215_v27 }
0x1ab9   : > { %v6085_v7 = vpop.f32.mrf.mxu0  ;;  %v6162_v36 = vpop.f32.mrf.mxu1 }
0x1aba   : > { %v6086_v60 = vadd.f32 %v6085_v7, %v5995_v32  ;;  %v6163_v24 = vadd.f32 %v6162_v36, %v6003_v34 }
0x1abb   : > { %v6087_v37 = vpop.f32.mrf.mxu0  ;;  %v6164_v38 = vpop.f32.mrf.mxu1 }
0x1abc   : > { %v6088_v14 = vadd.f32 %v6087_v37, %v5999_v35  ;;  %v6165_v39 = vadd.f32 %v6164_v38, %v6007_v33  ;;  %v6173_v57 = vmax.f32 %v6086_v60, 0.0  ;;  %v6175_v42 = vmax.f32 %v6163_v24, 0.0 }
0x1abd   : > { %v6091_v29 = vpop.f32.mrf.mxu0  ;;  %v6168_v40 = vpop.f32.mrf.mxu1 }
0x1abe   : > { %v6174_v58 = vmax.f32 %v6088_v14, 0.0  ;;  %v6176_v41 = vmax.f32 %v6165_v39, 0.0  ;;  %v6092_v43 = vadd.f32 %v6091_v29, %v5995_v32  ;;  %v6169_v44 = vadd.f32 %v6168_v40, %v6003_v34 }
0x1abf   : > { %v6093_v45 = vpop.f32.mrf.mxu0  ;;  %v6170_v46 = vpop.f32.mrf.mxu1 }
0x1ac0   : > { %v6094_v47 = vadd.f32 %v6093_v45, %v5999_v35  ;;  %v6171_v48 = vadd.f32 %v6170_v46, %v6007_v33  ;;  %6311 = vmatprep.mubr.f32.mxu0 %v6174_v58  ;;  %6386 = vmatprep.mubr.f32.mxu1 %v6176_v41  ;;  %v6177_v51 = vmax.f32 %v6092_v43, 0.0  ;;  %v6179_v52 = vmax.f32 %v6169_v44, 0.0 }
0x1ac1   : > { %6312 = vmatmul.mubr.f32.vlgmr.msra.gmra.mxu0 %v6173_v57  ;;  %6387 = vmatmul.mubr.f32.vlgmr.msra.gmra.mxu1 %v6175_v42 }
0x1ac2   : > { %v6178_v49 = vmax.f32 %v6094_v47, 0.0  ;;  %v6180_v50 = vmax.f32 %v6171_v48, 0.0 }
0x1ac4   : > { %6316 = vmatprep.mubr.f32.mxu0 %v6178_v49  ;;  %6391 = vmatprep.mubr.f32.mxu1 %v6180_v50 }
0x1ac5   : > { %6317 = vmatmul.mubr.f32.gmra.mxu0 %v6177_v51  ;;  %6392 = vmatmul.mubr.f32.gmra.mxu1 %v6179_v52 }
0x1b81   : > { %v7644_v53 = vpop.f32.mrf.mxu0  ;;  %v7682_v54 = vpop.f32.mrf.mxu1 }
0x1b83   : > { %v7645_v55 = vpop.f32.mrf.mxu0  ;;  %v7683_v63 = vpop.f32.mrf.mxu1 }
0x1b84   : > { %v7646_v0 = vadd.f32 %v7645_v55, %v7644_v53  ;;  %v7684_v1 = vadd.f32 %v7683_v63, %v7682_v54 }
0x1b85   : > { %v7647_v4 = vpop.f32.mrf.mxu0  ;;  %v7685_v5 = vpop.f32.mrf.mxu1 }
0x1b86   : > { %v6389_v6 = vadd.f32 %v7684_v1, %v7646_v0 }
0x1b87   : > { %v7648_v8 = vpop.f32.mrf.mxu0  ;;  %v7686_v9 = vpop.f32.mrf.mxu1 }
0x1b88   : > { %v6397_v10 = vadd.f32 %v6389_v6, %v6181_v2  ;;  %v7649_v12 = vadd.f32 %v7648_v8, %v7647_v4  ;;  %v7687_v13 = vadd.f32 %v7686_v9, %v7685_v5 }
0x1b8a   : > { %6399 = vst.msk [vmem:[#allocation3] sm:$0xff] %vm6012_vm5, %v6397_v10  ;;  %v6394_v56 = vadd.f32 %v7687_v13, %v7649_v12  ;;  %6404 = sbr.rel (%p7289_p4) target bundleno = 7373 (0x1ccd), region = 147 }
0x1b8c   : > { %v6398_v61 = vadd.f32 %v6394_v56, %v6182_v15 }
0x1b8e   : > { %6400 = vst.msk [vmem:[#allocation3 + $0x8] sm:$0xff] %vm6012_vm5, %v6398_v61 }
0x1b8f   : > { %v6405_v17 = vld [vmem:[#allocation2] sm:$0xff]  ;;  %v6406_v20 = vld [vmem:[#allocation2 + $0x8] sm:$0xff] }
0x1b90   : > { %v7290_v24 = vld [vmem:[%s9876_s23] ss:$0 sm:$0xff] }
0x1b91   : > { %v6407_v18 = vld [vmem:[#allocation3] sm:$0xff]  ;;  %v7291_v38 = vld [vmem:[%s9877_s14] ss:$0 sm:$0xff] }
0x1b92   : > { %v6409_v3 = vadd.f32 %v6407_v18, %v6405_v17 }
0x1b94   : > { %v6413_v23 = vsel %vm6012_vm5, %v6409_v3, 0.0 }
0x1b95   : > { %v6408_v21 = vld [vmem:[#allocation3 + $0x8] sm:$0xff]  ;;  %6414 = vadd.xlane.f32.xlu0 %v6413_v23 }
0x1b96   : > { %v6410_v22 = vadd.f32 %v6408_v21, %v6406_v20 }
0x1b98   : > { %v6416_v25 = vsel %vm6012_vm5, %v6410_v22, 0.0 }
0x1b99   : > { %6417 = vadd.xlane.f32.xlu0 %v6416_v25 }
0x1c1e   : > { %v6415_v11 = vpop.xlane.xlu0 %6414 }
0x1c1f   : > { %v6420_v26 = vmul.f32 0.015625, %v6415_v11 }
0x1c21   : > { %v6422_v27 = vsub.f32 %v6409_v3, %v6420_v26 }
0x1c22   : > { %v6418_v28 = vpop.xlane.xlu0 %6417 }
0x1c23   : > { %v6421_v59 = vmul.f32 0.015625, %v6418_v28  ;;  %v6424_v30 = vmul.f32 %v6422_v27, %v6422_v27 }
0x1c25   : > { %v6423_v16 = vsub.f32 %v6410_v22, %v6421_v59  ;;  %v6426_v62 = vsel %vm6012_vm5, %v6424_v30, 0.0 }
0x1c26   : > { %6427 = vadd.xlane.f32.xlu1 %v6426_v62 }
0x1c27   : > { %v6425_v19 = vmul.f32 %v6423_v16, %v6423_v16 }
0x1c29   : > { %v6429_v31 = vsel %vm6012_vm5, %v6425_v19, 0.0 }
0x1c2a   : > { %6430 = vadd.xlane.f32.xlu1 %v6429_v31 }
0x1caf   : > { %v6428_v32 = vpop.xlane.xlu1 %6427 }
0x1cb0   : > { %v6432_v34 = vmul.f32 0.015625, %v6428_v32 }
0x1cb2   : > { %v6434_v35 = vadd.f32 1e-05, %v6432_v34 }
0x1cb3   : > { %v6431_v33 = vpop.xlane.xlu1 %6430 }
0x1cb4   : > { %8529 = vrsqrt.f32 %v6434_v35  ;;  %v6433_v7 = vmul.f32 0.015625, %v6431_v33 }
0x1cb6   : > { %v6435_v36 = vadd.f32 1e-05, %v6433_v7 }
0x1cb8   : > { %8531 = vrsqrt.f32 %v6435_v36 }
0x1cc1   : > { %v8530_v60 = vpop.eup %8529 }
0x1cc2   : > { %v6438_v37 = vmul.f32 %v8530_v60, %v6422_v27 }
0x1cc4   : > { %v6446_v14 = vmul.f32 %v7290_v24, %v6438_v37 }
0x1cc5   : > { %v8532_v39 = vpop.eup %8531 }
0x1cc6   : > { %v6454_v29 = vadd.f32 %v7291_v38, %v6446_v14  ;;  %v6439_v40 = vmul.f32 %v8532_v39, %v6423_v16 }
0x1cc8   : > { %6456 = vst.msk [vmem:[#allocation2] sm:$0xff] %vm6012_vm5, %v6454_v29  ;;  %v6447_v58 = vmul.f32 %v7290_v24, %v6439_v40 }
0x1cca   : > { %v6455_v41 = vadd.f32 %v7291_v38, %v6447_v58 }
0x1ccc   : > { %6457 = vst.msk [vmem:[#allocation2 + $0x8] sm:$0xff] %vm6012_vm5, %v6455_v41 }
0x1ccd PF: > { %p6458_p5 = scmp.eq.s32.totalorder %s8603_s25, 1 }
0x1ccf   : > { %p6459_p6 = pnand %p6458_p5, %p6401_p3 }
0x1cd0   : > { %s9878_s30 = sld [smem:[#allocation29_spill]] (!%p6459_p6) }
0x1cd1   : > { %6462 = sbr.rel (%p6459_p6) target bundleno = 7798 (0x1e76), region = 151  ;;  %s9880_s7 = sld [smem:[#allocation18_spill]] (!%p6459_p6) }
0x1cd2   : > { %s9881_s6 = sld [smem:[#allocation28_spill]] (!%p6459_p6) }
0x1cd3   : > { %s9882_s24 = sld [smem:[#allocation31_spill]] (!%p6459_p6) }
0x1cd4   : > { %s9884_s4 = sld [smem:[#allocation30_spill]] (!%p6459_p6) }
0x1cd5   : > { %s9885_s23 = sld [smem:[#allocation32_spill]] (!%p6459_p6) }
0x1cd6   : > { %s9879_s16 = smov %s9878_s30  ;;  %v6492_v57 = vld [vmem:[%s9878_s30 + $0x8] sm:$0xff]  ;;  %v8620_v42 = vmov 0.0   ;;  %vm8621_vm6 = vmmov 0   ;;  %vm6493_vm7 = vcmask 130048   ;;  %v6463_v46 = vld [vmem:[#allocation2] sm:$0xff]  ;;  %vm6569_vm8 = vcmask 1041409  }
0x1cd7   : > { %8336 = vmatprep.subr.mxu1 %v8620_v42  ;;  %v6491_v43 = vld [vmem:[%s9879_s16] sm:$0xff]  ;;  %8340 = vmatprep.mubr.msk.f32.mxu1 %vm8621_vm6, %v8620_v42  ;;  %v6464_v47 = vld [vmem:[#allocation2 + $0x8] sm:$0xff]  ;;  %v6465_v48 = vsel %vm6012_vm5, %v6463_v46, 0.0  ;;  %vm6671_vm9 = vcmask 785408   ;;  %vm6745_vm10 = vcmask 58368  }
0x1cd8   : > { %8337 = vmatpush3.msra.mxu1 %v6492_v57  ;;  %v6490_v44 = vld [vmem:[%s9880_s7] sm:$0x3]  ;;  %8362 = vmatprep.subr.mxu0 %v8620_v42  ;;  %v6489_v45 = vld [vmem:[%s9881_s6 + $0x38] sm:$0xff]  ;;  %v6488_v49 = vld [vmem:[%s9881_s6 + $0x30] sm:$0xff]  ;;  %v6466_v50 = vrot.slane %v6465_v48, 4  ;;  %v6472_v51 = vsel %vm6012_vm5, %v6464_v47, 0.0 }
0x1cd9   : > { %8338 = vmatprep.subr.mxu1 %v8620_v42  ;;  %8386 = vmatprep.mubr.msk.f32.mxu0 %vm8621_vm6, %v8620_v42  ;;  %v6473_v52 = vrot.slane %v6472_v51, 4  ;;  %v6487_v53 = vld [vmem:[%s9881_s6 + $0x28] sm:$0xff]  ;;  %v6486_v63 = vld [vmem:[%s9881_s6 + $0x20] sm:$0xff]  ;;  %v6485_v2 = vld [vmem:[%s9881_s6 + $0x18] sm:$0xff]  ;;  %s9883_s7 = smov %s9882_s24 }
0x1cda   : > { %8339 = vmatpush3.msra.mxu1 %v6491_v43  ;;  %v6467_v54 = vadd.f32 %v6466_v50, %v6465_v48  ;;  %v6484_v6 = vld [vmem:[%s9881_s6 + $0x10] sm:$0xff]  ;;  %v6483_v10 = vld [vmem:[%s9881_s6 + $0x8] sm:$0xff]  ;;  %v6482_v15 = vld [vmem:[%s9881_s6] sm:$0xff] }
0x1cdb   : > { %8341 = vmatmul.mubr.msk.f32.vlgmr.msra.gmra.mxu1 %vm6493_vm7, %v6490_v44  ;;  %8343 = vmatprep.subr.mxu1 %v8620_v42  ;;  %v6474_v55 = vadd.f32 %v6473_v52, %v6472_v51  ;;  %v6663_v18 = vld [vmem:[%s9882_s24 + $0x58] sm:$0xff]  ;;  %v6662_v20 = vld [vmem:[%s9883_s7 + $0x50] sm:$0xff]  ;;  %v6661_v3 = vld [vmem:[%s9883_s7 + $0x48] sm:$0xff] }
0x1cdc   : > { %8344 = vmatpush3.msra.mxu1 %v6489_v45  ;;  %8359 = vmatprep.mubr.msk.f32.mxu1 %vm8621_vm6, %v8620_v42  ;;  %v6468_v0 = vrot.slane %v6467_v54, 2  ;;  %v6660_v21 = vld [vmem:[%s9883_s7 + $0x40] sm:$0xff]  ;;  %v6659_v22 = vld [vmem:[%s9883_s7 + $0x38] sm:$0xff]  ;;  %v6658_v23 = vld [vmem:[%s9883_s7 + $0x30] sm:$0xff] }
0x1cdd   : > { %8345 = vmatprep.subr.mxu1 %v8620_v42  ;;  %v6475_v1 = vrot.slane %v6474_v55, 2  ;;  %8363 = vmatpush3.msra.mxu0 %v6663_v18  ;;  %v6657_v25 = vld [vmem:[%s9883_s7 + $0x28] sm:$0xff]  ;;  %v6656_v11 = vld [vmem:[%s9883_s7 + $0x20] sm:$0xff]  ;;  %v6655_v26 = vld [vmem:[%s9883_s7 + $0x18] sm:$0xff] }
0x1cde   : > { %8346 = vmatpush3.msra.mxu1 %v6488_v49  ;;  %v6469_v4 = vadd.f32 %v6468_v0, %v6467_v54  ;;  %8364 = vmatprep.subr.mxu0 %v8620_v42  ;;  %v6654_v27 = vld [vmem:[%s9883_s7 + $0x10] sm:$0xff]  ;;  %v6653_v28 = vld [vmem:[%s9883_s7 + $0x8] sm:$0xff]  ;;  %v6652_v59 = vld [vmem:[%s9883_s7] sm:$0xff] }
0x1cdf   : > { %8347 = vmatprep.subr.mxu1 %v8620_v42  ;;  %v6476_v5 = vadd.f32 %v6475_v1, %v6474_v55  ;;  %8365 = vmatpush3.msra.mxu0 %v6662_v20  ;;  %v7294_v19 = vld [vmem:[%s9884_s4] ss:$0 sm:$0xff] }
0x1ce0   : > { %8348 = vmatpush3.msra.mxu1 %v6487_v53  ;;  %v6470_v8 = vrot.slane %v6469_v4, 1  ;;  %8366 = vmatprep.subr.mxu0 %v8620_v42  ;;  %v7295_v33 = vld [vmem:[%s9885_s23] ss:$0 sm:$0xff] }
0x1ce1   : > { %8349 = vmatprep.subr.mxu1 %v8620_v42  ;;  %v6477_v9 = vrot.slane %v6476_v5, 1  ;;  %8367 = vmatpush3.msra.mxu0 %v6661_v3 }
0x1ce2   : > { %8350 = vmatpush3.msra.mxu1 %v6486_v63  ;;  %v6471_v12 = vadd.f32 %v6470_v8, %v6469_v4  ;;  %8368 = vmatprep.subr.mxu0 %v8620_v42 }
0x1ce3   : > { %8351 = vmatprep.subr.mxu1 %v8620_v42  ;;  %v6478_v13 = vadd.f32 %v6477_v9, %v6476_v5  ;;  %8369 = vmatpush3.msra.mxu0 %v6660_v21 }
0x1ce4   : > { %8352 = vmatpush3.msra.mxu1 %v6485_v2  ;;  %v6480_v56 = vmul.f32 0.125, %v6471_v12  ;;  %8370 = vmatprep.subr.mxu0 %v8620_v42 }
0x1ce5   : > { %8353 = vmatprep.subr.mxu1 %v8620_v42  ;;  %v6481_v61 = vmul.f32 0.125, %v6478_v13  ;;  %8371 = vmatpush3.msra.mxu0 %v6659_v22 }
0x1ce6   : > { %8354 = vmatpush3.msra.mxu1 %v6484_v6  ;;  %8372 = vmatprep.subr.mxu0 %v8620_v42 }
0x1ce7   : > { %8355 = vmatprep.subr.mxu1 %v8620_v42  ;;  %v6570_v17 = vsel %vm6569_vm8, %v6481_v61, %v6480_v56  ;;  %8373 = vmatpush3.msra.mxu0 %v6658_v23 }
0x1ce8   : > { %8356 = vmatpush3.msra.mxu1 %v6483_v10  ;;  %8374 = vmatprep.subr.mxu0 %v8620_v42 }
0x1ce9   : > { %8357 = vmatprep.subr.mxu1 %v8620_v42  ;;  %8375 = vmatpush3.msra.mxu0 %v6657_v25 }
0x1cea   : > { %8358 = vmatpush3.msra.mxu1 %v6482_v15  ;;  %8376 = vmatprep.subr.mxu0 %v8620_v42 }
0x1ceb   : > { %8360 = vmatmul.mubr.msk.f32.vlgmr.msra.gmra.mxu1 %vm6012_vm5, %v6570_v17  ;;  %8377 = vmatpush3.msra.mxu0 %v6656_v11 }
0x1cec   : > { %8378 = vmatprep.subr.mxu0 %v8620_v42 }
0x1ced   : > { %8379 = vmatpush3.msra.mxu0 %v6655_v26 }
0x1cee   : > { %8380 = vmatprep.subr.mxu0 %v8620_v42 }
0x1cef   : > { %8381 = vmatpush3.msra.mxu0 %v6654_v27 }
0x1cf0   : > { %8382 = vmatprep.subr.mxu0 %v8620_v42 }
0x1cf1   : > { %8383 = vmatpush3.msra.mxu0 %v6653_v28 }
0x1cf2   : > { %8384 = vmatprep.subr.mxu0 %v8620_v42 }
0x1cf3   : > { %8385 = vmatpush3.msra.mxu0 %v6652_v59 }
0x1d9b   : > { %v6563_v30 = vpop.f32.mrf.mxu1 }
0x1d9d   : > { %v8342_v16 = vpop.f32.mrf.mxu1 }
0x1dab   : > { %v6639_v62 = vpop.f32.mrf.mxu1 }
0x1dac   : > { %v6640_v31 = vadd.f32 %v6639_v62, %v6563_v30 }
0x1dad   : > { %v8361_v32 = vpop.f32.mrf.mxu1 }
0x1dae   : > { %v6650_v34 = vadd.f32 %v7294_v19, %v6640_v31 }
0x1db0   : > { %v6651_v35 = vmax.f32 %v6650_v34, 0.0 }
0x1db2   : > { %8387 = vmatmul.mubr.msk.f32.vlgmr.msra.gmra.mxu0 %vm6671_vm9, %v6651_v35 }
0x1e72   : > { %v6741_v7 = vpop.f32.mrf.mxu0 }
0x1e73   : > { %v6742_v36 = vadd.f32 %v7295_v33, %v6741_v7 }
0x1e74   : > { %v8388_v60 = vpop.f32.mrf.mxu0 }
0x1e75   : > { %6746 = vst.msk [vmem:[#allocation5] sm:$0x3] %vm6745_vm10, %v6742_v36 }
0x1e76 PF: > { %s9886_s8 = sld [smem:[#allocation11_spill]]  ;;  %s8622_s1 = smov [#allocation5]  }
0x1e77   : > { %s6754_s22 = sshll.u32 %s8622_s1, 4  ;;  %s6755_s22 = int_to_ptr.vmem [resolvable:$true] %s6754_s22 }
0x1e78   : > { %s8533_s30 = scalar_lea.vmem %s6755_s22, 32  ;;  %p8540_p11 = scmp.lt.s32.totalorder %s6755_s22, %s6755_s22 }
0x1e79   : > { %p8534_p8 = scmp.ne.s32.totalorder %s6755_s22, %s8533_s30  ;;  %p8541_p12 = scmp.lt.s32.totalorder %s8533_s30, %s8533_s30 }
0x1e7b   : > { %p8542_p13 = por %p8541_p12, %p8540_p11 }
0x1e7c   : > { %s9887_s21 = sadd.s32 4294967295, %s9886_s8  }
0x1e7d   : > { %p9761_p7 = scmp.eq.s32.totalorder %s9887_s21, 7 }
0x1e7f   : > { %p8535_p9 = pnand %p8534_p8, %p9761_p7 }
0x1e81   : > { %p8536_p10 = pneg %p8535_p9 }
0x1e83   : > { %p8543_p0 = pnand %p8542_p13, %p8536_p10 }
0x1e85   : > { %8546 = shalt.err (!%p8543_p0)
}
0x1e86   : > { %s9889_s25 = sld [smem:[#allocation33_spill]] }
0x1e8c   : > { %8390 = dma.vmem_to_hbm [thread:$0]  (%p9761_p7), %s6755_s22, 32, %s9889_s25, [#allocation6]  }
0x1e8d   : > { %8586 = dma.done.wait (%p9761_p7), [#allocation6], 32  }
0x1e8e   : > { %8588 = vsyncadd (%p9761_p7), [#allocation6], 4294967264 }
0x1e8f PF: > { %s9890_s24 = sld [smem:[#allocation11_spill]] }
0x1e90   : > { %s9891_s4 = sld [smem:[#allocation8_spill]] }
0x1e91   : > { %s9892_s30 = sld [smem:[#allocation14_spill]] }
0x1e92   : > { %s9894_s25 = sld [smem:[#allocation10_spill]] }
0x1e93   : > { %s9895_s5 = sld [smem:[#allocation12_spill]] }
0x1e94   : > { %s9896_s1 = sld [smem:[#allocation13_spill]] }
0x1e95   : > { %s34_s26 = sadd.s32 1, %s9890_s24   ;;  %s9893_s24 = sld [smem:[#allocation9_spill]] }
0x1e96   : > { %p31_p1 = scmp.ge.s32.totalorder %s34_s26, 10  }
0x1e98   :  { %33 = sbr.rel (!%p31_p1) target bundleno = 22 (0x16), region = 257 }
0x1e9d   :  { %6767 = vsyncpa [#allocation6], 1 }
0x1e9e   :  { %6769 = vsyncpa [#allocation6 + $0x1], 1 }

</bundles_post_ra>
